<compile_context>
chip_gen: v7x
topology: tpu7x:2x2x1
jax: 0.10.0
libtpu: 0.0.40
codegen_flags: <defaults>
</compile_context>

<pallas_src>
import jax
import jax.numpy as jnp
from jax.experimental import pallas as pl
from jax.experimental.pallas import tpu as pltpu

C_IN, C_H1, C_H2, N_CLASSES = 1472, 368, 92, 21


def _fc_classifier_kernel(x_ref, w1_ref, b1_ref, w2_ref, b2_ref, w3_ref, b3_ref,
                          o_ref):
    # x_ref: (1, C_IN, TP) tile, pixels on lanes (bf16 on the recommended path).
    # Weights: (C_out, C_in) bf16, normalization folded into w1/b1.
    # Biases: (C_out, 1) f32.  Accumulation in f32 on the MXU.
    x = x_ref[0]                                                       # (C_IN, TP)
    if x.dtype != jnp.bfloat16:        # trace-time check; no-op for bf16 inputs
        x = x.astype(jnp.bfloat16)

    h1 = jnp.dot(w1_ref[...], x, preferred_element_type=jnp.float32)
    h1 = jnp.maximum(h1 + b1_ref[...], 0.0).astype(jnp.bfloat16)       # (C_H1, TP)

    h2 = jnp.dot(w2_ref[...], h1, preferred_element_type=jnp.float32)
    h2 = jnp.maximum(h2 + b2_ref[...], 0.0).astype(jnp.bfloat16)       # (C_H2, TP)

    out = jnp.dot(w3_ref[...], h2, preferred_element_type=jnp.float32)
    o_ref[0] = out + b3_ref[...]                                       # (21, TP)


@jax.jit
def fc_classifier_forward(x_nchw, mean, std, w1, b1, w2, b2, w3, b3):
    """x_nchw: (N, 1472, H, W), ideally bf16 (f32 accepted).  Weights in PyTorch
    nn.Linear layout (C_out, C_in), biases (C_out,), mean/std (1472,) f32.
    Returns (N, 21, H, W) f32 logits."""
    n, c, h, w = x_nchw.shape
    assert c == C_IN
    p = h * w

    # Fold normalization into layer 1 (identical affine map):
    #   W1 @ ((x - mean)/std) + b1 == (W1/std) @ x + (b1 - (W1/std) @ mean)
    # b1 is derived from the *bf16-quantized* folded weights so bias and MXU
    # weights match exactly.
    inv_std = (1.0 / std).astype(jnp.float32)
    w1_bf = (w1 * inv_std[None, :]).astype(jnp.bfloat16)
    b1_eff = b1.astype(jnp.float32) - w1_bf.astype(jnp.float32) @ mean
    w2_bf = w2.astype(jnp.bfloat16)
    w3_bf = w3.astype(jnp.bfloat16)
    b1c = b1_eff.reshape(C_H1, 1)
    b2c = b2.reshape(C_H2, 1).astype(jnp.float32)
    b3c = b3.reshape(N_CLASSES, 1).astype(jnp.float32)

    # NCHW kept as-is: pure reshape (no transpose, no pad) to (N, C, P),
    # pixels on the lane axis.
    x_rows = x_nchw.reshape(n, c, p)

    # Pixel tile: 2048 lanes for bf16 activations, 1024 for legacy f32 inputs
    # (keeps the double-buffered x tile comfortably inside v7x's 64 MiB VMEM).
    tp_max = 2048 if x_rows.dtype.itemsize <= 2 else 1024
    tp = p if p <= tp_max else tp_max          # full-dim block allowed if small
    grid = (n, pl.cdiv(p, tp))                 # ragged last tile handled by
                                               # Pallas' clipped boundary blocks

    const = lambda i, j: (0, 0)                # weights/biases: resident block
    tile = lambda i, j: (i, 0, j)              # (batch, all channels, pixel tile)
    resident = pl.Buffered(1)                  # single buffer for constants

    out = pl.pallas_call(
        _fc_classifier_kernel,
        out_shape=jax.ShapeDtypeStruct((n, N_CLASSES, p), jnp.float32),
        grid_spec=pltpu.PrefetchScalarGridSpec(
            num_scalar_prefetch=0,
            grid=grid,
            in_specs=[
                pl.BlockSpec((1, C_IN, tp), tile),                              # x
                pl.BlockSpec((C_H1, C_IN), const, pipeline_mode=resident),      # w1
                pl.BlockSpec((C_H1, 1), const, pipeline_mode=resident),         # b1
                pl.BlockSpec((C_H2, C_H1), const, pipeline_mode=resident),      # w2
                pl.BlockSpec((C_H2, 1), const, pipeline_mode=resident),         # b2
                pl.BlockSpec((N_CLASSES, C_H2), const, pipeline_mode=resident), # w3
                pl.BlockSpec((N_CLASSES, 1), const, pipeline_mode=resident),    # b3
            ],
            out_specs=pl.BlockSpec((1, N_CLASSES, tp), tile),
        ),
        compiler_params=pltpu.CompilerParams(
            dimension_semantics=("parallel", "parallel"),
            vmem_limit_bytes=48 * 1024 * 1024),
    )(x_rows, w1_bf, b1c, w2_bf, b2c, w3_bf, b3c)

    return out.reshape(n, N_CLASSES, h, w)


def _reference_forward(x_nchw, mean, std, w1, b1, w2, b2, w3, b3):
    # Pure-JAX f32 reference in PyTorch semantics (Linear over the channel dim).
    x = jnp.transpose(x_nchw.astype(jnp.float32), (0, 2, 3, 1))        # NHWC
    x = (x - mean) / std
    h1 = jnp.maximum(x @ w1.T + b1, 0.0)
    h2 = jnp.maximum(h1 @ w2.T + b2, 0.0)
    out = h2 @ w3.T + b3
    return jnp.transpose(out, (0, 3, 1, 2))


if __name__ == "__main__":
    key = jax.random.PRNGKey(0)
    kx, km, ks, k1, kb1, k2, kb2, k3, kb3 = jax.random.split(key, 9)

    # Small spatial extent; channel dims fixed by the module (1472/368/92/21).
    N, H, W = 2, 16, 16
    # Upstream zoomout feature producer emits bf16 (per perf review): the bf16
    # values ARE the input; no standalone f32->bf16 cast op in the pipeline.
    x = jax.random.normal(kx, (N, C_IN, H, W), dtype=jnp.float32).astype(jnp.bfloat16)

    # Synthetic stand-ins for features/mean.npy, features/std.npy and the
    # trained nn.Linear parameters (PyTorch layout: weight (C_out, C_in)).
    mean = jax.random.normal(km, (C_IN,), dtype=jnp.float32) * 0.1
    std = jnp.abs(jax.random.normal(ks, (C_IN,), dtype=jnp.float32)) + 0.5

    w1 = jax.random.normal(k1, (C_H1, C_IN), dtype=jnp.float32) * 0.02
    b1 = jax.random.normal(kb1, (C_H1,), dtype=jnp.float32) * 0.01
    w2 = jax.random.normal(k2, (C_H2, C_H1), dtype=jnp.float32) * 0.05
    b2 = jax.random.normal(kb2, (C_H2,), dtype=jnp.float32) * 0.01
    w3 = jax.random.normal(k3, (N_CLASSES, C_H2), dtype=jnp.float32) * 0.1
    b3 = jax.random.normal(kb3, (N_CLASSES,), dtype=jnp.float32) * 0.01

    out = fc_classifier_forward(x, mean, std, w1, b1, w2, b2, w3, b3)
    out = jax.block_until_ready(out)
    assert out.shape == (N, N_CLASSES, H, W), out.shape

    ref = _reference_forward(x, mean, std, w1, b1, w2, b2, w3, b3)
    # bf16 weights/activations on the MXU -> relaxed tolerance vs f32 reference.
    max_err = float(jnp.max(jnp.abs(out - ref)))
    assert jnp.allclose(out, ref, atol=5e-2, rtol=5e-2), f"mismatch: {max_err}"

    print("KERNEL_OK")
</pallas_src>

<mosaic_0001>
module attributes {stable_mosaic.version = 11 : i64} {
  func.func @_fc_classifier_kernel(%arg0: i32, %arg1: i32, %arg2: memref<1x1472x256xbf16, #tpu.memory_space<vmem>>, %arg3: memref<368x1472xbf16, #tpu.memory_space<vmem>>, %arg4: memref<368x1xf32, #tpu.memory_space<vmem>>, %arg5: memref<92x368xbf16, #tpu.memory_space<vmem>>, %arg6: memref<92x1xf32, #tpu.memory_space<vmem>>, %arg7: memref<21x92xbf16, #tpu.memory_space<vmem>>, %arg8: memref<21x1xf32, #tpu.memory_space<vmem>>, %arg9: memref<1x21x256xf32, #tpu.memory_space<vmem>>) attributes {dimension_semantics = [#tpu.dimension_semantics<parallel>, #tpu.dimension_semantics<parallel>], iteration_bounds = array<i64: 2, 1>, scalar_prefetch = 0 : i64, scratch_operands = 0 : i64, tpu.core_type = #tpu.core_type<tc>, window_params = [{transform_indices = @transform_0, window_bounds = array<i64: 1, 1472, 256>}, {pipeline_mode = #tpu.pipeline_mode<synchronous>, transform_indices = @transform_1, window_bounds = array<i64: 368, 1472>}, {pipeline_mode = #tpu.pipeline_mode<synchronous>, transform_indices = @transform_2, window_bounds = array<i64: 368, 1>}, {pipeline_mode = #tpu.pipeline_mode<synchronous>, transform_indices = @transform_3, window_bounds = array<i64: 92, 368>}, {pipeline_mode = #tpu.pipeline_mode<synchronous>, transform_indices = @transform_4, window_bounds = array<i64: 92, 1>}, {pipeline_mode = #tpu.pipeline_mode<synchronous>, transform_indices = @transform_5, window_bounds = array<i64: 21, 92>}, {pipeline_mode = #tpu.pipeline_mode<synchronous>, transform_indices = @transform_6, window_bounds = array<i64: 21, 1>}, {transform_indices = @transform_7, window_bounds = array<i64: 1, 21, 256>}]} {
    %c0 = arith.constant 0 : index
    %c0_0 = arith.constant 0 : index
    %c0_1 = arith.constant 0 : index
    %0 = vector.load %arg2[%c0, %c0_0, %c0_1] : memref<1x1472x256xbf16, #tpu.memory_space<vmem>>, vector<1x1472x256xbf16>
    %1 = vector.shape_cast %0 : vector<1x1472x256xbf16> to vector<1472x256xbf16>
    %c0_2 = arith.constant 0 : index
    %c0_3 = arith.constant 0 : index
    %2 = vector.load %arg3[%c0_2, %c0_3] : memref<368x1472xbf16, #tpu.memory_space<vmem>>, vector<368x1472xbf16>
    %cst = arith.constant dense<0.000000e+00> : vector<368x256xf32>
    %3 = tpu.matmul %2, %1, %cst {dimension_numbers = #tpu.dot_dimension_numbers<[1], [0], [0], [1], [0, 0, 1, 1], [], []>} : vector<368x1472xbf16>, vector<1472x256xbf16>, vector<368x256xf32> -> vector<368x256xf32>
    %c0_4 = arith.constant 0 : index
    %c0_5 = arith.constant 0 : index
    %4 = vector.load %arg4[%c0_4, %c0_5] : memref<368x1xf32, #tpu.memory_space<vmem>>, vector<368x1xf32>
    %5 = vector.broadcast %4 : vector<368x1xf32> to vector<368x256xf32>
    %6 = arith.addf %3, %5 : vector<368x256xf32>
    %cst_6 = arith.constant 0.000000e+00 : f32
    %7 = vector.broadcast %cst_6 : f32 to vector<368x256xf32>
    %8 = arith.maximumf %6, %7 : vector<368x256xf32>
    %9 = arith.truncf %8 : vector<368x256xf32> to vector<368x256xbf16>
    %c0_7 = arith.constant 0 : index
    %c0_8 = arith.constant 0 : index
    %10 = vector.load %arg5[%c0_7, %c0_8] : memref<92x368xbf16, #tpu.memory_space<vmem>>, vector<92x368xbf16>
    %cst_9 = arith.constant dense<0.000000e+00> : vector<92x256xf32>
    %11 = tpu.matmul %10, %9, %cst_9 {dimension_numbers = #tpu.dot_dimension_numbers<[1], [0], [0], [1], [0, 0, 1, 1], [], []>} : vector<92x368xbf16>, vector<368x256xbf16>, vector<92x256xf32> -> vector<92x256xf32>
    %c0_10 = arith.constant 0 : index
    %c0_11 = arith.constant 0 : index
    %12 = vector.load %arg6[%c0_10, %c0_11] : memref<92x1xf32, #tpu.memory_space<vmem>>, vector<92x1xf32>
    %13 = vector.broadcast %12 : vector<92x1xf32> to vector<92x256xf32>
    %14 = arith.addf %11, %13 : vector<92x256xf32>
    %cst_12 = arith.constant 0.000000e+00 : f32
    %15 = vector.broadcast %cst_12 : f32 to vector<92x256xf32>
    %16 = arith.maximumf %14, %15 : vector<92x256xf32>
    %17 = arith.truncf %16 : vector<92x256xf32> to vector<92x256xbf16>
    %c0_13 = arith.constant 0 : index
    %c0_14 = arith.constant 0 : index
    %18 = vector.load %arg7[%c0_13, %c0_14] : memref<21x92xbf16, #tpu.memory_space<vmem>>, vector<21x92xbf16>
    %cst_15 = arith.constant dense<0.000000e+00> : vector<21x256xf32>
    %19 = tpu.matmul %18, %17, %cst_15 {dimension_numbers = #tpu.dot_dimension_numbers<[1], [0], [0], [1], [0, 0, 1, 1], [], []>} : vector<21x92xbf16>, vector<92x256xbf16>, vector<21x256xf32> -> vector<21x256xf32>
    %c0_16 = arith.constant 0 : index
    %c0_17 = arith.constant 0 : index
    %20 = vector.load %arg8[%c0_16, %c0_17] : memref<21x1xf32, #tpu.memory_space<vmem>>, vector<21x1xf32>
    %21 = vector.broadcast %20 : vector<21x1xf32> to vector<21x256xf32>
    %22 = arith.addf %19, %21 : vector<21x256xf32>
    %c0_18 = arith.constant 0 : index
    %c0_19 = arith.constant 0 : index
    %c0_20 = arith.constant 0 : index
    %23 = vector.load %arg9[%c0_18, %c0_19, %c0_20] : memref<1x21x256xf32, #tpu.memory_space<vmem>>, vector<1x21x256xf32>
    %24 = vector.shape_cast %23 : vector<1x21x256xf32> to vector<21x256xf32>
    %25 = vector.shape_cast %22 : vector<21x256xf32> to vector<1x21x256xf32>
    tpu.vector_store %arg9[%c0_18, %c0_19, %c0_20], %25 {strides = array<i32>} : memref<1x21x256xf32, #tpu.memory_space<vmem>>, vector<1x21x256xf32>,
    return
  }
  func.func @transform_0(%arg0: i32, %arg1: i32) -> (i32, i32, i32) {
    %c0_i32 = arith.constant 0 : i32
    %c0_i32_0 = arith.constant 0 : i32
    return %arg0, %c0_i32, %arg1 : i32, i32, i32
  }
  func.func @transform_1(%arg0: i32, %arg1: i32) -> (i32, i32) {
    %c0_i32 = arith.constant 0 : i32
    %c0_i32_0 = arith.constant 0 : i32
    %c0_i32_1 = arith.constant 0 : i32
    return %c0_i32, %c0_i32_0 : i32, i32
  }
  func.func @transform_2(%arg0: i32, %arg1: i32) -> (i32, i32) {
    %c0_i32 = arith.constant 0 : i32
    %c0_i32_0 = arith.constant 0 : i32
    %c0_i32_1 = arith.constant 0 : i32
    return %c0_i32, %c0_i32_0 : i32, i32
  }
  func.func @transform_3(%arg0: i32, %arg1: i32) -> (i32, i32) {
    %c0_i32 = arith.constant 0 : i32
    %c0_i32_0 = arith.constant 0 : i32
    %c0_i32_1 = arith.constant 0 : i32
    return %c0_i32, %c0_i32_0 : i32, i32
  }
  func.func @transform_4(%arg0: i32, %arg1: i32) -> (i32, i32) {
    %c0_i32 = arith.constant 0 : i32
    %c0_i32_0 = arith.constant 0 : i32
    %c0_i32_1 = arith.constant 0 : i32
    return %c0_i32, %c0_i32_0 : i32, i32
  }
  func.func @transform_5(%arg0: i32, %arg1: i32) -> (i32, i32) {
    %c0_i32 = arith.constant 0 : i32
    %c0_i32_0 = arith.constant 0 : i32
    %c0_i32_1 = arith.constant 0 : i32
    return %c0_i32, %c0_i32_0 : i32, i32
  }
  func.func @transform_6(%arg0: i32, %arg1: i32) -> (i32, i32) {
    %c0_i32 = arith.constant 0 : i32
    %c0_i32_0 = arith.constant 0 : i32
    %c0_i32_1 = arith.constant 0 : i32
    return %c0_i32, %c0_i32_0 : i32, i32
  }
  func.func @transform_7(%arg0: i32, %arg1: i32) -> (i32, i32, i32) {
    %c0_i32 = arith.constant 0 : i32
    %c0_i32_0 = arith.constant 0 : i32
    return %arg0, %c0_i32, %arg1 : i32, i32, i32
  }
}

</mosaic_0001>

<bundles_post_ra>
// kernel: sub.1
= control target key start
LH: loop header
LB: loop body
LE: loop exit
PB: predicated region body
PF: predicated region fallthrough
CT: control target
= control target key end

     0   :  { %s34_s0 = inlined_call_operand.vmem [shape: f32[368], index: 0, kind: input, shape index: {}]   ;;  %s35_s1 = inlined_call_operand.vmem [shape: f32[368], index: 1, kind: input, shape index: {}]   ;;  %s36_s2 = inlined_call_operand.vmem [shape: f32[368], index: 2, kind: output, shape index: {}]  }
   0x1   :  { %v3_v0 = vld [vmem:[%s34_s0] sm:$0x7] }
   0x2   :  { %v4_v1 = vld [vmem:[%s35_s1] sm:$0x7] }
   0x3   :  { %v7_v2 = vsub.f32 %v3_v0, %v4_v1 }
   0x5   :  { %9 = vst [vmem:[%s36_s2] sm:$0xf] %v7_v2 }

// kernel: fc_classifier_forward.1
= control target key start
LH: loop header
LB: loop body
LE: loop exit
PB: predicated region body
PF: predicated region fallthrough
CT: control target
= control target key end

     0   :  { %s7695_s24 = smov 0   ;;  %s7697_s25 = smov 0   ;;  %s9552_s0 = inlined_call_operand.vmem [shape: bf16[2,1472,256], index: 0, kind: input, shape index: {}]   ;;  %s9553_s1 = inlined_call_operand.vmem [shape: bf16[368,1472], index: 1, kind: input, shape index: {}]   ;;  %s9554_s2 = inlined_call_operand.vmem [shape: f32[368,1], index: 2, kind: input, shape index: {}]   ;;  %s9555_s3 = inlined_call_operand.vmem [shape: bf16[92,368], index: 3, kind: input, shape index: {}]   ;;  %s9556_s4 = inlined_call_operand.vmem [shape: f32[92,1], index: 4, kind: input, shape index: {}]   ;;  %s9557_s5 = inlined_call_operand.vmem [shape: bf16[21,92], index: 5, kind: input, shape index: {}]   ;;  %s9558_s6 = inlined_call_operand.vmem [shape: f32[21,1], index: 6, kind: input, shape index: {}]   ;;  %s9559_s7 = inlined_call_operand.vmem [shape: f32[2,21,256], index: 7, kind: output, shape index: {}]  }
   0x1   :  { %s7699_s26 = smov 0  }
   0x2 LB: > { %s29_s27 = sadd.s32 1, %s7648_s25  ;;  %p5736_p0 = scmp.ge.s32.totalorder %s7652_s26, 1  ;;  %s7652_s26 = sphi %s7699_s26, %s17_s26   ;;  %s7648_s25 = sphi %s7697_s25, %s9730_s25   ;;  %s7644_s24 = sphi %s7695_s24, %s9729_s24  }
   0x3   : > { %p31_p1 = scmp.ge.s32.totalorder %s29_s27, 2  ;;  %p258_p2 = scmp.lt.s32.totalorder %s7652_s26, 3 }
   0x5   : > { %s9732_s27 = smov (%p31_p1, %s29_s27), 0  ;;  %p259_p3 = pnand %p5736_p0, %p258_p2 }
   0x7   : > { %262 = sbr.rel (%p259_p3) target bundleno = 1400 (0x578), region = 48 }
   0xe   : > { %p299_p4 = scmp.lt.s32.totalorder %s7644_s24, 1  ;;  %v7012_v0 = vld [vmem:[%s9553_s1 + $0x4] ss:$48 sps:$4 sm:$0xff]   ;;  %vm3332_vm0 = vcmask 523264   ;;  %vm5304_vm1 = vcmask 916480   ;;  %vm5581_vm2 = vcmask 1045504  }
   0xf   : > { %v7015_v1 = vld [vmem:[%s9553_s1 + $0x14] ss:$48 sps:$4 sm:$0xff]   ;;  %3434 = vmatprep.mubr.bf16.mxu1 %v7012_v0  ;;  %vm5574_vm3 = vcmask 752640  }
  0x10   : > { %s9734_s24 = smov (!%p299_p4, %s7644_s24), 1  ;;  %3960 = vmatprep.mubr.bf16.mxu0 %v7015_v1 }
  0x11   : > { %s6885_s9 = smul.u32 1472, %s9734_s24 }
  0x12   : > { %s6886_s11 = smul.u32 48, %s9734_s24 }
  0x13   : > { %s7725_s12 = scalar_lea.vmem %s9552_s0, %s6885_s9 }
  0x14   : > { %v6914_v2 = vld [vmem:[%s7725_s12 + $0x4] ss:$8 sps:$4 sm:$0xff]   ;;  %v6918_v4 = vld [vmem:[%s7725_s12] ss:$8 sps:$4 sm:$0xff]   ;;  %v6920_v6 = vld [vmem:[%s7725_s12 + $0x14] ss:$8 sps:$4 sm:$0xff]   ;;  %s316_s15 = scalar_lea.vmem %s9559_s7, %s6886_s11 }
  0x15   : > { %v6916_v3 = vld [vmem:[%s7725_s12 + $0x204] ss:$8 sps:$4 sm:$0xff]   ;;  %3402 = vmatprep.subr.bf16.mxu1 %v6914_v2  ;;  %v6919_v5 = vld [vmem:[%s7725_s12 + $0x200] ss:$8 sps:$4 sm:$0xff]   ;;  %v6922_v7 = vld [vmem:[%s7725_s12 + $0x214] ss:$8 sps:$4 sm:$0xff]  }
  0x16   : > { %3928 = vmatprep.subr.bf16.mxu0 %v6916_v3  ;;  %3403 = vmatpush1.bf16.msra.mxu1 %v6918_v4  ;;  %v6924_v8 = vld [vmem:[%s7725_s12 + $0x10] ss:$8 sps:$4 sm:$0xff]   ;;  %v6926_v10 = vld [vmem:[%s7725_s12 + $0x24] ss:$8 sps:$4 sm:$0xff]   ;;  %v6930_v12 = vld [vmem:[%s7725_s12 + $0x20] ss:$8 sps:$4 sm:$0xff]  }
  0x17   : > { %3929 = vmatpush1.bf16.msra.mxu0 %v6919_v5  ;;  %3404 = vmatprep.subr.bf16.mxu1 %v6920_v6  ;;  %v6925_v9 = vld [vmem:[%s7725_s12 + $0x210] ss:$8 sps:$4 sm:$0xff]   ;;  %v6928_v11 = vld [vmem:[%s7725_s12 + $0x224] ss:$8 sps:$4 sm:$0xff]   ;;  %v6931_v13 = vld [vmem:[%s7725_s12 + $0x220] ss:$8 sps:$4 sm:$0xff]  }
  0x18   : > { %3930 = vmatprep.subr.bf16.mxu0 %v6922_v7  ;;  %v6932_v14 = vld [vmem:[%s7725_s12 + $0x34] ss:$8 sps:$4 sm:$0xff]   ;;  %v6936_v16 = vld [vmem:[%s7725_s12 + $0x30] ss:$8 sps:$4 sm:$0xff]   ;;  %v6938_v18 = vld [vmem:[%s7725_s12 + $0x44] ss:$8 sps:$4 sm:$0xff]  }
  0x19   : > { %v6934_v15 = vld [vmem:[%s7725_s12 + $0x234] ss:$8 sps:$4 sm:$0xff]   ;;  %v6937_v17 = vld [vmem:[%s7725_s12 + $0x230] ss:$8 sps:$4 sm:$0xff]   ;;  %v6940_v19 = vld [vmem:[%s7725_s12 + $0x244] ss:$8 sps:$4 sm:$0xff]  }
  0x1a   : > { %3405 = vmatpush1.bf16.msra.mxu1 %v6924_v8  ;;  %v6942_v20 = vld [vmem:[%s7725_s12 + $0x40] ss:$8 sps:$4 sm:$0xff]   ;;  %v6944_v22 = vld [vmem:[%s7725_s12 + $0x54] ss:$8 sps:$4 sm:$0xff]   ;;  %v6948_v24 = vld [vmem:[%s7725_s12 + $0x50] ss:$8 sps:$4 sm:$0xff]  }
  0x1b   : > { %3931 = vmatpush1.bf16.msra.mxu0 %v6925_v9  ;;  %3406 = vmatprep.subr.bf16.mxu1 %v6926_v10  ;;  %v6943_v21 = vld [vmem:[%s7725_s12 + $0x240] ss:$8 sps:$4 sm:$0xff]   ;;  %v6946_v23 = vld [vmem:[%s7725_s12 + $0x254] ss:$8 sps:$4 sm:$0xff]   ;;  %v6949_v25 = vld [vmem:[%s7725_s12 + $0x250] ss:$8 sps:$4 sm:$0xff]  }
  0x1c   : > { %3932 = vmatprep.subr.bf16.mxu0 %v6928_v11  ;;  %v6950_v26 = vld [vmem:[%s7725_s12 + $0x64] ss:$8 sps:$4 sm:$0xff]   ;;  %v6954_v28 = vld [vmem:[%s7725_s12 + $0x60] ss:$8 sps:$4 sm:$0xff]   ;;  %v6956_v30 = vld [vmem:[%s7725_s12 + $0x74] ss:$8 sps:$4 sm:$0xff]  }
  0x1d   : > { %v6952_v27 = vld [vmem:[%s7725_s12 + $0x264] ss:$8 sps:$4 sm:$0xff]   ;;  %v6955_v29 = vld [vmem:[%s7725_s12 + $0x260] ss:$8 sps:$4 sm:$0xff]   ;;  %v6958_v31 = vld [vmem:[%s7725_s12 + $0x274] ss:$8 sps:$4 sm:$0xff]  }
  0x1e   : > { %3407 = vmatpush1.bf16.msra.mxu1 %v6930_v12  ;;  %v6960_v32 = vld [vmem:[%s7725_s12 + $0x70] ss:$8 sps:$4 sm:$0xff]   ;;  %v6962_v34 = vld [vmem:[%s7725_s12 + $0x84] ss:$8 sps:$4 sm:$0xff]   ;;  %v6966_v36 = vld [vmem:[%s7725_s12 + $0x80] ss:$8 sps:$4 sm:$0xff]  }
  0x1f   : > { %3933 = vmatpush1.bf16.msra.mxu0 %v6931_v13  ;;  %3408 = vmatprep.subr.bf16.mxu1 %v6932_v14  ;;  %v6961_v33 = vld [vmem:[%s7725_s12 + $0x270] ss:$8 sps:$4 sm:$0xff]   ;;  %v6964_v35 = vld [vmem:[%s7725_s12 + $0x284] ss:$8 sps:$4 sm:$0xff]   ;;  %v6967_v37 = vld [vmem:[%s7725_s12 + $0x280] ss:$8 sps:$4 sm:$0xff]  }
  0x20   : > { %3934 = vmatprep.subr.bf16.mxu0 %v6934_v15  ;;  %v6968_v38 = vld [vmem:[%s7725_s12 + $0x94] ss:$8 sps:$4 sm:$0xff]   ;;  %v6972_v40 = vld [vmem:[%s7725_s12 + $0x90] ss:$8 sps:$4 sm:$0xff]   ;;  %v6974_v42 = vld [vmem:[%s7725_s12 + $0xa4] ss:$8 sps:$4 sm:$0xff]  }
  0x21   : > { %v6970_v39 = vld [vmem:[%s7725_s12 + $0x294] ss:$8 sps:$4 sm:$0xff]   ;;  %v6973_v41 = vld [vmem:[%s7725_s12 + $0x290] ss:$8 sps:$4 sm:$0xff]   ;;  %v6976_v43 = vld [vmem:[%s7725_s12 + $0x2a4] ss:$8 sps:$4 sm:$0xff]  }
  0x22   : > { %3409 = vmatpush1.bf16.msra.mxu1 %v6936_v16  ;;  %v6978_v44 = vld [vmem:[%s7725_s12 + $0xa0] ss:$8 sps:$4 sm:$0xff]   ;;  %v6980_v46 = vld [vmem:[%s7725_s12 + $0xb4] ss:$8 sps:$4 sm:$0xff]   ;;  %v6984_v48 = vld [vmem:[%s7725_s12 + $0xb0] ss:$8 sps:$4 sm:$0xff]  }
  0x23   : > { %3935 = vmatpush1.bf16.msra.mxu0 %v6937_v17  ;;  %3410 = vmatprep.subr.bf16.mxu1 %v6938_v18  ;;  %v6979_v45 = vld [vmem:[%s7725_s12 + $0x2a0] ss:$8 sps:$4 sm:$0xff]   ;;  %v6982_v47 = vld [vmem:[%s7725_s12 + $0x2b4] ss:$8 sps:$4 sm:$0xff]   ;;  %v6985_v49 = vld [vmem:[%s7725_s12 + $0x2b0] ss:$8 sps:$4 sm:$0xff]  }
  0x24   : > { %3936 = vmatprep.subr.bf16.mxu0 %v6940_v19  ;;  %v6986_v50 = vld [vmem:[%s7725_s12 + $0xc4] ss:$8 sps:$4 sm:$0xff]   ;;  %v6990_v52 = vld [vmem:[%s7725_s12 + $0xc0] ss:$8 sps:$4 sm:$0xff]   ;;  %v6992_v54 = vld [vmem:[%s7725_s12 + $0xd4] ss:$8 sps:$4 sm:$0xff]  }
  0x25   : > { %v6988_v51 = vld [vmem:[%s7725_s12 + $0x2c4] ss:$8 sps:$4 sm:$0xff]   ;;  %v6991_v53 = vld [vmem:[%s7725_s12 + $0x2c0] ss:$8 sps:$4 sm:$0xff]   ;;  %v6994_v55 = vld [vmem:[%s7725_s12 + $0x2d4] ss:$8 sps:$4 sm:$0xff]  }
  0x26   : > { %3411 = vmatpush1.bf16.msra.mxu1 %v6942_v20  ;;  %v6996_v56 = vld [vmem:[%s7725_s12 + $0xd0] ss:$8 sps:$4 sm:$0xff]   ;;  %v6998_v58 = vld [vmem:[%s7725_s12 + $0xe4] ss:$8 sps:$4 sm:$0xff]   ;;  %v7002_v60 = vld [vmem:[%s7725_s12 + $0xe0] ss:$8 sps:$4 sm:$0xff]  }
  0x27   : > { %3937 = vmatpush1.bf16.msra.mxu0 %v6943_v21  ;;  %3412 = vmatprep.subr.bf16.mxu1 %v6944_v22  ;;  %v6997_v57 = vld [vmem:[%s7725_s12 + $0x2d0] ss:$8 sps:$4 sm:$0xff]   ;;  %v7000_v59 = vld [vmem:[%s7725_s12 + $0x2e4] ss:$8 sps:$4 sm:$0xff]   ;;  %v7003_v61 = vld [vmem:[%s7725_s12 + $0x2e0] ss:$8 sps:$4 sm:$0xff]  }
  0x28   : > { %3938 = vmatprep.subr.bf16.mxu0 %v6946_v23  ;;  %v7004_v62 = vld [vmem:[%s7725_s12 + $0xf4] ss:$8 sps:$4 sm:$0xff]   ;;  %v7008_v0 = vld [vmem:[%s7725_s12 + $0xf0] ss:$8 sps:$4 sm:$0xff]   ;;  %v7018_v2 = vld [vmem:[%s7725_s12 + $0x304] ss:$8 sps:$4 sm:$0xff]  }
  0x29   : > { %v7006_v63 = vld [vmem:[%s7725_s12 + $0x2f4] ss:$8 sps:$4 sm:$0xff]   ;;  %v7009_v1 = vld [vmem:[%s7725_s12 + $0x2f0] ss:$8 sps:$4 sm:$0xff]   ;;  %v7016_v6 = vld [vmem:[%s7725_s12 + $0x300] ss:$8 sps:$4 sm:$0xff]  }
  0x2a   : > { %3413 = vmatpush1.bf16.msra.mxu1 %v6948_v24  ;;  %v7010_v3 = vld [vmem:[%s9553_s1] ss:$48 sps:$4 sm:$0xff]   ;;  %v7019_v5 = vld [vmem:[%s9553_s1 + $0x64] ss:$48 sps:$4 sm:$0xff]  }
  0x2b   : > { %3939 = vmatpush1.bf16.msra.mxu0 %v6949_v25  ;;  %3414 = vmatprep.subr.bf16.mxu1 %v6950_v26  ;;  %v7013_v4 = vld [vmem:[%s9553_s1 + $0x10] ss:$48 sps:$4 sm:$0xff]   ;;  %v7021_v7 = vld [vmem:[%s9553_s1 + $0x74] ss:$48 sps:$4 sm:$0xff]  }
  0x2c   : > { %3940 = vmatprep.subr.bf16.mxu0 %v6952_v27  ;;  %v7033_v8 = vld [vmem:[%s7725_s12 + $0x314] ss:$8 sps:$4 sm:$0xff]   ;;  %v7031_v9 = vld [vmem:[%s7725_s12 + $0x310] ss:$8 sps:$4 sm:$0xff]   ;;  %v7042_v10 = vld [vmem:[%s7725_s12 + $0x324] ss:$8 sps:$4 sm:$0xff]  }
  0x2d   : > { %v7023_v11 = vld [vmem:[%s9553_s1 + $0x60] ss:$48 sps:$4 sm:$0xff]   ;;  %v7025_v13 = vld [vmem:[%s9553_s1 + $0xc4] ss:$48 sps:$4 sm:$0xff]  }
  0x2e   : > { %3415 = vmatpush1.bf16.msra.mxu1 %v6954_v28  ;;  %v7024_v12 = vld [vmem:[%s9553_s1 + $0x70] ss:$48 sps:$4 sm:$0xff]   ;;  %v7027_v14 = vld [vmem:[%s9553_s1 + $0xd4] ss:$48 sps:$4 sm:$0xff]  }
  0x2f   : > { %3941 = vmatpush1.bf16.msra.mxu0 %v6955_v29  ;;  %3416 = vmatprep.subr.bf16.mxu1 %v6956_v30  ;;  %v7040_v15 = vld [vmem:[%s7725_s12 + $0x320] ss:$8 sps:$4 sm:$0xff]   ;;  %v7055_v16 = vld [vmem:[%s7725_s12 + $0x334] ss:$8 sps:$4 sm:$0xff]   ;;  %v7053_v18 = vld [vmem:[%s7725_s12 + $0x330] ss:$8 sps:$4 sm:$0xff]  }
  0x30   : > { %3942 = vmatprep.subr.bf16.mxu0 %v6958_v31  ;;  %v7029_v17 = vld [vmem:[%s9553_s1 + $0xc0] ss:$48 sps:$4 sm:$0xff]   ;;  %v7066_v19 = vld [vmem:[%s7725_s12 + $0x344] ss:$8 sps:$4 sm:$0xff]   ;;  %v7075_v24 = vld [vmem:[%s7725_s12 + $0x354] ss:$8 sps:$4 sm:$0xff]  }
  0x31   : > { %v7030_v20 = vld [vmem:[%s9553_s1 + $0xd0] ss:$48 sps:$4 sm:$0xff]   ;;  %v7034_v21 = vld [vmem:[%s9553_s1 + $0x124] ss:$48 sps:$4 sm:$0xff]  }
  0x32   : > { %3417 = vmatpush1.bf16.msra.mxu1 %v6960_v32  ;;  %v7036_v22 = vld [vmem:[%s9553_s1 + $0x134] ss:$48 sps:$4 sm:$0xff]   ;;  %v7064_v23 = vld [vmem:[%s7725_s12 + $0x340] ss:$8 sps:$4 sm:$0xff]   ;;  %v7073_v27 = vld [vmem:[%s7725_s12 + $0x350] ss:$8 sps:$4 sm:$0xff]  }
  0x33   : > { %3943 = vmatpush1.bf16.msra.mxu0 %v6961_v33  ;;  %3418 = vmatprep.subr.bf16.mxu1 %v6962_v34  ;;  %v7038_v25 = vld [vmem:[%s9553_s1 + $0x120] ss:$48 sps:$4 sm:$0xff]   ;;  %v7090_v28 = vld [vmem:[%s7725_s12 + $0x364] ss:$8 sps:$4 sm:$0xff]   ;;  %v7099_v32 = vld [vmem:[%s7725_s12 + $0x374] ss:$8 sps:$4 sm:$0xff]  }
  0x34   : > { %3944 = vmatprep.subr.bf16.mxu0 %v6964_v35  ;;  %v7039_v26 = vld [vmem:[%s9553_s1 + $0x130] ss:$48 sps:$4 sm:$0xff]   ;;  %v7043_v29 = vld [vmem:[%s9553_s1 + $0x184] ss:$48 sps:$4 sm:$0xff]  }
  0x35   : > { %v7045_v30 = vld [vmem:[%s9553_s1 + $0x194] ss:$48 sps:$4 sm:$0xff]   ;;  %v7088_v31 = vld [vmem:[%s7725_s12 + $0x360] ss:$8 sps:$4 sm:$0xff]  }
  0x36   : > { %3419 = vmatpush1.bf16.msra.mxu1 %v6966_v36  ;;  %v7130_v33 = vld [vmem:[%s7725_s12 + $0x100] ss:$8 sps:$4 sm:$0xff]   ;;  %v7132_v34 = vld [vmem:[%s7725_s12 + $0x104] ss:$8 sps:$4 sm:$0xff]  }
  0x37   : > { %3945 = vmatpush1.bf16.msra.mxu0 %v6967_v37  ;;  %3420 = vmatprep.subr.bf16.mxu1 %v6968_v38  ;;  %v7047_v35 = vld [vmem:[%s9553_s1 + $0x180] ss:$48 sps:$4 sm:$0xff]   ;;  %v7049_v38 = vld [vmem:[%s9553_s1 + $0x1e4] ss:$48 sps:$4 sm:$0xff]  }
  0x38   : > { %3946 = vmatprep.subr.bf16.mxu0 %v6970_v39  ;;  %v7048_v36 = vld [vmem:[%s9553_s1 + $0x190] ss:$48 sps:$4 sm:$0xff]   ;;  %v7114_v39 = vld [vmem:[%s7725_s12 + $0x384] ss:$8 sps:$4 sm:$0xff]  }
  0x39   : > { %v7097_v37 = vld [vmem:[%s7725_s12 + $0x370] ss:$8 sps:$4 sm:$0xff]  }
  0x3a   : > { %3421 = vmatpush1.bf16.msra.mxu1 %v6972_v40  ;;  %v7142_v40 = vld [vmem:[%s7725_s12 + $0x110] ss:$8 sps:$4 sm:$0xff]  }
  0x3b   : > { %3947 = vmatpush1.bf16.msra.mxu0 %v6973_v41  ;;  %3422 = vmatprep.subr.bf16.mxu1 %v6974_v42  ;;  %v7144_v41 = vld [vmem:[%s7725_s12 + $0x114] ss:$8 sps:$4 sm:$0xff]  }
  0x3c   : > { %3948 = vmatprep.subr.bf16.mxu0 %v6976_v43  ;;  %v7051_v42 = vld [vmem:[%s9553_s1 + $0x1f4] ss:$48 sps:$4 sm:$0xff]   ;;  %v7112_v43 = vld [vmem:[%s7725_s12 + $0x380] ss:$8 sps:$4 sm:$0xff]  }
  0x3e   : > { %3423 = vmatpush1.bf16.msra.mxu1 %v6978_v44  ;;  %v7123_v44 = vld [vmem:[%s7725_s12 + $0x394] ss:$8 sps:$4 sm:$0xff]  }
  0x3f   : > { %3949 = vmatpush1.bf16.msra.mxu0 %v6979_v45  ;;  %3424 = vmatprep.subr.bf16.mxu1 %v6980_v46  ;;  %v7150_v45 = vld [vmem:[%s7725_s12 + $0x120] ss:$8 sps:$4 sm:$0xff]   ;;  %v7152_v46 = vld [vmem:[%s7725_s12 + $0x124] ss:$8 sps:$4 sm:$0xff]  }
  0x40   : > { %3950 = vmatprep.subr.bf16.mxu0 %v6982_v47  ;;  %v7121_v47 = vld [vmem:[%s7725_s12 + $0x390] ss:$8 sps:$4 sm:$0xff]  }
  0x42   : > { %3425 = vmatpush1.bf16.msra.mxu1 %v6984_v48  ;;  %v7139_v48 = vld [vmem:[%s7725_s12 + $0x3a4] ss:$8 sps:$4 sm:$0xff]  }
  0x43   : > { %3951 = vmatpush1.bf16.msra.mxu0 %v6985_v49  ;;  %3426 = vmatprep.subr.bf16.mxu1 %v6986_v50  ;;  %v7056_v49 = vld [vmem:[%s9553_s1 + $0x1e0] ss:$48 sps:$4 sm:$0xff]  }
  0x44   : > { %3952 = vmatprep.subr.bf16.mxu0 %v6988_v51  ;;  %v7057_v50 = vld [vmem:[%s9553_s1 + $0x1f0] ss:$48 sps:$4 sm:$0xff]  }
  0x45   : > { %v7157_v51 = vld [vmem:[%s7725_s12 + $0x130] ss:$8 sps:$4 sm:$0xff]  }
  0x46   : > { %3427 = vmatpush1.bf16.msra.mxu1 %v6990_v52  ;;  %v7159_v52 = vld [vmem:[%s7725_s12 + $0x134] ss:$8 sps:$4 sm:$0xff]  }
  0x47   : > { %3953 = vmatpush1.bf16.msra.mxu0 %v6991_v53  ;;  %3428 = vmatprep.subr.bf16.mxu1 %v6992_v54  ;;  %v7058_v53 = vld [vmem:[%s9553_s1 + $0x244] ss:$48 sps:$4 sm:$0xff]  }
  0x48   : > { %3954 = vmatprep.subr.bf16.mxu0 %v6994_v55  ;;  %v7060_v54 = vld [vmem:[%s9553_s1 + $0x254] ss:$48 sps:$4 sm:$0xff]   ;;  %v7137_v55 = vld [vmem:[%s7725_s12 + $0x3a0] ss:$8 sps:$4 sm:$0xff]  }
  0x4a   : > { %3429 = vmatpush1.bf16.msra.mxu1 %v6996_v56  ;;  %v7156_v56 = vld [vmem:[%s7725_s12 + $0x3b4] ss:$8 sps:$4 sm:$0xff]  }
  0x4b   : > { %3955 = vmatpush1.bf16.msra.mxu0 %v6997_v57  ;;  %3430 = vmatprep.subr.bf16.mxu1 %v6998_v58  ;;  %v7167_v57 = vld [vmem:[%s7725_s12 + $0x144] ss:$8 sps:$4 sm:$0xff]   ;;  %v7165_v58 = vld [vmem:[%s7725_s12 + $0x140] ss:$8 sps:$4 sm:$0xff]  }
  0x4c   : > { %3956 = vmatprep.subr.bf16.mxu0 %v7000_v59  ;;  %v7171_v59 = vld [vmem:[%s7725_s12 + $0x154] ss:$8 sps:$4 sm:$0xff]  }
  0x4e   : > { %3431 = vmatpush1.bf16.msra.mxu1 %v7002_v60  ;;  %v7154_v60 = vld [vmem:[%s7725_s12 + $0x3b0] ss:$8 sps:$4 sm:$0xff]  }
  0x4f   : > { %3957 = vmatpush1.bf16.msra.mxu0 %v7003_v61  ;;  %3432 = vmatprep.subr.bf16.mxu1 %v7004_v62  ;;  %v7062_v61 = vld [vmem:[%s9553_s1 + $0x240] ss:$48 sps:$4 sm:$0xff]  }
  0x50   : > { %3958 = vmatprep.subr.bf16.mxu0 %v7006_v63  ;;  %v7169_v62 = vld [vmem:[%s7725_s12 + $0x150] ss:$8 sps:$4 sm:$0xff]   ;;  %v7174_v63 = vld [vmem:[%s7725_s12 + $0x3c4] ss:$8 sps:$4 sm:$0xff]  }
  0x52   : > { %3433 = vmatpush1.bf16.msra.mxu1 %v7008_v0  ;;  %v7063_v0 = vld [vmem:[%s9553_s1 + $0x250] ss:$48 sps:$4 sm:$0xff]  }
  0x53   : > { %3959 = vmatpush1.bf16.msra.mxu0 %v7009_v1  ;;  %3665 = vmatprep.subr.bf16.mxu1 %v7132_v34  ;;  %v7067_v1 = vld [vmem:[%s9553_s1 + $0x2a4] ss:$48 sps:$4 sm:$0xff]   ;;  %v7238_v34 = vld [vmem:[%s7725_s12 + $0x3f0] ss:$8 sps:$4 sm:$0xff]  }
  0x54   : > { %4191 = vmatprep.subr.bf16.mxu0 %v7018_v2  ;;  %v7069_v2 = vld [vmem:[%s9553_s1 + $0x2b4] ss:$48 sps:$4 sm:$0xff]  }
  0x55   : > { %3435 = vmatmul.mubr.bf16.vlgmr.msra.gmra.mrb[0].mxu1 %v7010_v3  ;;  %v7172_v3 = vld [vmem:[%s7725_s12 + $0x3c0] ss:$8 sps:$4 sm:$0xff]  }
  0x56   : > { %3961 = vmatmul.mubr.bf16.vlgmr.msra.gmra.mrb[0].mxu0 %v7013_v4  ;;  %3444 = vmatprep.mubr.bf16.mxu1 %v7019_v5  ;;  %v7182_v4 = vld [vmem:[%s7725_s12 + $0x164] ss:$8 sps:$4 sm:$0xff]   ;;  %v7180_v5 = vld [vmem:[%s7725_s12 + $0x160] ss:$8 sps:$4 sm:$0xff]  }
  0x57   : > { %4192 = vmatpush1.bf16.msra.mxu0 %v7016_v6  ;;  %3970 = vmatprep.mubr.bf16.mxu0 %v7021_v7  ;;  %v7186_v6 = vld [vmem:[%s7725_s12 + $0x174] ss:$8 sps:$4 sm:$0xff]   ;;  %v7071_v7 = vld [vmem:[%s9553_s1 + $0x2a0] ss:$48 sps:$4 sm:$0xff]  }
  0x58   : > { %4193 = vmatprep.subr.bf16.mxu0 %v7033_v8  ;;  %3666 = vmatpush1.bf16.msra.mxu1 %v7130_v33  ;;  %v7072_v8 = vld [vmem:[%s9553_s1 + $0x2b0] ss:$48 sps:$4 sm:$0xff]   ;;  %v7224_v33 = vld [vmem:[%s7725_s12 + $0x1c4] ss:$8 sps:$4 sm:$0xff]  }
  0x59   : > { %3667 = vmatprep.subr.bf16.mxu1 %v7144_v41  ;;  %v7252_v41 = vld [vmem:[%s7725_s12 + $0x404] ss:$8 sps:$4 sm:$0xff]  }
  0x5b   : > { %4194 = vmatpush1.bf16.msra.mxu0 %v7031_v9  ;;  %v7184_v9 = vld [vmem:[%s7725_s12 + $0x170] ss:$8 sps:$4 sm:$0xff]  }
  0x5c   : > { %4195 = vmatprep.subr.bf16.mxu0 %v7042_v10  ;;  %3668 = vmatpush1.bf16.msra.mxu1 %v7142_v40  ;;  %v7196_v10 = vld [vmem:[%s7725_s12 + $0x3d0] ss:$8 sps:$4 sm:$0xff]   ;;  %v7100_v40 = vld [vmem:[%s9553_s1 + $0x424] ss:$48 sps:$4 sm:$0xff]  }
  0x5d   : > { %3445 = vmatmul.mubr.bf16.gmra.mrb[4].mxu1 %v7023_v11  ;;  %3669 = vmatprep.subr.bf16.mxu1 %v7152_v46  ;;  %v7198_v11 = vld [vmem:[%s7725_s12 + $0x3d4] ss:$8 sps:$4 sm:$0xff]   ;;  %v7104_v46 = vld [vmem:[%s9553_s1 + $0x420] ss:$48 sps:$4 sm:$0xff]  }
  0x5e   : > { %3971 = vmatmul.mubr.bf16.gmra.mrb[4].mxu0 %v7024_v12  ;;  %3454 = vmatprep.mubr.bf16.mxu1 %v7025_v13  ;;  %v7076_v12 = vld [vmem:[%s9553_s1 + $0x304] ss:$48 sps:$4 sm:$0xff]  }
  0x5f   : > { %3980 = vmatprep.mubr.bf16.mxu0 %v7027_v14  ;;  %4196 = vmatpush1.bf16.msra.mxu0 %v7040_v15  ;;  %v7078_v13 = vld [vmem:[%s9553_s1 + $0x314] ss:$48 sps:$4 sm:$0xff]   ;;  %v7192_v15 = vld [vmem:[%s7725_s12 + $0x180] ss:$8 sps:$4 sm:$0xff]  }
  0x60   : > { %4197 = vmatprep.subr.bf16.mxu0 %v7055_v16  ;;  %3670 = vmatpush1.bf16.msra.mxu1 %v7150_v45  ;;  %v7194_v14 = vld [vmem:[%s7725_s12 + $0x184] ss:$8 sps:$4 sm:$0xff]   ;;  %v7201_v16 = vld [vmem:[%s7725_s12 + $0x194] ss:$8 sps:$4 sm:$0xff]  }
  0x61   : > { %3671 = vmatprep.subr.bf16.mxu1 %v7159_v52  ;;  %v7243_v45 = vld [vmem:[%s7725_s12 + $0x1f4] ss:$8 sps:$4 sm:$0xff]   ;;  %v7111_v52 = vld [vmem:[%s9553_s1 + $0x490] ss:$48 sps:$4 sm:$0xff]  }
  0x63   : > { %4198 = vmatpush1.bf16.msra.mxu0 %v7053_v18  ;;  %v7081_v18 = vld [vmem:[%s9553_s1 + $0x310] ss:$48 sps:$4 sm:$0xff]  }
  0x64   : > { %4199 = vmatprep.subr.bf16.mxu0 %v7066_v19  ;;  %3672 = vmatpush1.bf16.msra.mxu1 %v7157_v51  ;;  %v7082_v19 = vld [vmem:[%s9553_s1 + $0x364] ss:$48 sps:$4 sm:$0xff]   ;;  %v7110_v51 = vld [vmem:[%s9553_s1 + $0x480] ss:$48 sps:$4 sm:$0xff]  }
  0x65   : > { %3455 = vmatmul.mubr.bf16.gmra.mrb[8].mxu1 %v7029_v17  ;;  %3673 = vmatprep.subr.bf16.mxu1 %v7167_v57  ;;  %v7080_v17 = vld [vmem:[%s9553_s1 + $0x300] ss:$48 sps:$4 sm:$0xff]   ;;  %v7124_v57 = vld [vmem:[%s9553_s1 + $0x544] ss:$48 sps:$4 sm:$0xff]  }
  0x66   : > { %3981 = vmatmul.mubr.bf16.gmra.mrb[8].mxu0 %v7030_v20  ;;  %3464 = vmatprep.mubr.bf16.mxu1 %v7034_v21  ;;  %v7199_v20 = vld [vmem:[%s7725_s12 + $0x190] ss:$8 sps:$4 sm:$0xff]   ;;  %v7214_v21 = vld [vmem:[%s7725_s12 + $0x3e0] ss:$8 sps:$4 sm:$0xff]  }
  0x67   : > { %3990 = vmatprep.mubr.bf16.mxu0 %v7036_v22  ;;  %4200 = vmatpush1.bf16.msra.mxu0 %v7064_v23  ;;  %v7216_v22 = vld [vmem:[%s7725_s12 + $0x3e4] ss:$8 sps:$4 sm:$0xff]  }
  0x68   : > { %4201 = vmatprep.subr.bf16.mxu0 %v7075_v24  ;;  %3674 = vmatpush1.bf16.msra.mxu1 %v7165_v58  ;;  %v7084_v23 = vld [vmem:[%s9553_s1 + $0x374] ss:$48 sps:$4 sm:$0xff]  }
  0x69   : > { %3675 = vmatprep.subr.bf16.mxu1 %v7171_v59  ;;  %v7209_v24 = vld [vmem:[%s7725_s12 + $0x1a4] ss:$8 sps:$4 sm:$0xff]   ;;  %v7128_v59 = vld [vmem:[%s9553_s1 + $0x540] ss:$48 sps:$4 sm:$0xff]  }
  0x6a   : > { %v7126_v58 = vld [vmem:[%s9553_s1 + $0x554] ss:$48 sps:$4 sm:$0xff]  }
  0x6b   : > { %4202 = vmatpush1.bf16.msra.mxu0 %v7073_v27  ;;  %v7086_v27 = vld [vmem:[%s9553_s1 + $0x360] ss:$48 sps:$4 sm:$0xff]  }
  0x6c   : > { %4203 = vmatprep.subr.bf16.mxu0 %v7090_v28  ;;  %3676 = vmatpush1.bf16.msra.mxu1 %v7169_v62  ;;  %v7087_v28 = vld [vmem:[%s9553_s1 + $0x370] ss:$48 sps:$4 sm:$0xff]   ;;  %v7135_v62 = vld [vmem:[%s9553_s1 + $0x5b4] ss:$48 sps:$4 sm:$0xff]  }
  0x6d   : > { %3465 = vmatmul.mubr.bf16.gmra.mrb[12].mxu1 %v7038_v25  ;;  %3677 = vmatprep.subr.bf16.mxu1 %v7182_v4  ;;  %v7207_v25 = vld [vmem:[%s7725_s12 + $0x1a0] ss:$8 sps:$4 sm:$0xff]  }
  0x6e   : > { %3991 = vmatmul.mubr.bf16.gmra.mrb[12].mxu0 %v7039_v26  ;;  %3474 = vmatprep.mubr.bf16.mxu1 %v7043_v29  ;;  %v7213_v26 = vld [vmem:[%s7725_s12 + $0x1b4] ss:$8 sps:$4 sm:$0xff]   ;;  %v7211_v29 = vld [vmem:[%s7725_s12 + $0x1b0] ss:$8 sps:$4 sm:$0xff]  }
  0x6f   : > { %4000 = vmatprep.mubr.bf16.mxu0 %v7045_v30  ;;  %4204 = vmatpush1.bf16.msra.mxu0 %v7088_v31  ;;  %v7091_v30 = vld [vmem:[%s9553_s1 + $0x3c4] ss:$48 sps:$4 sm:$0xff]   ;;  %v7153_v4 = vld [vmem:[%s9553_s1 + $0x610] ss:$48 sps:$4 sm:$0xff]  }
  0x70   : > { %4205 = vmatprep.subr.bf16.mxu0 %v7099_v32  ;;  %3678 = vmatpush1.bf16.msra.mxu1 %v7180_v5  ;;  %v7093_v31 = vld [vmem:[%s9553_s1 + $0x3d4] ss:$48 sps:$4 sm:$0xff]   ;;  %v7222_v32 = vld [vmem:[%s7725_s12 + $0x1c0] ss:$8 sps:$4 sm:$0xff]  }
  0x71   : > { %3679 = vmatprep.subr.bf16.mxu1 %v7186_v6  ;;  %v7160_v5 = vld [vmem:[%s9553_s1 + $0x664] ss:$48 sps:$4 sm:$0xff]  }
  0x72   : > { %v7162_v6 = vld [vmem:[%s9553_s1 + $0x674] ss:$48 sps:$4 sm:$0xff]  }
  0x73   : > { %4206 = vmatpush1.bf16.msra.mxu0 %v7097_v37  ;;  %v7095_v37 = vld [vmem:[%s9553_s1 + $0x3c0] ss:$48 sps:$4 sm:$0xff]  }
  0x74   : > { %4207 = vmatprep.subr.bf16.mxu0 %v7114_v39  ;;  %3680 = vmatpush1.bf16.msra.mxu1 %v7184_v9  ;;  %v7226_v39 = vld [vmem:[%s7725_s12 + $0x1d0] ss:$8 sps:$4 sm:$0xff]   ;;  %v7175_v9 = vld [vmem:[%s9553_s1 + $0x6c4] ss:$48 sps:$4 sm:$0xff]  }
  0x75   : > { %3475 = vmatmul.mubr.bf16.gmra.mrb[16].mxu1 %v7047_v35  ;;  %3681 = vmatprep.subr.bf16.mxu1 %v7194_v14  ;;  %v7240_v35 = vld [vmem:[%s7725_s12 + $0x3f4] ss:$8 sps:$4 sm:$0xff]   ;;  %v9560_v14 = vmov 0  }
  0x76   : > { %4001 = vmatmul.mubr.bf16.gmra.mrb[16].mxu0 %v7048_v36  ;;  %3484 = vmatprep.mubr.bf16.mxu1 %v7049_v38  ;;  %v7228_v36 = vld [vmem:[%s7725_s12 + $0x1d4] ss:$8 sps:$4 sm:$0xff]   ;;  %v7096_v38 = vld [vmem:[%s9553_s1 + $0x3d0] ss:$48 sps:$4 sm:$0xff]  }
  0x77   : > { %4010 = vmatprep.mubr.bf16.mxu0 %v7051_v42  ;;  %4208 = vmatpush1.bf16.msra.mxu0 %v7112_v43  ;;  %v7102_v42 = vld [vmem:[%s9553_s1 + $0x434] ss:$48 sps:$4 sm:$0xff]  }
  0x78   : > { %4209 = vmatprep.subr.bf16.mxu0 %v7123_v44  ;;  %3682 = vmatpush1.bf16.msra.mxu1 %v7192_v15  ;;  %v7236_v43 = vld [vmem:[%s7725_s12 + $0x1e4] ss:$8 sps:$4 sm:$0xff]   ;;  %v7234_v44 = vld [vmem:[%s7725_s12 + $0x1e0] ss:$8 sps:$4 sm:$0xff]  }
  0x79   : > { %3683 = vmatprep.subr.bf16.mxu1 %v7201_v16  ;;  %6912 = vset.pattern.permute.xlu0 %v9560_v14  ;;  %v780_v15 = vld [vmem:[%s9554_s2 + $0x8] sm:$0xff]  ;;  %v7187_v16 = vld [vmem:[%s9553_s1 + $0x724] ss:$48 sps:$4 sm:$0xff]  }
  0x7a   : > { %6913 = vset.pattern.permute.xlu1 %v9560_v14 }
  0x7b   : > { %4210 = vmatpush1.bf16.msra.mxu0 %v7121_v47  ;;  %v7241_v47 = vld [vmem:[%s7725_s12 + $0x1f0] ss:$8 sps:$4 sm:$0xff]  }
  0x7c   : > { %4211 = vmatprep.subr.bf16.mxu0 %v7139_v48  ;;  %3684 = vmatpush1.bf16.msra.mxu1 %v7199_v20  ;;  %v7105_v48 = vld [vmem:[%s9553_s1 + $0x430] ss:$48 sps:$4 sm:$0xff]  }
  0x7d   : > { %3485 = vmatmul.mubr.bf16.gmra.mrb[20].mxu1 %v7056_v49  ;;  %3685 = vmatprep.subr.bf16.mxu1 %v7209_v24  ;;  %v7106_v49 = vld [vmem:[%s9553_s1 + $0x484] ss:$48 sps:$4 sm:$0xff]   ;;  %v7191_v20 = vld [vmem:[%s9553_s1 + $0x720] ss:$48 sps:$4 sm:$0xff]  }
  0x7e   : > { %4011 = vmatmul.mubr.bf16.gmra.mrb[20].mxu0 %v7057_v50  ;;  %3494 = vmatprep.mubr.bf16.mxu1 %v7058_v53  ;;  %v7108_v50 = vld [vmem:[%s9553_s1 + $0x494] ss:$48 sps:$4 sm:$0xff]  }
  0x7f   : > { %4020 = vmatprep.mubr.bf16.mxu0 %v7060_v54  ;;  %4212 = vmatpush1.bf16.msra.mxu0 %v7137_v55  ;;  %v7115_v53 = vld [vmem:[%s9553_s1 + $0x4e4] ss:$48 sps:$4 sm:$0xff]   ;;  %v7119_v55 = vld [vmem:[%s9553_s1 + $0x4e0] ss:$48 sps:$4 sm:$0xff]  }
  0x80   : > { %4213 = vmatprep.subr.bf16.mxu0 %v7156_v56  ;;  %3686 = vmatpush1.bf16.msra.mxu1 %v7207_v25  ;;  %v7117_v54 = vld [vmem:[%s9553_s1 + $0x4f4] ss:$48 sps:$4 sm:$0xff]   ;;  %v7120_v56 = vld [vmem:[%s9553_s1 + $0x4f0] ss:$48 sps:$4 sm:$0xff]   ;;  %v784_v25 = vld [vmem:[%s9554_s2 + $0x28] sm:$0xff] }
  0x81   : > { %3687 = vmatprep.subr.bf16.mxu1 %v7213_v26  ;;  %v783_v24 = vld [vmem:[%s9554_s2 + $0x20] sm:$0xff] }
  0x82   : > { %v7206_v26 = vld [vmem:[%s9553_s1 + $0x780] ss:$48 sps:$4 sm:$0xff]  }
  0x83   : > { %4214 = vmatpush1.bf16.msra.mxu0 %v7154_v60  ;;  %v7129_v60 = vld [vmem:[%s9553_s1 + $0x550] ss:$48 sps:$4 sm:$0xff]  }
  0x84   : > { %4215 = vmatprep.subr.bf16.mxu0 %v7174_v63  ;;  %3688 = vmatpush1.bf16.msra.mxu1 %v7211_v29  ;;  %v7140_v63 = vld [vmem:[%s9553_s1 + $0x5a0] ss:$48 sps:$4 sm:$0xff]   ;;  %v7219_v29 = vld [vmem:[%s9553_s1 + $0x7f4] ss:$48 sps:$4 sm:$0xff]  }
  0x85   : > { %3495 = vmatmul.mubr.bf16.gmra.mrb[24].mxu1 %v7062_v61  ;;  %3689 = vmatprep.subr.bf16.mxu1 %v7224_v33  ;;  %v7133_v61 = vld [vmem:[%s9553_s1 + $0x5a4] ss:$48 sps:$4 sm:$0xff]   ;;  %v7225_v33 = vld [vmem:[%s9553_s1 + $0x7f0] ss:$48 sps:$4 sm:$0xff]  }
  0x86   : > { %4021 = vmatmul.mubr.bf16.gmra.mrb[24].mxu0 %v7063_v0  ;;  %3504 = vmatprep.mubr.bf16.mxu1 %v7067_v1  ;;  %v7141_v0 = vld [vmem:[%s9553_s1 + $0x5b0] ss:$48 sps:$4 sm:$0xff]   ;;  %v7145_v1 = vld [vmem:[%s9553_s1 + $0x604] ss:$48 sps:$4 sm:$0xff]  }
  0x87   : > { %4030 = vmatprep.mubr.bf16.mxu0 %v7069_v2  ;;  %4216 = vmatpush1.bf16.msra.mxu0 %v7172_v3  ;;  %v7147_v2 = vld [vmem:[%s9553_s1 + $0x614] ss:$48 sps:$4 sm:$0xff]   ;;  %v7149_v3 = vld [vmem:[%s9553_s1 + $0x600] ss:$48 sps:$4 sm:$0xff]  }
  0x88   : > { %4217 = vmatprep.subr.bf16.mxu0 %v7198_v11  ;;  %3690 = vmatpush1.bf16.msra.mxu1 %v7222_v32  ;;  %v779_v11 = vld [vmem:[%s9554_s2] sm:$0xff] }
  0x89   : > { %3691 = vmatprep.subr.bf16.mxu1 %v7228_v36  ;;  %827 = vperm.xlu0 %6912, %v779_v11   ;;  %v7221_v32 = vld [vmem:[%s9553_s1 + $0x7e0] ss:$48 sps:$4 sm:$0xff]   ;;  %v7273_v11 = vld [vmem:[%s9553_s1 + $0x138] ss:$48 sps:$4 sm:$0xff]  }
  0x8a   : > { %v787_v36 = vld [vmem:[%s9554_s2 + $0x40] sm:$0xff] }
  0x8b   : > { %4218 = vmatpush1.bf16.msra.mxu0 %v7196_v10  ;;  %v7177_v10 = vld [vmem:[%s9553_s1 + $0x6d4] ss:$48 sps:$4 sm:$0xff]  }
  0x8c   : > { %4219 = vmatprep.subr.bf16.mxu0 %v7216_v22  ;;  %3692 = vmatpush1.bf16.msra.mxu1 %v7226_v39  ;;  %v7202_v22 = vld [vmem:[%s9553_s1 + $0x784] ss:$48 sps:$4 sm:$0xff]   ;;  %v7237_v39 = vld [vmem:[%s9553_s1 + $0x850] ss:$48 sps:$4 sm:$0xff]  }
  0x8d   : > { %3505 = vmatmul.mubr.bf16.gmra.mrb[28].mxu1 %v7071_v7  ;;  %3693 = vmatprep.subr.bf16.mxu1 %v7236_v43  ;;  %v7164_v7 = vld [vmem:[%s9553_s1 + $0x660] ss:$48 sps:$4 sm:$0xff]   ;;  %v790_v43 = vld [vmem:[%s9554_s2 + $0x58] sm:$0xff] }
  0x8e   : > { %4031 = vmatmul.mubr.bf16.gmra.mrb[28].mxu0 %v7072_v8  ;;  %3514 = vmatprep.mubr.bf16.mxu1 %v7076_v12  ;;  %v7168_v8 = vld [vmem:[%s9553_s1 + $0x670] ss:$48 sps:$4 sm:$0xff]  }
  0x8f   : > { %4040 = vmatprep.mubr.bf16.mxu0 %v7078_v13  ;;  %4220 = vmatpush1.bf16.msra.mxu0 %v7214_v21  ;;  %v7179_v12 = vld [vmem:[%s9553_s1 + $0x6c0] ss:$48 sps:$4 sm:$0xff]  }
  0x90   : > { %4221 = vmatprep.subr.bf16.mxu0 %v7240_v35  ;;  %3694 = vmatpush1.bf16.msra.mxu1 %v7234_v44  ;;  %v7183_v13 = vld [vmem:[%s9553_s1 + $0x6d0] ss:$48 sps:$4 sm:$0xff]   ;;  %v7231_v35 = vld [vmem:[%s9553_s1 + $0x854] ss:$48 sps:$4 sm:$0xff]   ;;  %v7244_v44 = vld [vmem:[%s9553_s1 + $0x8] ss:$48 sps:$4 sm:$0xff]  }
  0x91   : > { %3695 = vmatprep.subr.bf16.mxu1 %v7243_v45  ;;  %832 = vperm.xlu0 %6912, %v780_v15   ;;  %v7195_v21 = vld [vmem:[%s9553_s1 + $0x730] ss:$48 sps:$4 sm:$0xff]   ;;  %v7247_v45 = vld [vmem:[%s9553_s1 + $0x18] ss:$48 sps:$4 sm:$0xff]  }
  0x92   : > { %v7322_v15 = vld [vmem:[%s7725_s12 + $0x460] ss:$8 sps:$4 sm:$0xff]  }
  0x93   : > { %4222 = vmatpush1.bf16.msra.mxu0 %v7238_v34  ;;  %v7229_v34 = vld [vmem:[%s9553_s1 + $0x844] ss:$48 sps:$4 sm:$0xff]  }
  0x94   : > { %4454 = vmatprep.subr.bf16.mxu0 %v7252_v41  ;;  %3696 = vmatpush1.bf16.msra.mxu1 %v7241_v47  ;;  %v7253_v47 = vld [vmem:[%s9553_s1 + $0x6c] ss:$48 sps:$4 sm:$0xff]  }
  0x95   : > { %3515 = vmatmul.mubr.bf16.gmra.mrb[32].mxu1 %v7080_v17  ;;  %6253 = vmatprep.subr.bf16.mxu1 %v7252_v41  ;;  %v7189_v17 = vld [vmem:[%s9553_s1 + $0x734] ss:$48 sps:$4 sm:$0xff]   ;;  %v7249_v41 = vld [vmem:[%s9553_s1 + $0x1c] ss:$48 sps:$4 sm:$0xff]  }
  0x96   : > { %4041 = vmatmul.mubr.bf16.gmra.mrb[32].mxu0 %v7081_v18  ;;  %3524 = vmatprep.mubr.bf16.mxu1 %v7082_v19  ;;  %v781_v18 = vld [vmem:[%s9554_s2 + $0x10] sm:$0xff]  ;;  %v782_v19 = vld [vmem:[%s9554_s2 + $0x18] sm:$0xff] }
  0x97   : > { %4050 = vmatprep.mubr.bf16.mxu0 %v7084_v23  ;;  %837 = vperm.xlu1 %6913, %v781_v18   ;;  %v7204_v23 = vld [vmem:[%s9553_s1 + $0x794] ss:$48 sps:$4 sm:$0xff]   ;;  %v7331_v18 = vld [vmem:[%s7725_s12 + $0x470] ss:$8 sps:$4 sm:$0xff]  }
  0x98   : > { %847 = vperm.xlu0 %6912, %v783_v24   ;;  %v7285_v24 = vld [vmem:[%s9553_s1 + $0x1fc] ss:$48 sps:$4 sm:$0xff]  }
  0x9b   : > { %842 = vperm.xlu1 %6913, %v782_v19   ;;  %v798_v19 = vld [vmem:[%s9554_s2 + $0x98] sm:$0xff] }
  0x9d   : > { %3525 = vmatmul.mubr.bf16.gmra.mrb[36].mxu1 %v7086_v27  ;;  %v7210_v27 = vld [vmem:[%s9553_s1 + $0x790] ss:$48 sps:$4 sm:$0xff]  }
  0x9e   : > { %4051 = vmatmul.mubr.bf16.gmra.mrb[36].mxu0 %v7087_v28  ;;  %3534 = vmatprep.mubr.bf16.mxu1 %v7091_v30  ;;  %v7217_v28 = vld [vmem:[%s9553_s1 + $0x7e4] ss:$48 sps:$4 sm:$0xff]  }
  0x9f   : > { %4060 = vmatprep.mubr.bf16.mxu0 %v7093_v31  ;;  %852 = vperm.xlu1 %6913, %v784_v25   ;;  %v785_v30 = vld [vmem:[%s9554_s2 + $0x30] sm:$0xff]  ;;  %v786_v31 = vld [vmem:[%s9554_s2 + $0x38] sm:$0xff]  ;;  %v7346_v25 = vld [vmem:[%s7725_s12 + $0x480] ss:$8 sps:$4 sm:$0xff]  }
  0xa0   : > { %857 = vperm.xlu0 %6912, %v785_v30   ;;  %v7370_v30 = vld [vmem:[%s7725_s12 + $0x4a4] ss:$8 sps:$4 sm:$0xff]  }
  0xa3   : > { %862 = vperm.xlu1 %6913, %v786_v31   ;;  %v7290_v31 = vld [vmem:[%s9553_s1 + $0x1e8] ss:$48 sps:$4 sm:$0xff]  }
  0xa4   : > { %867 = vperm.xlu0 %6912, %v787_v36   ;;  %v7381_v36 = vld [vmem:[%s7725_s12 + $0x4b4] ss:$8 sps:$4 sm:$0xff]  }
  0xa5   : > { %3535 = vmatmul.mubr.bf16.gmra.mrb[40].mxu1 %v7095_v37  ;;  %v788_v37 = vld [vmem:[%s9554_s2 + $0x48] sm:$0xff] }
  0xa6   : > { %4061 = vmatmul.mubr.bf16.gmra.mrb[40].mxu0 %v7096_v38  ;;  %3544 = vmatprep.mubr.bf16.mxu1 %v7100_v40  ;;  %v7233_v38 = vld [vmem:[%s9553_s1 + $0x840] ss:$48 sps:$4 sm:$0xff]   ;;  %v7246_v40 = vld [vmem:[%s9553_s1 + $0xc] ss:$48 sps:$4 sm:$0xff]  }
  0xa7   : > { %4070 = vmatprep.mubr.bf16.mxu0 %v7102_v42  ;;  %872 = vperm.xlu1 %6913, %v788_v37   ;;  %v789_v42 = vld [vmem:[%s9554_s2 + $0x50] sm:$0xff] }
  0xa8   : > { %877 = vperm.xlu0 %6912, %v789_v42   ;;  %v801_v37 = vld [vmem:[%s9554_s2 + $0xb0] sm:$0xff]  ;;  %v7297_v42 = vld [vmem:[%s9553_s1 + $0x258] ss:$48 sps:$4 sm:$0xff]  }
  0xab   : > { %882 = vperm.xlu1 %6913, %v790_v43   ;;  %v7301_v43 = vld [vmem:[%s9553_s1 + $0x2ac] ss:$48 sps:$4 sm:$0xff]  }
  0xad   : > { %3545 = vmatmul.mubr.bf16.gmra.mrb[44].mxu1 %v7104_v46  ;;  %v7250_v46 = vld [vmem:[%s7725_s12 + $0x400] ss:$8 sps:$4 sm:$0xff]  }
  0xae   : > { %4071 = vmatmul.mubr.bf16.gmra.mrb[44].mxu0 %v7105_v48  ;;  %3554 = vmatprep.mubr.bf16.mxu1 %v7106_v49  ;;  %v7255_v48 = vld [vmem:[%s9553_s1 + $0x7c] ss:$48 sps:$4 sm:$0xff]  }
  0xaf   : > { %4080 = vmatprep.mubr.bf16.mxu0 %v7108_v50  ;;  %v7267_v49 = vld [vmem:[%s7725_s12 + $0x414] ss:$8 sps:$4 sm:$0xff]   ;;  %v791_v50 = vld [vmem:[%s9554_s2 + $0x60] sm:$0xff] }
  0xb0   : > { %887 = vperm.xlu0 %6912, %v791_v50   ;;  %v7414_v50 = vld [vmem:[%s7725_s12 + $0x4e4] ss:$8 sps:$4 sm:$0xff]  }
  0xb5   : > { %3555 = vmatmul.mubr.bf16.gmra.mrb[48].mxu1 %v7110_v51  ;;  %v7265_v51 = vld [vmem:[%s7725_s12 + $0x410] ss:$8 sps:$4 sm:$0xff]  }
  0xb6   : > { %4081 = vmatmul.mubr.bf16.gmra.mrb[48].mxu0 %v7111_v52  ;;  %3564 = vmatprep.mubr.bf16.mxu1 %v7115_v53  ;;  %v792_v52 = vld [vmem:[%s9554_s2 + $0x68] sm:$0xff] }
  0xb7   : > { %4090 = vmatprep.mubr.bf16.mxu0 %v7117_v54  ;;  %v7257_v53 = vld [vmem:[%s9553_s1 + $0x68] ss:$48 sps:$4 sm:$0xff]   ;;  %892 = vperm.xlu1 %6913, %v792_v52  }
  0xb8   : > { %v7258_v54 = vld [vmem:[%s9553_s1 + $0x78] ss:$48 sps:$4 sm:$0xff]  }
  0xb9   : > { %v7306_v52 = vld [vmem:[%s9553_s1 + $0x2b8] ss:$48 sps:$4 sm:$0xff]  }
  0xbd   : > { %3565 = vmatmul.mubr.bf16.gmra.mrb[52].mxu1 %v7119_v55  ;;  %v7276_v55 = vld [vmem:[%s7725_s12 + $0x424] ss:$8 sps:$4 sm:$0xff]  }
  0xbe   : > { %4091 = vmatmul.mubr.bf16.gmra.mrb[52].mxu0 %v7120_v56  ;;  %3574 = vmatprep.mubr.bf16.mxu1 %v7124_v57  ;;  %v7259_v56 = vld [vmem:[%s9553_s1 + $0xcc] ss:$48 sps:$4 sm:$0xff]  }
  0xbf   : > { %4100 = vmatprep.mubr.bf16.mxu0 %v7126_v58  ;;  %v7261_v57 = vld [vmem:[%s9553_s1 + $0xdc] ss:$48 sps:$4 sm:$0xff]   ;;  %v7274_v58 = vld [vmem:[%s7725_s12 + $0x420] ss:$8 sps:$4 sm:$0xff]  }
  0xc5   : > { %3575 = vmatmul.mubr.bf16.gmra.mrb[56].mxu1 %v7128_v59  ;;  %v7289_v59 = vld [vmem:[%s7725_s12 + $0x434] ss:$8 sps:$4 sm:$0xff]  }
  0xc6   : > { %4101 = vmatmul.mubr.bf16.gmra.mrb[56].mxu0 %v7129_v60  ;;  %3584 = vmatprep.mubr.bf16.mxu1 %v7133_v61  ;;  %v7287_v60 = vld [vmem:[%s7725_s12 + $0x430] ss:$8 sps:$4 sm:$0xff]   ;;  %v7300_v61 = vld [vmem:[%s7725_s12 + $0x444] ss:$8 sps:$4 sm:$0xff]  }
  0xc7   : > { %4110 = vmatprep.mubr.bf16.mxu0 %v7135_v62  ;;  %v793_v62 = vld [vmem:[%s9554_s2 + $0x70] sm:$0xff] }
  0xc8   : > { %897 = vperm.xlu0 %6912, %v793_v62   ;;  %v7315_v62 = vld [vmem:[%s9553_s1 + $0x318] ss:$48 sps:$4 sm:$0xff]  }
  0xcd   : > { %3585 = vmatmul.mubr.bf16.gmra.mrb[60].mxu1 %v7140_v63  ;;  %v7263_v63 = vld [vmem:[%s9553_s1 + $0xc8] ss:$48 sps:$4 sm:$0xff]  }
  0xce   : > { %4111 = vmatmul.mubr.bf16.gmra.mrb[60].mxu0 %v7141_v0  ;;  %3594 = vmatprep.mubr.bf16.mxu1 %v7145_v1  ;;  %v7264_v0 = vld [vmem:[%s9553_s1 + $0xd8] ss:$48 sps:$4 sm:$0xff]  }
  0xcf   : > { %4120 = vmatprep.mubr.bf16.mxu0 %v7147_v2  ;;  %v794_v1 = vld [vmem:[%s9554_s2 + $0x78] sm:$0xff] }
  0xd0   : > { %v7268_v2 = vld [vmem:[%s9553_s1 + $0x12c] ss:$48 sps:$4 sm:$0xff]   ;;  %902 = vperm.xlu1 %6913, %v794_v1   ;;  %v807_v1 = vld [vmem:[%s9554_s2 + $0xe0] sm:$0xff] }
  0xd5   : > { %3595 = vmatmul.mubr.bf16.gmra.mrb[64].mxu1 %v7149_v3  ;;  %v7270_v3 = vld [vmem:[%s9553_s1 + $0x13c] ss:$48 sps:$4 sm:$0xff]  }
  0xd6   : > { %4121 = vmatmul.mubr.bf16.gmra.mrb[64].mxu0 %v7153_v4  ;;  %3604 = vmatprep.mubr.bf16.mxu1 %v7160_v5  ;;  %v7298_v4 = vld [vmem:[%s7725_s12 + $0x440] ss:$8 sps:$4 sm:$0xff]   ;;  %v7309_v5 = vld [vmem:[%s7725_s12 + $0x454] ss:$8 sps:$4 sm:$0xff]  }
  0xd7   : > { %4130 = vmatprep.mubr.bf16.mxu0 %v7162_v6  ;;  %v7307_v6 = vld [vmem:[%s7725_s12 + $0x450] ss:$8 sps:$4 sm:$0xff]  }
  0xdd   : > { %3605 = vmatmul.mubr.bf16.gmra.mrb[68].mxu1 %v7164_v7  ;;  %v795_v7 = vld [vmem:[%s9554_s2 + $0x80] sm:$0xff] }
  0xde   : > { %4131 = vmatmul.mubr.bf16.gmra.mrb[68].mxu0 %v7168_v8  ;;  %3614 = vmatprep.mubr.bf16.mxu1 %v7175_v9  ;;  %v796_v8 = vld [vmem:[%s9554_s2 + $0x88] sm:$0xff] }
  0xdf   : > { %4140 = vmatprep.mubr.bf16.mxu0 %v7177_v10  ;;  %v7324_v9 = vld [vmem:[%s7725_s12 + $0x464] ss:$8 sps:$4 sm:$0xff]   ;;  %v7272_v10 = vld [vmem:[%s9553_s1 + $0x128] ss:$48 sps:$4 sm:$0xff]   ;;  %907 = vperm.xlu0 %6912, %v795_v7   ;;  %v809_v7 = vld [vmem:[%s9554_s2 + $0xf0] sm:$0xff] }
  0xe0   : > { %912 = vperm.xlu1 %6913, %v796_v8   ;;  %v810_v8 = vld [vmem:[%s9554_s2 + $0xf8] sm:$0xff] }
  0xe4   : > { %922 = vperm.xlu1 %6913, %v798_v19   ;;  %v812_v19 = vld [vmem:[%s9554_s2 + $0x108] sm:$0xff] }
  0xe5   : > { %3615 = vmatmul.mubr.bf16.gmra.mrb[72].mxu1 %v7179_v12  ;;  %v7277_v12 = vld [vmem:[%s9553_s1 + $0x18c] ss:$48 sps:$4 sm:$0xff]  }
  0xe6   : > { %4141 = vmatmul.mubr.bf16.gmra.mrb[72].mxu0 %v7183_v13  ;;  %3624 = vmatprep.mubr.bf16.mxu1 %v7187_v16  ;;  %v7279_v13 = vld [vmem:[%s9553_s1 + $0x19c] ss:$48 sps:$4 sm:$0xff]  }
  0xe7   : > { %4150 = vmatprep.mubr.bf16.mxu0 %v7189_v17  ;;  %v7333_v16 = vld [vmem:[%s7725_s12 + $0x474] ss:$8 sps:$4 sm:$0xff]  }
  0xe8   : > { %v797_v17 = vld [vmem:[%s9554_s2 + $0x90] sm:$0xff] }
  0xe9   : > { %917 = vperm.xlu0 %6912, %v797_v17   ;;  %v7340_v17 = vld [vmem:[%s9553_s1 + $0x48c] ss:$48 sps:$4 sm:$0xff]  }
  0xed   : > { %3625 = vmatmul.mubr.bf16.gmra.mrb[76].mxu1 %v7191_v20  ;;  %v7348_v20 = vld [vmem:[%s7725_s12 + $0x484] ss:$8 sps:$4 sm:$0xff]  }
  0xee   : > { %4151 = vmatmul.mubr.bf16.gmra.mrb[76].mxu0 %v7195_v21  ;;  %3634 = vmatprep.mubr.bf16.mxu1 %v7202_v22  ;;  %v7281_v21 = vld [vmem:[%s9553_s1 + $0x188] ss:$48 sps:$4 sm:$0xff]  }
  0xef   : > { %4160 = vmatprep.mubr.bf16.mxu0 %v7204_v23  ;;  %v7282_v22 = vld [vmem:[%s9553_s1 + $0x198] ss:$48 sps:$4 sm:$0xff]   ;;  %v7283_v23 = vld [vmem:[%s9553_s1 + $0x1ec] ss:$48 sps:$4 sm:$0xff]  }
  0xf5   : > { %3635 = vmatmul.mubr.bf16.gmra.mrb[80].mxu1 %v7206_v26  ;;  %v7357_v26 = vld [vmem:[%s7725_s12 + $0x494] ss:$8 sps:$4 sm:$0xff]  }
  0xf6   : > { %4161 = vmatmul.mubr.bf16.gmra.mrb[80].mxu0 %v7210_v27  ;;  %3644 = vmatprep.mubr.bf16.mxu1 %v7217_v28  ;;  %v799_v27 = vld [vmem:[%s9554_s2 + $0xa0] sm:$0xff]  ;;  %v7355_v28 = vld [vmem:[%s7725_s12 + $0x490] ss:$8 sps:$4 sm:$0xff]  }
  0xf7   : > { %4170 = vmatprep.mubr.bf16.mxu0 %v7219_v29  ;;  %v800_v29 = vld [vmem:[%s9554_s2 + $0xa8] sm:$0xff]  ;;  %927 = vperm.xlu0 %6912, %v799_v27  }
  0xf8   : > { %932 = vperm.xlu1 %6913, %v800_v29   ;;  %v7353_v27 = vld [vmem:[%s9553_s1 + $0x4e8] ss:$48 sps:$4 sm:$0xff]   ;;  %v7358_v29 = vld [vmem:[%s9553_s1 + $0x54c] ss:$48 sps:$4 sm:$0xff]  }
  0xfb   : > { %937 = vperm.xlu0 %6912, %v801_v37   ;;  %v818_v37 = vld [vmem:[%s9554_s2 + $0x138] sm:$0xff] }
  0xfd   : > { %3645 = vmatmul.mubr.bf16.gmra.mrb[84].mxu1 %v7221_v32  ;;  %v7291_v32 = vld [vmem:[%s9553_s1 + $0x1f8] ss:$48 sps:$4 sm:$0xff]  }
  0xfe   : > { %4171 = vmatmul.mubr.bf16.gmra.mrb[84].mxu0 %v7225_v33  ;;  %3654 = vmatprep.mubr.bf16.mxu1 %v7229_v34  ;;  %v7292_v33 = vld [vmem:[%s9553_s1 + $0x24c] ss:$48 sps:$4 sm:$0xff]  }
  0xff   : > { %4180 = vmatprep.mubr.bf16.mxu0 %v7231_v35  ;;  %v7294_v34 = vld [vmem:[%s9553_s1 + $0x25c] ss:$48 sps:$4 sm:$0xff]   ;;  %v7368_v35 = vld [vmem:[%s7725_s12 + $0x4a0] ss:$8 sps:$4 sm:$0xff]  }
 0x105   : > { %3655 = vmatmul.mubr.bf16.gmra.mrb[88].mxu1 %v7233_v38  ;;  %v7379_v38 = vld [vmem:[%s7725_s12 + $0x4b0] ss:$8 sps:$4 sm:$0xff]  }
 0x106   : > { %4181 = vmatmul.mubr.bf16.gmra.mrb[88].mxu0 %v7237_v39  ;;  %3697 = vmatprep.mubr.bf16.mxu1 %v7246_v40  ;;  %v802_v39 = vld [vmem:[%s9554_s2 + $0xb8] sm:$0xff]  ;;  %v7390_v40 = vld [vmem:[%s7725_s12 + $0x4c4] ss:$8 sps:$4 sm:$0xff]  }
 0x107   : > { %4223 = vmatprep.mubr.bf16.mxu0 %v7249_v41  ;;  %v7296_v41 = vld [vmem:[%s9553_s1 + $0x248] ss:$48 sps:$4 sm:$0xff]   ;;  %942 = vperm.xlu1 %6913, %v802_v39  }
 0x108   : > { %v7371_v39 = vld [vmem:[%s9553_s1 + $0x5a8] ss:$48 sps:$4 sm:$0xff]  }
 0x10d   : > { %3698 = vmatmul.mubr.bf16.vlgmr.msra.gmra.mrb[0].mxu1 %v7244_v44  ;;  %v7303_v44 = vld [vmem:[%s9553_s1 + $0x2bc] ss:$48 sps:$4 sm:$0xff]  }
 0x10e   : > { %4224 = vmatmul.mubr.bf16.vlgmr.msra.gmra.mrb[0].mxu0 %v7247_v45  ;;  %3707 = vmatprep.mubr.bf16.mxu1 %v7253_v47  ;;  %v7388_v45 = vld [vmem:[%s7725_s12 + $0x4c0] ss:$8 sps:$4 sm:$0xff]  }
 0x10f   : > { %4455 = vmatpush1.bf16.msra.mxu0 %v7250_v46  ;;  %4233 = vmatprep.mubr.bf16.mxu0 %v7255_v48  ;;  %v803_v47 = vld [vmem:[%s9554_s2 + $0xc0] sm:$0xff]  ;;  %v7403_v48 = vld [vmem:[%s7725_s12 + $0x4d0] ss:$8 sps:$4 sm:$0xff]  }
 0x110   : > { %4456 = vmatprep.subr.bf16.mxu0 %v7267_v49  ;;  %6269 = vmatpush1.bf16.msra.mxu1 %v7250_v46  ;;  %v7405_v46 = vld [vmem:[%s7725_s12 + $0x4d4] ss:$8 sps:$4 sm:$0xff]  }
 0x111   : > { %6254 = vmatprep.subr.bf16.mxu1 %v7267_v49  ;;  %v804_v49 = vld [vmem:[%s9554_s2 + $0xc8] sm:$0xff]  ;;  %947 = vperm.xlu0 %6912, %v803_v47  }
 0x112   : > { %952 = vperm.xlu1 %6913, %v804_v49   ;;  %v7382_v47 = vld [vmem:[%s9553_s1 + $0x66c] ss:$48 sps:$4 sm:$0xff]  }
 0x113   : > { %4457 = vmatpush1.bf16.msra.mxu0 %v7265_v51  ;;  %v822_v49 = vld [vmem:[%s9554_s2 + $0x158] sm:$0xff] }
 0x114   : > { %4458 = vmatprep.subr.bf16.mxu0 %v7276_v55  ;;  %6270 = vmatpush1.bf16.msra.mxu1 %v7265_v51  ;;  %v7305_v51 = vld [vmem:[%s9553_s1 + $0x2a8] ss:$48 sps:$4 sm:$0xff]  }
 0x115   : > { %3708 = vmatmul.mubr.bf16.gmra.mrb[4].mxu1 %v7257_v53  ;;  %6255 = vmatprep.subr.bf16.mxu1 %v7276_v55  ;;  %v7310_v53 = vld [vmem:[%s9553_s1 + $0x30c] ss:$48 sps:$4 sm:$0xff]   ;;  %v7412_v55 = vld [vmem:[%s7725_s12 + $0x4e0] ss:$8 sps:$4 sm:$0xff]  }
 0x116   : > { %4234 = vmatmul.mubr.bf16.gmra.mrb[4].mxu0 %v7258_v54  ;;  %3717 = vmatprep.mubr.bf16.mxu1 %v7259_v56  ;;  %v7312_v54 = vld [vmem:[%s9553_s1 + $0x31c] ss:$48 sps:$4 sm:$0xff]  }
 0x117   : > { %4243 = vmatprep.mubr.bf16.mxu0 %v7261_v57  ;;  %4459 = vmatpush1.bf16.msra.mxu0 %v7274_v58  ;;  %v7429_v56 = vld [vmem:[%s7725_s12 + $0x4f4] ss:$8 sps:$4 sm:$0xff]  }
 0x118   : > { %4460 = vmatprep.subr.bf16.mxu0 %v7289_v59  ;;  %6271 = vmatpush1.bf16.msra.mxu1 %v7274_v58  ;;  %v805_v57 = vld [vmem:[%s9554_s2 + $0xd0] sm:$0xff] }
 0x119   : > { %6256 = vmatprep.subr.bf16.mxu1 %v7289_v59  ;;  %v7427_v58 = vld [vmem:[%s7725_s12 + $0x4f0] ss:$8 sps:$4 sm:$0xff]   ;;  %957 = vperm.xlu0 %6912, %v805_v57  }
 0x11a   : > { %v806_v59 = vld [vmem:[%s9554_s2 + $0xd8] sm:$0xff] }
 0x11b   : > { %4461 = vmatpush1.bf16.msra.mxu0 %v7287_v60  ;;  %962 = vperm.xlu1 %6913, %v806_v59   ;;  %v7396_v57 = vld [vmem:[%s9553_s1 + $0x6d8] ss:$48 sps:$4 sm:$0xff]   ;;  %v7399_v59 = vld [vmem:[%s9553_s1 + $0x73c] ss:$48 sps:$4 sm:$0xff]  }
 0x11c   : > { %4462 = vmatprep.subr.bf16.mxu0 %v7300_v61  ;;  %6272 = vmatpush1.bf16.msra.mxu1 %v7287_v60  ;;  %v7438_v60 = vld [vmem:[%s7725_s12 + $0x504] ss:$8 sps:$4 sm:$0xff]  }
 0x11d   : > { %3718 = vmatmul.mubr.bf16.gmra.mrb[8].mxu1 %v7263_v63  ;;  %6257 = vmatprep.subr.bf16.mxu1 %v7300_v61  ;;  %v7314_v61 = vld [vmem:[%s9553_s1 + $0x308] ss:$48 sps:$4 sm:$0xff]   ;;  %v7316_v63 = vld [vmem:[%s9553_s1 + $0x36c] ss:$48 sps:$4 sm:$0xff]  }
 0x11e   : > { %4244 = vmatmul.mubr.bf16.gmra.mrb[8].mxu0 %v7264_v0  ;;  %3727 = vmatprep.mubr.bf16.mxu1 %v7268_v2  ;;  %v7318_v0 = vld [vmem:[%s9553_s1 + $0x37c] ss:$48 sps:$4 sm:$0xff]  }
 0x11f   : > { %4253 = vmatprep.mubr.bf16.mxu0 %v7270_v3  ;;  %4463 = vmatpush1.bf16.msra.mxu0 %v7298_v4  ;;  %v808_v2 = vld [vmem:[%s9554_s2 + $0xe8] sm:$0xff] }
 0x120   : > { %4464 = vmatprep.subr.bf16.mxu0 %v7309_v5  ;;  %6273 = vmatpush1.bf16.msra.mxu1 %v7298_v4  ;;  %v7320_v3 = vld [vmem:[%s9553_s1 + $0x368] ss:$48 sps:$4 sm:$0xff]  }
 0x121   : > { %6258 = vmatprep.subr.bf16.mxu1 %v7309_v5  ;;  %967 = vperm.xlu0 %6912, %v807_v1   ;;  %v7321_v4 = vld [vmem:[%s9553_s1 + $0x378] ss:$48 sps:$4 sm:$0xff]   ;;  %v7325_v5 = vld [vmem:[%s9553_s1 + $0x3cc] ss:$48 sps:$4 sm:$0xff]  }
 0x122   : > { %972 = vperm.xlu1 %6913, %v808_v2   ;;  %v7411_v1 = vld [vmem:[%s9553_s1 + $0x798] ss:$48 sps:$4 sm:$0xff]   ;;  %v7415_v2 = vld [vmem:[%s9553_s1 + $0x7ec] ss:$48 sps:$4 sm:$0xff]  }
 0x123   : > { %4465 = vmatpush1.bf16.msra.mxu0 %v7307_v6 }
 0x124   : > { %4466 = vmatprep.subr.bf16.mxu0 %v7324_v9  ;;  %6274 = vmatpush1.bf16.msra.mxu1 %v7307_v6  ;;  %v7327_v6 = vld [vmem:[%s9553_s1 + $0x3dc] ss:$48 sps:$4 sm:$0xff]  }
 0x125   : > { %3728 = vmatmul.mubr.bf16.gmra.mrb[12].mxu1 %v7272_v10  ;;  %6259 = vmatprep.subr.bf16.mxu1 %v7324_v9  ;;  %v7329_v9 = vld [vmem:[%s9553_s1 + $0x3c8] ss:$48 sps:$4 sm:$0xff]  }
 0x126   : > { %4254 = vmatmul.mubr.bf16.gmra.mrb[12].mxu0 %v7273_v11  ;;  %3737 = vmatprep.mubr.bf16.mxu1 %v7277_v12  ;;  %v7330_v10 = vld [vmem:[%s9553_s1 + $0x3d8] ss:$48 sps:$4 sm:$0xff]   ;;  %v7334_v11 = vld [vmem:[%s9553_s1 + $0x42c] ss:$48 sps:$4 sm:$0xff]  }
 0x127   : > { %4263 = vmatprep.mubr.bf16.mxu0 %v7279_v13  ;;  %4467 = vmatpush1.bf16.msra.mxu0 %v7322_v15  ;;  %v7336_v12 = vld [vmem:[%s9553_s1 + $0x43c] ss:$48 sps:$4 sm:$0xff]   ;;  %v811_v13 = vld [vmem:[%s9554_s2 + $0x100] sm:$0xff] }
 0x128   : > { %4468 = vmatprep.subr.bf16.mxu0 %v7333_v16  ;;  %6275 = vmatpush1.bf16.msra.mxu1 %v7322_v15  ;;  %v7338_v15 = vld [vmem:[%s9553_s1 + $0x428] ss:$48 sps:$4 sm:$0xff]  }
 0x129   : > { %6260 = vmatprep.subr.bf16.mxu1 %v7333_v16  ;;  %977 = vperm.xlu0 %6912, %v809_v7   ;;  %v7339_v16 = vld [vmem:[%s9553_s1 + $0x438] ss:$48 sps:$4 sm:$0xff]   ;;  %v7423_v7 = vld [vmem:[%s9553_s1 + $0x85c] ss:$48 sps:$4 sm:$0xff]  }
 0x12a   : > { %982 = vperm.xlu1 %6913, %v810_v8   ;;  %v7425_v8 = vld [vmem:[%s9553_s1 + $0x848] ss:$48 sps:$4 sm:$0xff]  }
 0x12b   : > { %4469 = vmatpush1.bf16.msra.mxu0 %v7331_v18 }
 0x12c   : > { %4470 = vmatprep.subr.bf16.mxu0 %v7348_v20  ;;  %6276 = vmatpush1.bf16.msra.mxu1 %v7331_v18  ;;  %v7342_v18 = vld [vmem:[%s9553_s1 + $0x49c] ss:$48 sps:$4 sm:$0xff]  }
 0x12d   : > { %3738 = vmatmul.mubr.bf16.gmra.mrb[16].mxu1 %v7281_v21  ;;  %6261 = vmatprep.subr.bf16.mxu1 %v7348_v20  ;;  %v813_v20 = vld [vmem:[%s9554_s2 + $0x110] sm:$0xff]  ;;  %v7344_v21 = vld [vmem:[%s9553_s1 + $0x488] ss:$48 sps:$4 sm:$0xff]  }
 0x12e   : > { %4264 = vmatmul.mubr.bf16.gmra.mrb[16].mxu0 %v7282_v22  ;;  %3747 = vmatprep.mubr.bf16.mxu1 %v7283_v23  ;;  %v7345_v22 = vld [vmem:[%s9553_s1 + $0x498] ss:$48 sps:$4 sm:$0xff]   ;;  %v7349_v23 = vld [vmem:[%s9553_s1 + $0x4ec] ss:$48 sps:$4 sm:$0xff]  }
 0x12f   : > { %4273 = vmatprep.mubr.bf16.mxu0 %v7285_v24  ;;  %4471 = vmatpush1.bf16.msra.mxu0 %v7346_v25  ;;  %v7351_v24 = vld [vmem:[%s9553_s1 + $0x4fc] ss:$48 sps:$4 sm:$0xff]  }
 0x130   : > { %4472 = vmatprep.subr.bf16.mxu0 %v7357_v26  ;;  %6277 = vmatpush1.bf16.msra.mxu1 %v7346_v25  ;;  %v814_v25 = vld [vmem:[%s9554_s2 + $0x118] sm:$0xff] }
 0x131   : > { %6262 = vmatprep.subr.bf16.mxu1 %v7357_v26  ;;  %987 = vperm.xlu0 %6912, %v811_v13   ;;  %v815_v26 = vld [vmem:[%s9554_s2 + $0x120] sm:$0xff]  ;;  %v5144_v13 = vld [vmem:[%s9556_s4 + $0x10] sm:$0xff] }
 0x132   : > { %992 = vperm.xlu1 %6913, %v812_v19   ;;  %v7441_v19 = vld [vmem:[%s9553_s1 + $0x324] ss:$48 sps:$4 sm:$0xff]  }
 0x133   : > { %4473 = vmatpush1.bf16.msra.mxu0 %v7355_v28 }
 0x134   : > { %4474 = vmatprep.subr.bf16.mxu0 %v7370_v30  ;;  %6278 = vmatpush1.bf16.msra.mxu1 %v7355_v28  ;;  %v7354_v28 = vld [vmem:[%s9553_s1 + $0x4f8] ss:$48 sps:$4 sm:$0xff]  }
 0x135   : > { %3748 = vmatmul.mubr.bf16.gmra.mrb[20].mxu1 %v7290_v31  ;;  %6263 = vmatprep.subr.bf16.mxu1 %v7370_v30  ;;  %v7360_v30 = vld [vmem:[%s9553_s1 + $0x55c] ss:$48 sps:$4 sm:$0xff]  }
 0x136   : > { %4274 = vmatmul.mubr.bf16.gmra.mrb[20].mxu0 %v7291_v32  ;;  %3757 = vmatprep.mubr.bf16.mxu1 %v7292_v33  ;;  %v816_v31 = vld [vmem:[%s9554_s2 + $0x128] sm:$0xff]  ;;  %v817_v32 = vld [vmem:[%s9554_s2 + $0x130] sm:$0xff] }
 0x137   : > { %4283 = vmatprep.mubr.bf16.mxu0 %v7294_v34  ;;  %4475 = vmatpush1.bf16.msra.mxu0 %v7368_v35  ;;  %v7362_v33 = vld [vmem:[%s9553_s1 + $0x548] ss:$48 sps:$4 sm:$0xff]  }
 0x138   : > { %4476 = vmatprep.subr.bf16.mxu0 %v7381_v36  ;;  %6279 = vmatpush1.bf16.msra.mxu1 %v7368_v35  ;;  %v7363_v34 = vld [vmem:[%s9553_s1 + $0x558] ss:$48 sps:$4 sm:$0xff]   ;;  %v7364_v35 = vld [vmem:[%s9553_s1 + $0x5ac] ss:$48 sps:$4 sm:$0xff]  }
 0x139   : > { %6264 = vmatprep.subr.bf16.mxu1 %v7381_v36  ;;  %997 = vperm.xlu0 %6912, %v813_v20   ;;  %v7366_v36 = vld [vmem:[%s9553_s1 + $0x5bc] ss:$48 sps:$4 sm:$0xff]  }
 0x13a   : > { %1002 = vperm.xlu1 %6913, %v814_v25   ;;  %v7447_v20 = vld [vmem:[%s7725_s12 + $0x514] ss:$8 sps:$4 sm:$0xff]   ;;  %v7443_v25 = vld [vmem:[%s9553_s1 + $0x80] ss:$48 sps:$4 sm:$0xff]  }
 0x13b   : > { %4477 = vmatpush1.bf16.msra.mxu0 %v7379_v38 }
 0x13c   : > { %4478 = vmatprep.subr.bf16.mxu0 %v7390_v40  ;;  %6280 = vmatpush1.bf16.msra.mxu1 %v7379_v38  ;;  %v819_v38 = vld [vmem:[%s9554_s2 + $0x140] sm:$0xff] }
 0x13d   : > { %3758 = vmatmul.mubr.bf16.gmra.mrb[24].mxu1 %v7296_v41  ;;  %6265 = vmatprep.subr.bf16.mxu1 %v7390_v40  ;;  %v7372_v40 = vld [vmem:[%s9553_s1 + $0x5b8] ss:$48 sps:$4 sm:$0xff]   ;;  %v7373_v41 = vld [vmem:[%s9553_s1 + $0x60c] ss:$48 sps:$4 sm:$0xff]  }
 0x13e   : > { %4284 = vmatmul.mubr.bf16.gmra.mrb[24].mxu0 %v7297_v42  ;;  %3767 = vmatprep.mubr.bf16.mxu1 %v7301_v43  ;;  %v7375_v42 = vld [vmem:[%s9553_s1 + $0x61c] ss:$48 sps:$4 sm:$0xff]  }
 0x13f   : > { %4293 = vmatprep.mubr.bf16.mxu0 %v7303_v44  ;;  %4479 = vmatpush1.bf16.msra.mxu0 %v7388_v45  ;;  %v820_v43 = vld [vmem:[%s9554_s2 + $0x148] sm:$0xff]  ;;  %v821_v44 = vld [vmem:[%s9554_s2 + $0x150] sm:$0xff] }
 0x140   : > { %4480 = vmatprep.subr.bf16.mxu0 %v7405_v46  ;;  %6281 = vmatpush1.bf16.msra.mxu1 %v7388_v45  ;;  %v7377_v45 = vld [vmem:[%s9553_s1 + $0x608] ss:$48 sps:$4 sm:$0xff]  }
 0x141   : > { %6266 = vmatprep.subr.bf16.mxu1 %v7405_v46  ;;  %1007 = vperm.xlu0 %6912, %v815_v26   ;;  %v7378_v46 = vld [vmem:[%s9553_s1 + $0x618] ss:$48 sps:$4 sm:$0xff]   ;;  %v7444_v26 = vld [vmem:[%s9553_s1 + $0x320] ss:$48 sps:$4 sm:$0xff]  }
 0x142   : > { %1012 = vperm.xlu1 %6913, %v816_v31   ;;  %v7459_v31 = vld [vmem:[%s7725_s12 + $0x534] ss:$8 sps:$4 sm:$0xff]  }
 0x143   : > { %4481 = vmatpush1.bf16.msra.mxu0 %v7403_v48 }
 0x144   : > { %4482 = vmatprep.subr.bf16.mxu0 %v7414_v50  ;;  %6282 = vmatpush1.bf16.msra.mxu1 %v7403_v48  ;;  %v7384_v48 = vld [vmem:[%s9553_s1 + $0x67c] ss:$48 sps:$4 sm:$0xff]  }
 0x145   : > { %3768 = vmatmul.mubr.bf16.gmra.mrb[28].mxu1 %v7305_v51  ;;  %6267 = vmatprep.subr.bf16.mxu1 %v7414_v50  ;;  %v823_v50 = vld [vmem:[%s9554_s2 + $0x160] sm:$0xff]  ;;  %v7386_v51 = vld [vmem:[%s9553_s1 + $0x668] ss:$48 sps:$4 sm:$0xff]  }
 0x146   : > { %4294 = vmatmul.mubr.bf16.gmra.mrb[28].mxu0 %v7306_v52  ;;  %3777 = vmatprep.mubr.bf16.mxu1 %v7310_v53  ;;  %v7387_v52 = vld [vmem:[%s9553_s1 + $0x678] ss:$48 sps:$4 sm:$0xff]   ;;  %v7391_v53 = vld [vmem:[%s9553_s1 + $0x6cc] ss:$48 sps:$4 sm:$0xff]  }
 0x147   : > { %4303 = vmatprep.mubr.bf16.mxu0 %v7312_v54  ;;  %4483 = vmatpush1.bf16.msra.mxu0 %v7412_v55  ;;  %v7393_v54 = vld [vmem:[%s9553_s1 + $0x6dc] ss:$48 sps:$4 sm:$0xff]  }
 0x148   : > { %6283 = vmatpush1.bf16.msra.mxu1 %v7412_v55  ;;  %4484 = vmatprep.subr.bf16.mxu0 %v7429_v56  ;;  %v824_v55 = vld [vmem:[%s9554_s2 + $0x168] sm:$0xff] }
 0x149   : > { %6268 = vmatprep.subr.bf16.mxu1 %v7429_v56  ;;  %1017 = vperm.xlu0 %6912, %v817_v32   ;;  %v7395_v56 = vld [vmem:[%s9553_s1 + $0x6c8] ss:$48 sps:$4 sm:$0xff]  }
 0x14a   : > { %1022 = vperm.xlu1 %6913, %v818_v37   ;;  %v5145_v32 = vld [vmem:[%s9556_s4 + $0x18] sm:$0xff]  ;;  %v7455_v37 = vld [vmem:[%s9553_s1 + $0xe0] ss:$48 sps:$4 sm:$0xff]  }
 0x14b   : > { %4485 = vmatpush1.bf16.msra.mxu0 %v7427_v58 }
 0x14c   : > { %6284 = vmatpush1.bf16.msra.mxu1 %v7427_v58  ;;  %4717 = vmatprep.subr.bf16.mxu0 %v7438_v60  ;;  %v7397_v58 = vld [vmem:[%s9553_s1 + $0x72c] ss:$48 sps:$4 sm:$0xff]   ;;  %v7401_v60 = vld [vmem:[%s9553_s1 + $0x728] ss:$48 sps:$4 sm:$0xff]  }
 0x14d   : > { %3778 = vmatmul.mubr.bf16.gmra.mrb[32].mxu1 %v7314_v61  ;;  %1027 = vperm.xlu0 %6912, %v819_v38   ;;  %v7402_v61 = vld [vmem:[%s9553_s1 + $0x738] ss:$48 sps:$4 sm:$0xff]   ;;  %v7456_v38 = vld [vmem:[%s9553_s1 + $0x380] ss:$48 sps:$4 sm:$0xff]  }
 0x14e   : > { %4304 = vmatmul.mubr.bf16.gmra.mrb[32].mxu0 %v7315_v62  ;;  %3787 = vmatprep.mubr.bf16.mxu1 %v7316_v63  ;;  %v7406_v62 = vld [vmem:[%s9553_s1 + $0x78c] ss:$48 sps:$4 sm:$0xff]  }
 0x14f   : > { %4313 = vmatprep.mubr.bf16.mxu0 %v7318_v0  ;;  %1032 = vperm.xlu1 %6913, %v820_v43   ;;  %v7408_v63 = vld [vmem:[%s9553_s1 + $0x79c] ss:$48 sps:$4 sm:$0xff]   ;;  %v7410_v0 = vld [vmem:[%s9553_s1 + $0x788] ss:$48 sps:$4 sm:$0xff]  }
 0x150   : > { %v7471_v43 = vld [vmem:[%s7725_s12 + $0x554] ss:$8 sps:$4 sm:$0xff]  }
 0x151   : > { %1037 = vperm.xlu0 %6912, %v821_v44   ;;  %v5149_v44 = vld [vmem:[%s9556_s4 + $0x38] sm:$0xff] }
 0x153   : > { %1042 = vperm.xlu1 %6913, %v822_v49   ;;  %v7467_v49 = vld [vmem:[%s9553_s1 + $0x140] ss:$48 sps:$4 sm:$0xff]  }
 0x155   : > { %3788 = vmatmul.mubr.bf16.gmra.mrb[36].mxu1 %v7320_v3  ;;  %1047 = vperm.xlu0 %6912, %v823_v50   ;;  %v7417_v3 = vld [vmem:[%s9553_s1 + $0x7fc] ss:$48 sps:$4 sm:$0xff]   ;;  %v7468_v50 = vld [vmem:[%s9553_s1 + $0x3e0] ss:$48 sps:$4 sm:$0xff]  }
 0x156   : > { %4314 = vmatmul.mubr.bf16.gmra.mrb[36].mxu0 %v7321_v4  ;;  %3797 = vmatprep.mubr.bf16.mxu1 %v7325_v5  ;;  %v7419_v4 = vld [vmem:[%s9553_s1 + $0x7e8] ss:$48 sps:$4 sm:$0xff]  }
 0x157   : > { %4323 = vmatprep.mubr.bf16.mxu0 %v7327_v6  ;;  %1052 = vperm.xlu1 %6913, %v824_v55   ;;  %v7420_v5 = vld [vmem:[%s9553_s1 + $0x7f8] ss:$48 sps:$4 sm:$0xff]   ;;  %v7421_v6 = vld [vmem:[%s9553_s1 + $0x84c] ss:$48 sps:$4 sm:$0xff]  }
 0x158   : > { %v7483_v55 = vld [vmem:[%s7725_s12 + $0x574] ss:$8 sps:$4 sm:$0xff]  }
 0x15d   : > { %3798 = vmatmul.mubr.bf16.gmra.mrb[40].mxu1 %v7329_v9  ;;  %v7426_v9 = vld [vmem:[%s9553_s1 + $0x858] ss:$48 sps:$4 sm:$0xff]  }
 0x15e   : > { %4324 = vmatmul.mubr.bf16.gmra.mrb[40].mxu0 %v7330_v10  ;;  %3807 = vmatprep.mubr.bf16.mxu1 %v7334_v11  ;;  %v7432_v10 = vld [vmem:[%s9553_s1 + $0x24] ss:$48 sps:$4 sm:$0xff]  }
 0x15f   : > { %4333 = vmatprep.mubr.bf16.mxu0 %v7336_v12  ;;  %v7435_v11 = vld [vmem:[%s9553_s1 + $0x2c4] ss:$48 sps:$4 sm:$0xff]  }
 0x160   : > { %v5142_v12 = vld [vmem:[%s9556_s4] sm:$0xff] }
 0x161   : > { %5156 = vperm.xlu0 %6912, %v5142_v12  }
 0x165   : > { %3808 = vmatmul.mubr.bf16.gmra.mrb[44].mxu1 %v7338_v15  ;;  %v7430_v15 = vld [vmem:[%s9553_s1 + $0x20] ss:$48 sps:$4 sm:$0xff]   ;;  %5166 = vperm.xlu0 %6912, %v5144_v13   ;;  %v7496_v13 = vld [vmem:[%s9553_s1 + $0x264] ss:$48 sps:$4 sm:$0xff]  }
 0x166   : > { %4334 = vmatmul.mubr.bf16.gmra.mrb[44].mxu0 %v7339_v16  ;;  %3817 = vmatprep.mubr.bf16.mxu1 %v7340_v17  ;;  %v7433_v16 = vld [vmem:[%s9553_s1 + $0x2c0] ss:$48 sps:$4 sm:$0xff]  }
 0x167   : > { %4343 = vmatprep.mubr.bf16.mxu0 %v7342_v18  ;;  %v7436_v17 = vld [vmem:[%s7725_s12 + $0x500] ss:$8 sps:$4 sm:$0xff]   ;;  %v7439_v18 = vld [vmem:[%s9553_s1 + $0x84] ss:$48 sps:$4 sm:$0xff]  }
 0x16d   : > { %3818 = vmatmul.mubr.bf16.gmra.mrb[48].mxu1 %v7344_v21  ;;  %v5146_v21 = vld [vmem:[%s9556_s4 + $0x20] sm:$0xff] }
 0x16e   : > { %4344 = vmatmul.mubr.bf16.gmra.mrb[48].mxu0 %v7345_v22  ;;  %3827 = vmatprep.mubr.bf16.mxu1 %v7349_v23  ;;  %v7445_v22 = vld [vmem:[%s7725_s12 + $0x510] ss:$8 sps:$4 sm:$0xff]   ;;  %v5143_v23 = vld [vmem:[%s9556_s4 + $0x8] sm:$0xff] }
 0x16f   : > { %4353 = vmatprep.mubr.bf16.mxu0 %v7351_v24  ;;  %v7450_v24 = vld [vmem:[%s7725_s12 + $0x524] ss:$8 sps:$4 sm:$0xff]   ;;  %5176 = vperm.xlu0 %6912, %v5146_v21  }
 0x170   : > { %5161 = vperm.xlu1 %6913, %v5143_v23   ;;  %v7501_v23 = vld [vmem:[%s9553_s1 + $0x500] ss:$48 sps:$4 sm:$0xff]  }
 0x174   : > { %5171 = vperm.xlu1 %6913, %v5145_v32   ;;  %v7510_v32 = vld [vmem:[%s9553_s1 + $0x28] ss:$48 sps:$4 sm:$0xff]  }
 0x175   : > { %3828 = vmatmul.mubr.bf16.gmra.mrb[52].mxu1 %v7353_v27  ;;  %v5148_v27 = vld [vmem:[%s9556_s4 + $0x30] sm:$0xff] }
 0x176   : > { %4354 = vmatmul.mubr.bf16.gmra.mrb[52].mxu0 %v7354_v28  ;;  %3837 = vmatprep.mubr.bf16.mxu1 %v7358_v29  ;;  %v7451_v28 = vld [vmem:[%s9553_s1 + $0xe4] ss:$48 sps:$4 sm:$0xff]  }
 0x177   : > { %4363 = vmatprep.mubr.bf16.mxu0 %v7360_v30  ;;  %v7453_v29 = vld [vmem:[%s9553_s1 + $0x384] ss:$48 sps:$4 sm:$0xff]   ;;  %v7448_v30 = vld [vmem:[%s7725_s12 + $0x520] ss:$8 sps:$4 sm:$0xff]   ;;  %5186 = vperm.xlu0 %6912, %v5148_v27  }
 0x17d   : > { %3838 = vmatmul.mubr.bf16.gmra.mrb[56].mxu1 %v7362_v33  ;;  %v5150_v33 = vld [vmem:[%s9556_s4 + $0x40] sm:$0xff] }
 0x17e   : > { %4364 = vmatmul.mubr.bf16.gmra.mrb[56].mxu0 %v7363_v34  ;;  %3847 = vmatprep.mubr.bf16.mxu1 %v7364_v35  ;;  %v7457_v34 = vld [vmem:[%s7725_s12 + $0x530] ss:$8 sps:$4 sm:$0xff]   ;;  %v7466_v35 = vld [vmem:[%s7725_s12 + $0x544] ss:$8 sps:$4 sm:$0xff]  }
 0x17f   : > { %4373 = vmatprep.mubr.bf16.mxu0 %v7366_v36  ;;  %5196 = vperm.xlu0 %6912, %v5150_v33   ;;  %v5147_v36 = vld [vmem:[%s9556_s4 + $0x28] sm:$0xff]  ;;  %v7513_v33 = vld [vmem:[%s9553_s1 + $0x560] ss:$48 sps:$4 sm:$0xff]  }
 0x180   : > { %5181 = vperm.xlu1 %6913, %v5147_v36   ;;  %v7516_v36 = vld [vmem:[%s9553_s1 + $0x8c] ss:$48 sps:$4 sm:$0xff]  }
 0x184   : > { %5191 = vperm.xlu1 %6913, %v5149_v44  }
 0x185   : > { %3848 = vmatmul.mubr.bf16.gmra.mrb[60].mxu1 %v7371_v39  ;;  %v5152_v39 = vld [vmem:[%s9556_s4 + $0x50] sm:$0xff] }
 0x186   : > { %4374 = vmatmul.mubr.bf16.gmra.mrb[60].mxu0 %v7372_v40  ;;  %3857 = vmatprep.mubr.bf16.mxu1 %v7373_v41  ;;  %v7460_v40 = vld [vmem:[%s9553_s1 + $0x144] ss:$48 sps:$4 sm:$0xff]  }
 0x187   : > { %4383 = vmatprep.mubr.bf16.mxu0 %v7375_v42  ;;  %v7462_v41 = vld [vmem:[%s9553_s1 + $0x3e4] ss:$48 sps:$4 sm:$0xff]   ;;  %v7464_v42 = vld [vmem:[%s7725_s12 + $0x540] ss:$8 sps:$4 sm:$0xff]   ;;  %5206 = vperm.xlu0 %6912, %v5152_v39  }
 0x18d   : > { %3858 = vmatmul.mubr.bf16.gmra.mrb[64].mxu1 %v7377_v45  ;;  %v5548_v45 = vld [vmem:[%s9558_s6] sm:$0xff] }
 0x18e   : > { %4384 = vmatmul.mubr.bf16.gmra.mrb[64].mxu0 %v7378_v46  ;;  %3867 = vmatprep.mubr.bf16.mxu1 %v7382_v47  ;;  %v7469_v46 = vld [vmem:[%s7725_s12 + $0x550] ss:$8 sps:$4 sm:$0xff]   ;;  %v7480_v47 = vld [vmem:[%s7725_s12 + $0x564] ss:$8 sps:$4 sm:$0xff]  }
 0x18f   : > { %4393 = vmatprep.mubr.bf16.mxu0 %v7384_v48  ;;  %5553 = vperm.xlu0 %6912, %v5548_v45   ;;  %v5151_v48 = vld [vmem:[%s9556_s4 + $0x48] sm:$0xff] }
 0x190   : > { %5201 = vperm.xlu1 %6913, %v5151_v48  }
 0x195   : > { %3868 = vmatmul.mubr.bf16.gmra.mrb[68].mxu1 %v7386_v51  ;;  %v5550_v51 = vld [vmem:[%s9558_s6 + $0x10] sm:$0x1f] }
 0x196   : > { %4394 = vmatmul.mubr.bf16.gmra.mrb[68].mxu0 %v7387_v52  ;;  %3877 = vmatprep.mubr.bf16.mxu1 %v7391_v53  ;;  %v7472_v52 = vld [vmem:[%s9553_s1 + $0x1a4] ss:$48 sps:$4 sm:$0xff]  }
 0x197   : > { %4403 = vmatprep.mubr.bf16.mxu0 %v7393_v54  ;;  %v7474_v53 = vld [vmem:[%s9553_s1 + $0x444] ss:$48 sps:$4 sm:$0xff]   ;;  %v7478_v54 = vld [vmem:[%s7725_s12 + $0x560] ss:$8 sps:$4 sm:$0xff]   ;;  %5563 = vperm.xlu0 %6912, %v5550_v51  }
 0x19d   : > { %3878 = vmatmul.mubr.bf16.gmra.mrb[72].mxu1 %v7395_v56  ;;  %v5153_v56 = vld [vmem:[%s9556_s4 + $0x58] sm:$0xf] }
 0x19e   : > { %4404 = vmatmul.mubr.bf16.gmra.mrb[72].mxu0 %v7396_v57  ;;  %3887 = vmatprep.mubr.bf16.mxu1 %v7397_v58  ;;  %v7481_v57 = vld [vmem:[%s7725_s12 + $0x570] ss:$8 sps:$4 sm:$0xff]  }
 0x19f   : > { %4413 = vmatprep.mubr.bf16.mxu0 %v7399_v59  ;;  %5211 = vperm.xlu1 %6913, %v5153_v56   ;;  %v7492_v59 = vld [vmem:[%s7725_s12 + $0x584] ss:$8 sps:$4 sm:$0xff]  }
 0x1a5   : > { %3888 = vmatmul.mubr.bf16.gmra.mrb[76].mxu1 %v7401_v60  ;;  %v5549_v60 = vld [vmem:[%s9558_s6 + $0x8] sm:$0xff] }
 0x1a6   : > { %4414 = vmatmul.mubr.bf16.gmra.mrb[76].mxu0 %v7402_v61  ;;  %3897 = vmatprep.mubr.bf16.mxu1 %v7406_v62  ;;  %v7476_v62 = vld [vmem:[%s9553_s1 + $0x1a0] ss:$48 sps:$4 sm:$0xff]  }
 0x1a7   : > { %4423 = vmatprep.mubr.bf16.mxu0 %v7408_v63  ;;  %v7477_v63 = vld [vmem:[%s9553_s1 + $0x440] ss:$48 sps:$4 sm:$0xff]   ;;  %5558 = vperm.xlu1 %6913, %v5549_v60   ;;  %v7528_v60 = vld [vmem:[%s9553_s1 + $0x14c] ss:$48 sps:$4 sm:$0xff]  }
 0x1ad   : > { %3898 = vmatmul.mubr.bf16.gmra.mrb[80].mxu1 %v7410_v0 }
 0x1ae   : > { %4424 = vmatmul.mubr.bf16.gmra.mrb[80].mxu0 %v7411_v1  ;;  %3907 = vmatprep.mubr.bf16.mxu1 %v7415_v2  ;;  %v7484_v1 = vld [vmem:[%s9553_s1 + $0x204] ss:$48 sps:$4 sm:$0xff]  }
 0x1af   : > { %4433 = vmatprep.mubr.bf16.mxu0 %v7417_v3  ;;  %v7486_v2 = vld [vmem:[%s9553_s1 + $0x4a4] ss:$48 sps:$4 sm:$0xff]  }
 0x1b5   : > { %3908 = vmatmul.mubr.bf16.gmra.mrb[84].mxu1 %v7419_v4  ;;  %v7490_v4 = vld [vmem:[%s7725_s12 + $0x580] ss:$8 sps:$4 sm:$0xff]  }
 0x1b6   : > { %4434 = vmatmul.mubr.bf16.gmra.mrb[84].mxu0 %v7420_v5  ;;  %3917 = vmatprep.mubr.bf16.mxu1 %v7421_v6  ;;  %v7495_v5 = vld [vmem:[%s7725_s12 + $0x594] ss:$8 sps:$4 sm:$0xff]   ;;  %v7493_v6 = vld [vmem:[%s7725_s12 + $0x590] ss:$8 sps:$4 sm:$0xff]  }
 0x1b7   : > { %4443 = vmatprep.mubr.bf16.mxu0 %v7423_v7 }
 0x1bd   : > { %3918 = vmatmul.mubr.bf16.gmra.mrb[88].mxu1 %v7425_v8  ;;  %v7504_v8 = vld [vmem:[%s7725_s12 + $0x5a4] ss:$8 sps:$4 sm:$0xff]  }
 0x1be   : > { %4444 = vmatmul.mubr.bf16.gmra.mrb[88].mxu0 %v7426_v9  ;;  %4556 = vmatprep.mubr.bf16.mxu1 %v7435_v11  ;;  %v7489_v11 = vld [vmem:[%s9553_s1 + $0x4a0] ss:$48 sps:$4 sm:$0xff]  }
 0x1bf   : > { %4486 = vmatprep.mubr.bf16.mxu0 %v7432_v10  ;;  %v7488_v10 = vld [vmem:[%s9553_s1 + $0x200] ss:$48 sps:$4 sm:$0xff]  }
 0x1c5   : > { %4557 = vmatmul.mubr.bf16.vlgmr.msra.gmra.mrb[92].mxu1 %v7433_v16 }
 0x1c6   : > { %4487 = vmatmul.mubr.bf16.vlgmr.msra.gmra.mrb[0].mxu0 %v7430_v15  ;;  %4566 = vmatprep.mubr.bf16.mxu1 %v7441_v19  ;;  %v7498_v15 = vld [vmem:[%s9553_s1 + $0x504] ss:$48 sps:$4 sm:$0xff]   ;;  %v7505_v19 = vld [vmem:[%s7725_s12 + $0x5b0] ss:$8 sps:$4 sm:$0xff]  }
 0x1c7   : > { %4718 = vmatpush1.bf16.msra.mxu0 %v7436_v17  ;;  %4496 = vmatprep.mubr.bf16.mxu0 %v7439_v18  ;;  %v7502_v17 = vld [vmem:[%s7725_s12 + $0x5a0] ss:$8 sps:$4 sm:$0xff]   ;;  %v7507_v18 = vld [vmem:[%s7725_s12 + $0x5b4] ss:$8 sps:$4 sm:$0xff]  }
 0x1c8   : > { %4719 = vmatprep.subr.bf16.mxu0 %v7447_v20 }
 0x1cb   : > { %4720 = vmatpush1.bf16.msra.mxu0 %v7445_v22  ;;  %v7500_v22 = vld [vmem:[%s9553_s1 + $0x260] ss:$48 sps:$4 sm:$0xff]  }
 0x1cc   : > { %4721 = vmatprep.subr.bf16.mxu0 %v7450_v24 }
 0x1cd   : > { %4567 = vmatmul.mubr.bf16.gmra.mrb[96].mxu1 %v7444_v26  ;;  %v7512_v26 = vld [vmem:[%s9553_s1 + $0x2c] ss:$48 sps:$4 sm:$0xff]  }
 0x1ce   : > { %4497 = vmatmul.mubr.bf16.gmra.mrb[4].mxu0 %v7443_v25  ;;  %4576 = vmatprep.mubr.bf16.mxu1 %v7453_v29  ;;  %v7508_v25 = vld [vmem:[%s9553_s1 + $0x564] ss:$48 sps:$4 sm:$0xff]  }
 0x1cf   : > { %4506 = vmatprep.mubr.bf16.mxu0 %v7451_v28  ;;  %4722 = vmatpush1.bf16.msra.mxu0 %v7448_v30  ;;  %v8757_v28 = vpop.permute.xlu0 %827  ;;  %v8761_v30 = vpop.permute.xlu1 %837 }
 0x1d0   : > { %4723 = vmatprep.subr.bf16.mxu0 %v7459_v31 }
 0x1d3   : > { %4724 = vmatpush1.bf16.msra.mxu0 %v7457_v34  ;;  %v8784_v39 = vpop.permute.xlu1 %842 }
 0x1d4   : > { %4725 = vmatprep.subr.bf16.mxu0 %v7466_v35  ;;  %v7514_v35 = vld [vmem:[%s9553_s1 + $0x5c4] ss:$48 sps:$4 sm:$0xff]  }
 0x1d5   : > { %4577 = vmatmul.mubr.bf16.gmra.mrb[100].mxu1 %v7456_v38  ;;  %v8781_v38 = vpop.permute.xlu0 %832 }
 0x1d6   : > { %4507 = vmatmul.mubr.bf16.gmra.mrb[8].mxu0 %v7455_v37  ;;  %4586 = vmatprep.mubr.bf16.mxu1 %v7462_v41 }
 0x1d7   : > { %4516 = vmatprep.mubr.bf16.mxu0 %v7460_v40  ;;  %4726 = vmatpush1.bf16.msra.mxu0 %v7464_v42  ;;  %v7518_v42 = vld [vmem:[%s9553_s1 + $0x5c0] ss:$48 sps:$4 sm:$0xff]   ;;  %v8806_v48 = vpop.permute.xlu1 %852 }
 0x1d8   : > { %4727 = vmatprep.subr.bf16.mxu0 %v7471_v43  ;;  %v7519_v43 = vld [vmem:[%s9553_s1 + $0x88] ss:$48 sps:$4 sm:$0xff]   ;;  %9586 = vst [vmem:[#allocation16_spill] sm:$0xff] %v8806_v48 }
 0x1d9   : > { %v8796_v44 = vpop.permute.xlu0 %847 }
 0x1da   : > { %9584 = vst [vmem:[#allocation14_spill] sm:$0xff] %v8796_v44 }
 0x1db   : > { %4728 = vmatpush1.bf16.msra.mxu0 %v7469_v46  ;;  %v7520_v46 = vld [vmem:[%s9553_s1 + $0x624] ss:$48 sps:$4 sm:$0xff]   ;;  %v8813_v51 = vpop.permute.xlu1 %862 }
 0x1dc   : > { %4729 = vmatprep.subr.bf16.mxu0 %v7480_v47  ;;  %v7522_v47 = vld [vmem:[%s9553_s1 + $0xec] ss:$48 sps:$4 sm:$0xff]   ;;  %9589 = vst [vmem:[#allocation19_spill] sm:$0xff] %v8813_v51 }
 0x1dd   : > { %4587 = vmatmul.mubr.bf16.gmra.mrb[104].mxu1 %v7468_v50  ;;  %v8810_v50 = vpop.permute.xlu0 %857 }
 0x1de   : > { %4517 = vmatmul.mubr.bf16.gmra.mrb[12].mxu0 %v7467_v49  ;;  %4596 = vmatprep.mubr.bf16.mxu1 %v7474_v53  ;;  %9588 = vst [vmem:[#allocation18_spill] sm:$0xff] %v8810_v50 }
 0x1df   : > { %4526 = vmatprep.mubr.bf16.mxu0 %v7472_v52  ;;  %4730 = vmatpush1.bf16.msra.mxu0 %v7478_v54  ;;  %v7524_v54 = vld [vmem:[%s9553_s1 + $0x620] ss:$48 sps:$4 sm:$0xff]  }
 0x1e0   : > { %v8685_v58 = vpop.f32.mrb[0].mxu1  ;;  %4731 = vmatprep.subr.bf16.mxu0 %v7483_v55  ;;  %v7525_v55 = vld [vmem:[%s9553_s1 + $0xe8] ss:$48 sps:$4 sm:$0xff]  }
 0x1e1   : > { %v8691_v61 = vpop.f32.mrb[1].mxu1  ;;  %v8825_v56 = vpop.permute.xlu0 %867 }
 0x1e2   : > { %v8699_v0 = vpop.f32.mrb[2].mxu1  ;;  %9592 = vst [vmem:[#allocation22_spill] sm:$0xff] %v8825_v56 }
 0x1e3   : > { %v8707_v3 = vpop.f32.mrb[3].mxu1  ;;  %4732 = vmatpush1.bf16.msra.mxu0 %v7481_v57 }
 0x1e4   : > { %4733 = vmatprep.subr.bf16.mxu0 %v7492_v59  ;;  %v7526_v59 = vld [vmem:[%s9553_s1 + $0x684] ss:$48 sps:$4 sm:$0xff]  }
 0x1e5   : > { %4597 = vmatmul.mubr.bf16.gmra.mrb[108].mxu1 %v7477_v63 }
 0x1e6   : > { %4527 = vmatmul.mubr.bf16.gmra.mrb[16].mxu0 %v7476_v62  ;;  %4606 = vmatprep.mubr.bf16.mxu1 %v7486_v2  ;;  %v8835_v62 = vpop.permute.xlu1 %872 }
 0x1e7   : > { %4536 = vmatprep.mubr.bf16.mxu0 %v7484_v1  ;;  %4734 = vmatpush1.bf16.msra.mxu0 %v7490_v4  ;;  %9594 = vst [vmem:[#allocation24_spill] sm:$0xff] %v8835_v62  ;;  %v8839_v1 = vpop.permute.xlu0 %877 }
 0x1e8   : > { %v8712_v7 = vpop.f32.mrb[4].mxu1  ;;  %4735 = vmatprep.subr.bf16.mxu0 %v7495_v5  ;;  %9596 = vst [vmem:[#allocation26_spill] sm:$0xff] %v8839_v1 }
 0x1e9   : > { %v8715_v9 = vpop.f32.mrb[5].mxu1 }
 0x1ea   : > { %v8723_v12 = vpop.f32.mrb[6].mxu1  ;;  %v8842_v2 = vpop.permute.xlu1 %882 }
 0x1eb   : > { %9572 = vst [vmem:[#allocation2_spill] sm:$0xff] %v8723_v12  ;;  %v8731_v16 = vpop.f32.mrb[7].mxu1  ;;  %4736 = vmatpush1.bf16.msra.mxu0 %v7493_v6  ;;  %9597 = vst [vmem:[#allocation27_spill] sm:$0xff] %v8842_v2  ;;  %v7530_v6 = vld [vmem:[%s9553_s1 + $0x680] ss:$48 sps:$4 sm:$0xff]  }
 0x1ec   : > { %9573 = vst [vmem:[#allocation3_spill] sm:$0xff] %v8731_v16  ;;  %4737 = vmatprep.subr.bf16.mxu0 %v7504_v8  ;;  %v7531_v8 = vld [vmem:[%s9553_s1 + $0x148] ss:$48 sps:$4 sm:$0xff]  }
 0x1ed   : > { %4607 = vmatmul.mubr.bf16.gmra.mrb[112].mxu1 %v7489_v11 }
 0x1ee   : > { %4537 = vmatmul.mubr.bf16.gmra.mrb[20].mxu0 %v7488_v10  ;;  %4616 = vmatprep.mubr.bf16.mxu1 %v7498_v15  ;;  %v8854_v10 = vpop.permute.xlu0 %887  ;;  %v7534_v15 = vld [vmem:[%s9553_s1 + $0x1ac] ss:$48 sps:$4 sm:$0xff]  }
 0x1ef   : > { %4546 = vmatprep.mubr.bf16.mxu0 %v7496_v13  ;;  %4738 = vmatpush1.bf16.msra.mxu0 %v7502_v17  ;;  %9600 = vst [vmem:[#allocation30_spill] sm:$0xff] %v8854_v10  ;;  %v7532_v13 = vld [vmem:[%s9553_s1 + $0x6e4] ss:$48 sps:$4 sm:$0xff]   ;;  %v8864_v17 = vpop.permute.xlu1 %892 }
 0x1f0   : > { %v8736_v20 = vpop.f32.mrb[8].mxu1  ;;  %4739 = vmatprep.subr.bf16.mxu0 %v7507_v18  ;;  %9602 = vst [vmem:[#allocation32_spill] sm:$0xff] %v8864_v17 }
 0x1f1   : > { %9574 = vst [vmem:[#allocation4_spill] sm:$0xff] %v8736_v20  ;;  %v8738_v21 = vpop.f32.mrb[9].mxu1 }
 0x1f2   : > { %9575 = vst [vmem:[#allocation5_spill] sm:$0xff] %v8738_v21  ;;  %v8746_v24 = vpop.f32.mrb[10].mxu1 }
 0x1f3   : > { %9576 = vst [vmem:[#allocation6_spill] sm:$0xff] %v8746_v24  ;;  %v8754_v27 = vpop.f32.mrb[11].mxu1  ;;  %4740 = vmatpush1.bf16.msra.mxu0 %v7505_v19  ;;  %v898_v19 = vpop.permute.xlu0 %897 }
 0x1f4   : > { %9577 = vst [vmem:[#allocation7_spill] sm:$0xff] %v8754_v27 }
 0x1f5   : > { %4617 = vmatmul.mubr.bf16.gmra.mrb[116].mxu1 %v7501_v23 }
 0x1f6   : > { %4547 = vmatmul.mubr.bf16.gmra.mrb[24].mxu0 %v7500_v22  ;;  %4626 = vmatprep.mubr.bf16.mxu1 %v7508_v25  ;;  %v903_v22 = vpop.permute.xlu1 %902 }
 0x1f7   : > { %6199 = vmatprep.mubr.msk.bf16.mxu0 %vm3332_vm0, %v7512_v26 }
 0x1f8   : > { %v8759_v29 = vpop.f32.mrb[12].mxu1 }
 0x1f9   : > { %9578 = vst [vmem:[#allocation8_spill] sm:$0xff] %v8759_v29  ;;  %v8763_v31 = vpop.f32.mrb[13].mxu1 }
 0x1fa   : > { %9579 = vst [vmem:[#allocation9_spill] sm:$0xff] %v8763_v31  ;;  %v8771_v34 = vpop.f32.mrb[14].mxu1 }
 0x1fb   : > { %9580 = vst [vmem:[#allocation10_spill] sm:$0xff] %v8771_v34  ;;  %v8779_v37 = vpop.f32.mrb[15].mxu1 }
 0x1fc   : > { %9581 = vst [vmem:[#allocation11_spill] sm:$0xff] %v8779_v37 }
 0x1fd   : > { %4627 = vmatmul.mubr.bf16.gmra.mrb[120].mxu1 %v7513_v33 }
 0x1fe   : > { %4750 = vmatmul.mubr.bf16.vlgmr.msra.gmra.mrb[0].mxu0 %v7510_v32  ;;  %4636 = vmatprep.mubr.bf16.mxu1 %v7514_v35  ;;  %v7536_v35 = vld [vmem:[%s9553_s1 + $0x6e0] ss:$48 sps:$4 sm:$0xff]  }
 0x1ff   : > { %6200 = vmatprep.mubr.msk.bf16.mxu0 %vm3332_vm0, %v7516_v36  ;;  %v7537_v36 = vld [vmem:[%s9553_s1 + $0x1a8] ss:$48 sps:$4 sm:$0xff]  }
 0x200   : > { %v8786_v40 = vpop.f32.mrb[16].mxu1 }
 0x201   : > { %9582 = vst [vmem:[#allocation12_spill] sm:$0xff] %v8786_v40  ;;  %v8788_v41 = vpop.f32.mrb[17].mxu1 }
 0x202   : > { %9583 = vst [vmem:[#allocation13_spill] sm:$0xff] %v8788_v41  ;;  %v8798_v45 = vpop.f32.mrb[18].mxu1 }
 0x203   : > { %9585 = vst [vmem:[#allocation15_spill] sm:$0xff] %v8798_v45  ;;  %v8808_v49 = vpop.f32.mrb[19].mxu1 }
 0x204   : > { %9587 = vst [vmem:[#allocation17_spill] sm:$0xff] %v8808_v49 }
 0x205   : > { %4637 = vmatmul.mubr.bf16.gmra.mrb[124].mxu1 %v7518_v42 }
 0x206   : > { %4760 = vmatmul.mubr.bf16.gmra.mrb[4].mxu0 %v7519_v43  ;;  %4646 = vmatprep.mubr.bf16.mxu1 %v7520_v46 }
 0x207   : > { %6201 = vmatprep.mubr.msk.bf16.mxu0 %vm3332_vm0, %v7522_v47  ;;  %v7538_v47 = vld [vmem:[%s9553_s1 + $0x744] ss:$48 sps:$4 sm:$0xff]  }
 0x208   : > { %v8815_v52 = vpop.f32.mrb[20].mxu1 }
 0x209   : > { %9590 = vst [vmem:[#allocation20_spill] sm:$0xff] %v8815_v52  ;;  %v8817_v53 = vpop.f32.mrb[21].mxu1 }
 0x20a   : > { %9591 = vst [vmem:[#allocation21_spill] sm:$0xff] %v8817_v53  ;;  %v8827_v57 = vpop.f32.mrb[22].mxu1 }
 0x20b   : > { %9593 = vst [vmem:[#allocation23_spill] sm:$0xff] %v8827_v57  ;;  %v8837_v63 = vpop.f32.mrb[23].mxu1 }
 0x20c   : > { %9595 = vst [vmem:[#allocation25_spill] sm:$0xff] %v8837_v63 }
 0x20d   : > { %4647 = vmatmul.mubr.bf16.gmra.mrb[128].mxu1 %v7524_v54  ;;  %v7540_v54 = vld [vmem:[%s9553_s1 + $0x20c] ss:$48 sps:$4 sm:$0xff]  }
 0x20e   : > { %4770 = vmatmul.mubr.bf16.gmra.mrb[8].mxu0 %v7525_v55  ;;  %4656 = vmatprep.mubr.bf16.mxu1 %v7526_v59 }
 0x20f   : > { %6202 = vmatprep.mubr.msk.bf16.mxu0 %vm3332_vm0, %v7528_v60 }
 0x210   : > { %v8844_v4 = vpop.f32.mrb[24].mxu1 }
 0x211   : > { %9598 = vst [vmem:[#allocation28_spill] sm:$0xff] %v8844_v4  ;;  %v8846_v5 = vpop.f32.mrb[25].mxu1 }
 0x212   : > { %9599 = vst [vmem:[#allocation29_spill] sm:$0xff] %v8846_v5  ;;  %v8856_v11 = vpop.f32.mrb[26].mxu1 }
 0x213   : > { %9601 = vst [vmem:[#allocation31_spill] sm:$0xff] %v8856_v11  ;;  %v8866_v18 = vpop.f32.mrb[27].mxu1 }
 0x214   : > { %9603 = vst [vmem:[#allocation33_spill] sm:$0xff] %v8866_v18 }
 0x215   : > { %4657 = vmatmul.mubr.bf16.gmra.mrb[132].mxu1 %v7530_v6 }
 0x216   : > { %4780 = vmatmul.mubr.bf16.gmra.mrb[12].mxu0 %v7531_v8  ;;  %4666 = vmatprep.mubr.bf16.mxu1 %v7532_v13 }
 0x217   : > { %6203 = vmatprep.mubr.msk.bf16.mxu0 %vm3332_vm0, %v7534_v15 }
 0x218   : > { %v3769_v23 = vpop.f32.mrb[28].mxu1 }
 0x219   : > { %v4295_v25 = vpop.f32.mrb[28].mxu0  ;;  %v6341_v26 = vadd.f32 %v3769_v23, %v898_v19  ;;  %v3771_v32 = vpop.f32.mrb[29].mxu1 }
 0x21a   : > { %v4297_v33 = vpop.f32.mrb[29].mxu0  ;;  %v6345_v42 = vadd.f32 %v3771_v32, %v898_v19  ;;  %v3773_v43 = vpop.f32.mrb[30].mxu1 }
 0x21b   : > { %v4299_v46 = vpop.f32.mrb[30].mxu0  ;;  %v8881_v55 = vadd.f32 %v6341_v26, %v4295_v25  ;;  %v6349_v59 = vadd.f32 %v3773_v43, %v903_v22  ;;  %v3775_v60 = vpop.f32.mrb[31].mxu1 }
 0x21c   : > { %v4301_v6 = vpop.f32.mrb[31].mxu0  ;;  %v8883_v8 = vadd.f32 %v6345_v42, %v4297_v33  ;;  %v6353_v13 = vadd.f32 %v3775_v60, %v903_v22  ;;  %v908_v23 = vpop.permute.xlu0 %907  ;;  %v7542_v22 = vld [vmem:[%s9553_s1 + $0x740] ss:$48 sps:$4 sm:$0xff]   ;;  %v7543_v33 = vld [vmem:[%s9553_s1 + $0x208] ss:$48 sps:$4 sm:$0xff]  }
 0x21d   : > { %v8885_v15 = vadd.f32 %v6349_v59, %v4299_v46  ;;  %4667 = vmatmul.mubr.bf16.gmra.mrb[136].mxu1 %v7536_v35  ;;  %v913_v32 = vpop.permute.xlu1 %912  ;;  %v7544_v46 = vld [vmem:[%s9553_s1 + $0x7a4] ss:$48 sps:$4 sm:$0xff]  }
 0x21e   : > { %4790 = vmatmul.mubr.bf16.gmra.mrb[16].mxu0 %v7537_v36  ;;  %v8887_v19 = vadd.f32 %v6353_v13, %v4301_v6  ;;  %4676 = vmatprep.mubr.bf16.mxu1 %v7538_v47 }
 0x21f   : > { %6204 = vmatprep.mubr.msk.bf16.mxu0 %vm3332_vm0, %v7540_v54 }
 0x220   : > { %v3779_v14 = vpop.f32.mrb[32].mxu1 }
 0x221   : > { %v4305_v25 = vpop.f32.mrb[32].mxu0  ;;  %v6357_v26 = vadd.f32 %v3779_v14, %v908_v23  ;;  %v3781_v43 = vpop.f32.mrb[33].mxu1  ;;  %v7546_v14 = vld [vmem:[%s9553_s1 + $0x26c] ss:$48 sps:$4 sm:$0xff]  }
 0x222   : > { %v4307_v18 = vpop.f32.mrb[33].mxu0  ;;  %v6361_v35 = vadd.f32 %v3781_v43, %v908_v23  ;;  %v3783_v36 = vpop.f32.mrb[34].mxu1 }
 0x223   : > { %v4309_v42 = vpop.f32.mrb[34].mxu0  ;;  %v8902_v47 = vadd.f32 %v6357_v26, %v4305_v25  ;;  %v6365_v54 = vadd.f32 %v3783_v36, %v913_v32  ;;  %v3785_v59 = vpop.f32.mrb[35].mxu1 }
 0x224   : > { %v4311_v60 = vpop.f32.mrb[35].mxu0  ;;  %v8904_v6 = vadd.f32 %v6361_v35, %v4307_v18  ;;  %v6369_v13 = vadd.f32 %v3785_v59, %v913_v32  ;;  %v918_v43 = vpop.permute.xlu0 %917  ;;  %v7548_v18 = vld [vmem:[%s9553_s1 + $0x7a0] ss:$48 sps:$4 sm:$0xff]   ;;  %v7549_v32 = vld [vmem:[%s9553_s1 + $0x268] ss:$48 sps:$4 sm:$0xff]  }
 0x225   : > { %v8906_v11 = vadd.f32 %v6365_v54, %v4309_v42  ;;  %4677 = vmatmul.mubr.bf16.gmra.mrb[140].mxu1 %v7542_v22  ;;  %v923_v17 = vpop.permute.xlu1 %922  ;;  %v7550_v42 = vld [vmem:[%s9553_s1 + $0x804] ss:$48 sps:$4 sm:$0xff]  }
 0x226   : > { %4800 = vmatmul.mubr.bf16.gmra.mrb[20].mxu0 %v7543_v33  ;;  %v8908_v23 = vadd.f32 %v6369_v13, %v4311_v60  ;;  %4686 = vmatprep.mubr.bf16.mxu1 %v7544_v46 }
 0x227   : > { %6205 = vmatprep.mubr.msk.bf16.mxu0 %vm3332_vm0, %v7546_v14 }
 0x228   : > { %v3789_v5 = vpop.f32.mrb[36].mxu1 }
 0x229   : > { %v4315_v25 = vpop.f32.mrb[36].mxu0  ;;  %v6373_v26 = vadd.f32 %v3789_v5, %v918_v43  ;;  %v3791_v36 = vpop.f32.mrb[37].mxu1  ;;  %v7552_v5 = vld [vmem:[%s9553_s1 + $0x2cc] ss:$48 sps:$4 sm:$0xff]  }
 0x22a   : > { %v4317_v4 = vpop.f32.mrb[37].mxu0  ;;  %v6377_v22 = vadd.f32 %v3791_v36, %v918_v43  ;;  %v3793_v33 = vpop.f32.mrb[38].mxu1 }
 0x22b   : > { %v4319_v35 = vpop.f32.mrb[38].mxu0  ;;  %v8923_v46 = vadd.f32 %v6373_v26, %v4315_v25  ;;  %v6381_v14 = vadd.f32 %v3793_v33, %v923_v17  ;;  %v3795_v54 = vpop.f32.mrb[39].mxu1 }
 0x22c   : > { %v4321_v59 = vpop.f32.mrb[39].mxu0  ;;  %v8925_v60 = vadd.f32 %v6377_v22, %v4317_v4  ;;  %v6385_v13 = vadd.f32 %v3795_v54, %v923_v17  ;;  %v928_v36 = vpop.permute.xlu0 %927  ;;  %v7554_v4 = vld [vmem:[%s9553_s1 + $0x800] ss:$48 sps:$4 sm:$0xff]   ;;  %v7555_v17 = vld [vmem:[%s9553_s1 + $0x2c8] ss:$48 sps:$4 sm:$0xff]  }
 0x22d   : > { %v8927_v10 = vadd.f32 %v6381_v14, %v4319_v35  ;;  %4687 = vmatmul.mubr.bf16.gmra.mrb[144].mxu1 %v7548_v18  ;;  %v933_v63 = vpop.permute.xlu1 %932  ;;  %v7556_v35 = vld [vmem:[%s9553_s1 + $0x864] ss:$48 sps:$4 sm:$0xff]  }
 0x22e   : > { %4810 = vmatmul.mubr.bf16.gmra.mrb[24].mxu0 %v7549_v32  ;;  %v8929_v43 = vadd.f32 %v6385_v13, %v4321_v59  ;;  %4696 = vmatprep.mubr.bf16.mxu1 %v7550_v42 }
 0x22f   : > { %6206 = vmatprep.mubr.msk.bf16.mxu0 %vm3332_vm0, %v7552_v5 }
 0x230   : > { %v3799_v57 = vpop.f32.mrb[40].mxu1 }
 0x231   : > { %v4325_v25 = vpop.f32.mrb[40].mxu0  ;;  %v6389_v26 = vadd.f32 %v3799_v57, %v928_v36  ;;  %v3801_v33 = vpop.f32.mrb[41].mxu1  ;;  %v7558_v57 = vld [vmem:[%s9553_s1 + $0x32c] ss:$48 sps:$4 sm:$0xff]  }
 0x232   : > { %v4327_v2 = vpop.f32.mrb[41].mxu0  ;;  %v6393_v18 = vadd.f32 %v3801_v33, %v928_v36  ;;  %v3803_v32 = vpop.f32.mrb[42].mxu1 }
 0x233   : > { %v4329_v22 = vpop.f32.mrb[42].mxu0  ;;  %v8944_v42 = vadd.f32 %v6389_v26, %v4325_v25  ;;  %v6397_v5 = vadd.f32 %v3803_v32, %v933_v63  ;;  %v3805_v14 = vpop.f32.mrb[43].mxu1 }
 0x234   : > { %v4331_v54 = vpop.f32.mrb[43].mxu0  ;;  %v8946_v59 = vadd.f32 %v6393_v18, %v4327_v2  ;;  %v6401_v13 = vadd.f32 %v3805_v14, %v933_v63  ;;  %v938_v33 = vpop.permute.xlu0 %937  ;;  %v7560_v63 = vld [vmem:[%s9553_s1 + $0x860] ss:$48 sps:$4 sm:$0xff]   ;;  %v7561_v2 = vld [vmem:[%s9553_s1 + $0x328] ss:$48 sps:$4 sm:$0xff]  }
 0x235   : > { %v8948_v53 = vadd.f32 %v6397_v5, %v4329_v22  ;;  %4697 = vmatmul.mubr.bf16.gmra.mrb[148].mxu1 %v7554_v4  ;;  %v943_v52 = vpop.permute.xlu1 %942  ;;  %v7562_v22 = vld [vmem:[%s9553_s1 + $0x38c] ss:$48 sps:$4 sm:$0xff]  }
 0x236   : > { %4820 = vmatmul.mubr.bf16.gmra.mrb[92].mxu0 %v7555_v17  ;;  %v8950_v36 = vadd.f32 %v6401_v13, %v4331_v54  ;;  %4706 = vmatprep.mubr.bf16.mxu1 %v7556_v35 }
 0x237   : > { %6207 = vmatprep.mubr.msk.bf16.mxu0 %vm3332_vm0, %v7558_v57 }
 0x238   : > { %v3809_v1 = vpop.f32.mrb[44].mxu1 }
 0x239   : > { %v4335_v25 = vpop.f32.mrb[44].mxu0  ;;  %v6405_v26 = vadd.f32 %v3809_v1, %v938_v33  ;;  %v3811_v32 = vpop.f32.mrb[45].mxu1 }
 0x23a   : > { %v4337_v49 = vpop.f32.mrb[45].mxu0  ;;  %v6409_v4 = vadd.f32 %v3811_v32, %v938_v33  ;;  %v3813_v17 = vpop.f32.mrb[46].mxu1 }
 0x23b   : > { %v4339_v18 = vpop.f32.mrb[46].mxu0  ;;  %v8962_v35 = vadd.f32 %v6405_v26, %v4335_v25  ;;  %v6413_v1 = vadd.f32 %v3813_v17, %v943_v52  ;;  %v3815_v57 = vpop.f32.mrb[47].mxu1 }
 0x23c   : > { %v4341_v5 = vpop.f32.mrb[47].mxu0  ;;  %v8964_v14 = vadd.f32 %v6409_v4, %v4337_v49  ;;  %v6417_v54 = vadd.f32 %v3815_v57, %v943_v52  ;;  %v948_v33 = vpop.permute.xlu0 %947  ;;  %v7564_v49 = vld [vmem:[%s9553_s1 + $0x388] ss:$48 sps:$4 sm:$0xff]  }
 0x23d   : > { %v8966_v13 = vadd.f32 %v6413_v1, %v4339_v18  ;;  %4707 = vmatmul.mubr.bf16.gmra.mrb[152].mxu1 %v7560_v63  ;;  %v953_v32 = vpop.permute.xlu1 %952  ;;  %v7565_v63 = vld [vmem:[%s9553_s1 + $0x3ec] ss:$48 sps:$4 sm:$0xff]  }
 0x23e   : > { %4830 = vmatmul.mubr.bf16.gmra.mrb[96].mxu0 %v7561_v2  ;;  %v8968_v45 = vadd.f32 %v6417_v54, %v4341_v5 }
 0x23f   : > { %6208 = vmatprep.mubr.msk.bf16.mxu0 %vm3332_vm0, %v7562_v22 }
 0x240   : > { %v3819_v62 = vpop.f32.mrb[48].mxu1 }
 0x241   : > { %v4345_v41 = vpop.f32.mrb[48].mxu0  ;;  %v6421_v25 = vadd.f32 %v3819_v62, %v948_v33  ;;  %v3821_v26 = vpop.f32.mrb[49].mxu1 }
 0x242   : > { %v4347_v17 = vpop.f32.mrb[49].mxu0  ;;  %v6425_v52 = vadd.f32 %v3821_v26, %v948_v33  ;;  %v3823_v4 = vpop.f32.mrb[50].mxu1 }
 0x243   : > { %v4349_v18 = vpop.f32.mrb[50].mxu0  ;;  %v8977_v2 = vadd.f32 %v6421_v25, %v4345_v41  ;;  %v6429_v22 = vadd.f32 %v3823_v4, %v953_v32  ;;  %v3825_v1 = vpop.f32.mrb[51].mxu1 }
 0x244   : > { %v4351_v57 = vpop.f32.mrb[51].mxu0  ;;  %v8979_v5 = vadd.f32 %v6425_v52, %v4347_v17  ;;  %v6433_v62 = vadd.f32 %v3825_v1, %v953_v32  ;;  %v958_v33 = vpop.permute.xlu0 %957  ;;  %v7567_v17 = vld [vmem:[%s9553_s1 + $0x3e8] ss:$48 sps:$4 sm:$0xff]  }
 0x245   : > { %v8981_v54 = vadd.f32 %v6429_v22, %v4349_v18  ;;  %v963_v26 = vpop.permute.xlu1 %962 }
 0x246   : > { %4840 = vmatmul.mubr.bf16.gmra.mrb[100].mxu0 %v7564_v49  ;;  %v8983_v40 = vadd.f32 %v6433_v62, %v4351_v57  ;;  %v7568_v49 = vld [vmem:[%s9553_s1 + $0x44c] ss:$48 sps:$4 sm:$0xff]  }
 0x247   : > { %6209 = vmatprep.mubr.msk.bf16.mxu0 %vm3332_vm0, %v7565_v63 }
 0x248   : > { %v3829_v56 = vpop.f32.mrb[52].mxu1 }
 0x249   : > { %v4355_v37 = vpop.f32.mrb[52].mxu0  ;;  %v6437_v34 = vadd.f32 %v3829_v56, %v958_v33  ;;  %v3831_v41 = vpop.f32.mrb[53].mxu1 }
 0x24a   : > { %v4357_v25 = vpop.f32.mrb[53].mxu0  ;;  %v6441_v52 = vadd.f32 %v3831_v41, %v958_v33  ;;  %v3833_v32 = vpop.f32.mrb[54].mxu1 }
 0x24b   : > { %v4359_v4 = vpop.f32.mrb[54].mxu0  ;;  %v8992_v18 = vadd.f32 %v6437_v34, %v4355_v37  ;;  %v6445_v63 = vadd.f32 %v3833_v32, %v963_v26  ;;  %v3835_v22 = vpop.f32.mrb[55].mxu1 }
 0x24c   : > { %v4361_v1 = vpop.f32.mrb[55].mxu0  ;;  %v8994_v57 = vadd.f32 %v6441_v52, %v4357_v25  ;;  %v6449_v56 = vadd.f32 %v3835_v22, %v963_v26  ;;  %v968_v33 = vpop.permute.xlu0 %967  ;;  %v7570_v25 = vld [vmem:[%s9553_s1 + $0x448] ss:$48 sps:$4 sm:$0xff]  }
 0x24d   : > { %v8996_v62 = vadd.f32 %v6445_v63, %v4359_v4  ;;  %v973_v41 = vpop.permute.xlu1 %972 }
 0x24e   : > { %4850 = vmatmul.mubr.bf16.gmra.mrb[104].mxu0 %v7567_v17  ;;  %v8998_v51 = vadd.f32 %v6449_v56, %v4361_v1  ;;  %v7571_v17 = vld [vmem:[%s9553_s1 + $0x4ac] ss:$48 sps:$4 sm:$0xff]  }
 0x24f   : > { %6210 = vmatprep.mubr.msk.bf16.mxu0 %vm3332_vm0, %v7568_v49 }
 0x250   : > { %v3839_v31 = vpop.f32.mrb[56].mxu1 }
 0x251   : > { %v4365_v29 = vpop.f32.mrb[56].mxu0  ;;  %v6453_v50 = vadd.f32 %v3839_v31, %v968_v33  ;;  %v3841_v34 = vpop.f32.mrb[57].mxu1 }
 0x252   : > { %v4367_v37 = vpop.f32.mrb[57].mxu0  ;;  %v6457_v52 = vadd.f32 %v3841_v34, %v968_v33  ;;  %v3843_v26 = vpop.f32.mrb[58].mxu1 }
 0x253   : > { %v4369_v32 = vpop.f32.mrb[58].mxu0  ;;  %v9007_v4 = vadd.f32 %v6453_v50, %v4365_v29  ;;  %v6461_v49 = vadd.f32 %v3843_v26, %v973_v41  ;;  %v3845_v63 = vpop.f32.mrb[59].mxu1 }
 0x254   : > { %v4371_v22 = vpop.f32.mrb[59].mxu0  ;;  %v9009_v1 = vadd.f32 %v6457_v52, %v4367_v37  ;;  %v6465_v31 = vadd.f32 %v3845_v63, %v973_v41  ;;  %v978_v33 = vpop.permute.xlu0 %977  ;;  %v7573_v37 = vld [vmem:[%s9553_s1 + $0x4a8] ss:$48 sps:$4 sm:$0xff]  }
 0x255   : > { %v9011_v56 = vadd.f32 %v6461_v49, %v4369_v32  ;;  %v983_v34 = vpop.permute.xlu1 %982 }
 0x256   : > { %4860 = vmatmul.mubr.bf16.gmra.mrb[108].mxu0 %v7570_v25  ;;  %v9013_v27 = vadd.f32 %v6465_v31, %v4371_v22  ;;  %v7574_v25 = vld [vmem:[%s9553_s1 + $0x50c] ss:$48 sps:$4 sm:$0xff]  }
 0x257   : > { %6211 = vmatprep.mubr.msk.bf16.mxu0 %vm3332_vm0, %v7571_v17 }
 0x258   : > { %v3849_v24 = vpop.f32.mrb[60].mxu1 }
 0x259   : > { %v4375_v48 = vpop.f32.mrb[60].mxu0  ;;  %v6469_v21 = vadd.f32 %v3849_v24, %v978_v33  ;;  %v3851_v29 = vpop.f32.mrb[61].mxu1 }
 0x25a   : > { %v4377_v50 = vpop.f32.mrb[61].mxu0  ;;  %v6473_v52 = vadd.f32 %v3851_v29, %v978_v33  ;;  %v3853_v41 = vpop.f32.mrb[62].mxu1 }
 0x25b   : > { %v4379_v26 = vpop.f32.mrb[62].mxu0  ;;  %v9022_v32 = vadd.f32 %v6469_v21, %v4375_v48  ;;  %v6477_v17 = vadd.f32 %v3853_v41, %v983_v34  ;;  %v3855_v49 = vpop.f32.mrb[63].mxu1 }
 0x25c   : > { %v4381_v63 = vpop.f32.mrb[63].mxu0  ;;  %v9024_v22 = vadd.f32 %v6473_v52, %v4377_v50  ;;  %v6481_v24 = vadd.f32 %v3855_v49, %v983_v34  ;;  %v988_v33 = vpop.permute.xlu0 %987  ;;  %v7576_v50 = vld [vmem:[%s9553_s1 + $0x508] ss:$48 sps:$4 sm:$0xff]  }
 0x25d   : > { %9604 = vst [vmem:[#allocation34_spill] sm:$0xff] %v9022_v32  ;;  %v9026_v31 = vadd.f32 %v6477_v17, %v4379_v26  ;;  %v993_v29 = vpop.permute.xlu1 %992 }
 0x25e   : > { %9605 = vst [vmem:[#allocation35_spill] sm:$0xff] %v9024_v22  ;;  %4870 = vmatmul.mubr.bf16.gmra.mrb[112].mxu0 %v7573_v37  ;;  %v9028_v20 = vadd.f32 %v6481_v24, %v4381_v63  ;;  %v7577_v37 = vld [vmem:[%s9553_s1 + $0x56c] ss:$48 sps:$4 sm:$0xff]  }
 0x25f   : > { %9606 = vst [vmem:[#allocation36_spill] sm:$0xff] %v9026_v31  ;;  %6212 = vmatprep.mubr.msk.bf16.mxu0 %vm3332_vm0, %v7574_v25 }
 0x260   : > { %9607 = vst [vmem:[#allocation37_spill] sm:$0xff] %v9028_v20  ;;  %v3859_v44 = vpop.f32.mrb[64].mxu1 }
 0x261   : > { %v4385_v16 = vpop.f32.mrb[64].mxu0  ;;  %v6485_v12 = vadd.f32 %v3859_v44, %v988_v33  ;;  %v3861_v21 = vpop.f32.mrb[65].mxu1 }
 0x262   : > { %v4387_v48 = vpop.f32.mrb[65].mxu0  ;;  %v6489_v52 = vadd.f32 %v3861_v21, %v988_v33  ;;  %v3863_v34 = vpop.f32.mrb[66].mxu1 }
 0x263   : > { %v4389_v41 = vpop.f32.mrb[66].mxu0  ;;  %v9037_v26 = vadd.f32 %v6485_v12, %v4385_v16  ;;  %v6493_v25 = vadd.f32 %v3863_v34, %v993_v29  ;;  %v3865_v17 = vpop.f32.mrb[67].mxu1 }
 0x264   : > { %v4391_v49 = vpop.f32.mrb[67].mxu0  ;;  %v9039_v63 = vadd.f32 %v6489_v52, %v4387_v48  ;;  %v6497_v44 = vadd.f32 %v3865_v17, %v993_v29  ;;  %v998_v33 = vpop.permute.xlu0 %997  ;;  %v7579_v48 = vld [vmem:[%s9553_s1 + $0x568] ss:$48 sps:$4 sm:$0xff]  }
 0x265   : > { %9608 = vst [vmem:[#allocation38_spill] sm:$0xff] %v9037_v26  ;;  %v9041_v24 = vadd.f32 %v6493_v25, %v4389_v41  ;;  %v1003_v21 = vpop.permute.xlu1 %1002 }
 0x266   : > { %9609 = vst [vmem:[#allocation39_spill] sm:$0xff] %v9039_v63  ;;  %4880 = vmatmul.mubr.bf16.gmra.mrb[116].mxu0 %v7576_v50  ;;  %v9043_v20 = vadd.f32 %v6497_v44, %v4391_v49  ;;  %v7580_v50 = vld [vmem:[%s9553_s1 + $0x5cc] ss:$48 sps:$4 sm:$0xff]  }
 0x267   : > { %9610 = vst [vmem:[#allocation40_spill] sm:$0xff] %v9041_v24  ;;  %6213 = vmatprep.mubr.msk.bf16.mxu0 %vm3332_vm0, %v7577_v37 }
 0x268   : > { %9611 = vst [vmem:[#allocation41_spill] sm:$0xff] %v9043_v20  ;;  %v3869_v31 = vpop.f32.mrb[68].mxu1 }
 0x269   : > { %v4395_v22 = vpop.f32.mrb[68].mxu0  ;;  %v6501_v32 = vadd.f32 %v3869_v31, %v998_v33  ;;  %v3871_v12 = vpop.f32.mrb[69].mxu1 }
 0x26a   : > { %v4397_v16 = vpop.f32.mrb[69].mxu0  ;;  %v6505_v52 = vadd.f32 %v3871_v12, %v998_v33  ;;  %v3873_v29 = vpop.f32.mrb[70].mxu1 }
 0x26b   : > { %v4399_v34 = vpop.f32.mrb[70].mxu0  ;;  %v9052_v41 = vadd.f32 %v6501_v32, %v4395_v22  ;;  %v6509_v37 = vadd.f32 %v3873_v29, %v1003_v21  ;;  %v3875_v25 = vpop.f32.mrb[71].mxu1 }
 0x26c   : > { %v4401_v17 = vpop.f32.mrb[71].mxu0  ;;  %v9054_v49 = vadd.f32 %v6505_v52, %v4397_v16  ;;  %v6513_v31 = vadd.f32 %v3875_v25, %v1003_v21  ;;  %v1008_v33 = vpop.permute.xlu0 %1007  ;;  %v7582_v16 = vld [vmem:[%s9553_s1 + $0x5c8] ss:$48 sps:$4 sm:$0xff]  }
 0x26d   : > { %9612 = vst [vmem:[#allocation42_spill] sm:$0xff] %v9052_v41  ;;  %v9056_v44 = vadd.f32 %v6509_v37, %v4399_v34  ;;  %v1013_v12 = vpop.permute.xlu1 %1012 }
 0x26e   : > { %9613 = vst [vmem:[#allocation43_spill] sm:$0xff] %v9054_v49  ;;  %4890 = vmatmul.mubr.bf16.gmra.mrb[120].mxu0 %v7579_v48  ;;  %v9058_v20 = vadd.f32 %v6513_v31, %v4401_v17  ;;  %v7583_v48 = vld [vmem:[%s9553_s1 + $0x62c] ss:$48 sps:$4 sm:$0xff]  }
 0x26f   : > { %9614 = vst [vmem:[#allocation44_spill] sm:$0xff] %v9056_v44  ;;  %6214 = vmatprep.mubr.msk.bf16.mxu0 %vm3332_vm0, %v7580_v50 }
 0x270   : > { %9615 = vst [vmem:[#allocation45_spill] sm:$0xff] %v9058_v20  ;;  %v3879_v24 = vpop.f32.mrb[72].mxu1 }
 0x271   : > { %v4405_v63 = vpop.f32.mrb[72].mxu0  ;;  %v6517_v26 = vadd.f32 %v3879_v24, %v1008_v33  ;;  %v3881_v32 = vpop.f32.mrb[73].mxu1 }
 0x272   : > { %v4407_v22 = vpop.f32.mrb[73].mxu0  ;;  %v6521_v52 = vadd.f32 %v3881_v32, %v1008_v33  ;;  %v3883_v21 = vpop.f32.mrb[74].mxu1 }
 0x273   : > { %v4409_v29 = vpop.f32.mrb[74].mxu0  ;;  %v9067_v34 = vadd.f32 %v6517_v26, %v4405_v63  ;;  %v6525_v50 = vadd.f32 %v3883_v21, %v1013_v12  ;;  %v3885_v37 = vpop.f32.mrb[75].mxu1 }
 0x274   : > { %v4411_v25 = vpop.f32.mrb[75].mxu0  ;;  %v9069_v17 = vadd.f32 %v6521_v52, %v4407_v22  ;;  %v6529_v24 = vadd.f32 %v3885_v37, %v1013_v12  ;;  %v1018_v33 = vpop.permute.xlu0 %1017  ;;  %v7585_v22 = vld [vmem:[%s9553_s1 + $0x628] ss:$48 sps:$4 sm:$0xff]  }
 0x275   : > { %9616 = vst [vmem:[#allocation46_spill] sm:$0xff] %v9067_v34  ;;  %v9071_v31 = vadd.f32 %v6525_v50, %v4409_v29  ;;  %v1023_v32 = vpop.permute.xlu1 %1022 }
 0x276   : > { %9617 = vst [vmem:[#allocation47_spill] sm:$0xff] %v9069_v17  ;;  %4900 = vmatmul.mubr.bf16.gmra.mrb[124].mxu0 %v7582_v16  ;;  %v9073_v20 = vadd.f32 %v6529_v24, %v4411_v25  ;;  %v7586_v16 = vld [vmem:[%s9553_s1 + $0x68c] ss:$48 sps:$4 sm:$0xff]  }
 0x277   : > { %9618 = vst [vmem:[#allocation48_spill] sm:$0xff] %v9071_v31  ;;  %6215 = vmatprep.mubr.msk.bf16.mxu0 %vm3332_vm0, %v7583_v48 }
 0x278   : > { %9619 = vst [vmem:[#allocation49_spill] sm:$0xff] %v9073_v20  ;;  %v3889_v44 = vpop.f32.mrb[76].mxu1 }
 0x279   : > { %v4415_v49 = vpop.f32.mrb[76].mxu0  ;;  %v6533_v41 = vadd.f32 %v3889_v44, %v1018_v33  ;;  %v3891_v26 = vpop.f32.mrb[77].mxu1 }
 0x27a   : > { %v4417_v63 = vpop.f32.mrb[77].mxu0  ;;  %v6537_v52 = vadd.f32 %v3891_v26, %v1018_v33  ;;  %v3893_v12 = vpop.f32.mrb[78].mxu1 }
 0x27b   : > { %v4419_v21 = vpop.f32.mrb[78].mxu0  ;;  %v9082_v29 = vadd.f32 %v6533_v41, %v4415_v49  ;;  %v6541_v48 = vadd.f32 %v3893_v12, %v1023_v32  ;;  %v3895_v50 = vpop.f32.mrb[79].mxu1 }
 0x27c   : > { %v4421_v37 = vpop.f32.mrb[79].mxu0  ;;  %v9084_v25 = vadd.f32 %v6537_v52, %v4417_v63  ;;  %v6545_v44 = vadd.f32 %v3895_v50, %v1023_v32  ;;  %v1028_v33 = vpop.permute.xlu0 %1027  ;;  %v7588_v63 = vld [vmem:[%s9553_s1 + $0x688] ss:$48 sps:$4 sm:$0xff]  }
 0x27d   : > { %9620 = vst [vmem:[#allocation50_spill] sm:$0xff] %v9082_v29  ;;  %v9086_v24 = vadd.f32 %v6541_v48, %v4419_v21  ;;  %v1033_v26 = vpop.permute.xlu1 %1032 }
 0x27e   : > { %9621 = vst [vmem:[#allocation51_spill] sm:$0xff] %v9084_v25  ;;  %4910 = vmatmul.mubr.bf16.gmra.mrb[128].mxu0 %v7585_v22  ;;  %v9088_v20 = vadd.f32 %v6545_v44, %v4421_v37  ;;  %v7589_v22 = vld [vmem:[%s9553_s1 + $0x6ec] ss:$48 sps:$4 sm:$0xff]  }
 0x27f   : > { %9622 = vst [vmem:[#allocation52_spill] sm:$0xff] %v9086_v24  ;;  %6216 = vmatprep.mubr.msk.bf16.mxu0 %vm3332_vm0, %v7586_v16 }
 0x280   : > { %9623 = vst [vmem:[#allocation53_spill] sm:$0xff] %v9088_v20  ;;  %v3899_v31 = vpop.f32.mrb[80].mxu1 }
 0x281   : > { %v4425_v17 = vpop.f32.mrb[80].mxu0  ;;  %v6549_v34 = vadd.f32 %v3899_v31, %v1028_v33  ;;  %v3901_v41 = vpop.f32.mrb[81].mxu1 }
 0x282   : > { %v4427_v49 = vpop.f32.mrb[81].mxu0  ;;  %v6553_v52 = vadd.f32 %v3901_v41, %v1028_v33  ;;  %v3903_v32 = vpop.f32.mrb[82].mxu1 }
 0x283   : > { %v4429_v12 = vpop.f32.mrb[82].mxu0  ;;  %v9097_v21 = vadd.f32 %v6549_v34, %v4425_v17  ;;  %v6557_v16 = vadd.f32 %v3903_v32, %v1033_v26  ;;  %v3905_v48 = vpop.f32.mrb[83].mxu1 }
 0x284   : > { %v4431_v50 = vpop.f32.mrb[83].mxu0  ;;  %v9099_v37 = vadd.f32 %v6553_v52, %v4427_v49  ;;  %v6561_v31 = vadd.f32 %v3905_v48, %v1033_v26  ;;  %v1038_v33 = vpop.permute.xlu0 %1037  ;;  %v7591_v49 = vld [vmem:[%s9553_s1 + $0x6e8] ss:$48 sps:$4 sm:$0xff]  }
 0x285   : > { %9624 = vst [vmem:[#allocation54_spill] sm:$0xff] %v9097_v21  ;;  %v9101_v44 = vadd.f32 %v6557_v16, %v4429_v12  ;;  %v1043_v41 = vpop.permute.xlu1 %1042 }
 0x286   : > { %9625 = vst [vmem:[#allocation55_spill] sm:$0xff] %v9099_v37  ;;  %4920 = vmatmul.mubr.bf16.gmra.mrb[132].mxu0 %v7588_v63  ;;  %v9103_v20 = vadd.f32 %v6561_v31, %v4431_v50  ;;  %v7592_v63 = vld [vmem:[%s9553_s1 + $0x74c] ss:$48 sps:$4 sm:$0xff]  }
 0x287   : > { %9626 = vst [vmem:[#allocation56_spill] sm:$0xff] %v9101_v44  ;;  %6217 = vmatprep.mubr.msk.bf16.mxu0 %vm3332_vm0, %v7589_v22 }
 0x288   : > { %9627 = vst [vmem:[#allocation57_spill] sm:$0xff] %v9103_v20  ;;  %v3909_v24 = vpop.f32.mrb[84].mxu1 }
 0x289   : > { %v4435_v25 = vpop.f32.mrb[84].mxu0  ;;  %v6565_v29 = vadd.f32 %v3909_v24, %v1038_v33  ;;  %v3911_v34 = vpop.f32.mrb[85].mxu1 }
 0x28a   : > { %v4437_v17 = vpop.f32.mrb[85].mxu0  ;;  %v6569_v52 = vadd.f32 %v3911_v34, %v1038_v33  ;;  %v3913_v26 = vpop.f32.mrb[86].mxu1 }
 0x28b   : > { %v4439_v32 = vpop.f32.mrb[86].mxu0  ;;  %v9112_v12 = vadd.f32 %v6565_v29, %v4435_v25  ;;  %v6573_v22 = vadd.f32 %v3913_v26, %v1043_v41  ;;  %v3915_v16 = vpop.f32.mrb[87].mxu1 }
 0x28c   : > { %v4441_v48 = vpop.f32.mrb[87].mxu0  ;;  %v9114_v50 = vadd.f32 %v6569_v52, %v4437_v17  ;;  %v6577_v24 = vadd.f32 %v3915_v16, %v1043_v41  ;;  %v1048_v33 = vpop.permute.xlu0 %1047  ;;  %v7594_v17 = vld [vmem:[%s9553_s1 + $0x748] ss:$48 sps:$4 sm:$0xff]  }
 0x28d   : > { %v9116_v31 = vadd.f32 %v6573_v22, %v4439_v32  ;;  %v1053_v34 = vpop.permute.xlu1 %1052 }
 0x28e   : > { %4930 = vmatmul.mubr.bf16.gmra.mrb[136].mxu0 %v7591_v49  ;;  %v9118_v20 = vadd.f32 %v6577_v24, %v4441_v48  ;;  %v7595_v49 = vld [vmem:[%s9553_s1 + $0x7ac] ss:$48 sps:$4 sm:$0xff]  }
 0x28f   : > { %9628 = vst [vmem:[#allocation58_spill] sm:$0xff] %v9116_v31  ;;  %6218 = vmatprep.mubr.msk.bf16.mxu0 %vm3332_vm0, %v7592_v63 }
 0x290   : > { %9629 = vst [vmem:[#allocation59_spill] sm:$0xff] %v9118_v20  ;;  %v3919_v44 = vpop.f32.mrb[88].mxu1 }
 0x291   : > { %v4445_v37 = vpop.f32.mrb[88].mxu0  ;;  %v6581_v21 = vadd.f32 %v3919_v44, %v1048_v33  ;;  %v3921_v29 = vpop.f32.mrb[89].mxu1 }
 0x292   : > { %v4447_v25 = vpop.f32.mrb[89].mxu0  ;;  %v6585_v52 = vadd.f32 %v3921_v29, %v1048_v33  ;;  %v3923_v41 = vpop.f32.mrb[90].mxu1 }
 0x293   : > { %v4449_v26 = vpop.f32.mrb[90].mxu0  ;;  %v9127_v32 = vadd.f32 %v6581_v21, %v4445_v37  ;;  %v6589_v63 = vadd.f32 %v3923_v41, %v1053_v34  ;;  %v3925_v22 = vpop.f32.mrb[91].mxu1  ;;  %v7597_v21 = vld [vmem:[%s9553_s1 + $0x7a8] ss:$48 sps:$4 sm:$0xff]  }
 0x294   : > { %v4451_v16 = vpop.f32.mrb[91].mxu0  ;;  %v9129_v48 = vadd.f32 %v6585_v52, %v4447_v25  ;;  %v6593_v44 = vadd.f32 %v3925_v22, %v1053_v34  ;;  %v7598_v25 = vld [vmem:[%s9553_s1 + $0x80c] ss:$48 sps:$4 sm:$0xff]  }
 0x295   : > { %v9131_v24 = vadd.f32 %v6589_v63, %v4449_v26 }
 0x296   : > { %4940 = vmatmul.mubr.bf16.gmra.mrb[140].mxu0 %v7594_v17  ;;  %v9133_v20 = vadd.f32 %v6593_v44, %v4451_v16 }
 0x297   : > { %6219 = vmatprep.mubr.msk.bf16.mxu0 %vm3332_vm0, %v7595_v49 }
 0x298   : > { %v4558_v33 = vpop.f32.mrb[92].mxu1 }
 0x299   : > { %v9137_v29 = vadd.f32 %v8881_v55, %v4558_v33  ;;  %v4560_v31 = vpop.f32.mrb[93].mxu1  ;;  %v7603_v33 = vld [vmem:[%s9553_s1 + $0x868] ss:$48 sps:$4 sm:$0xff]  }
 0x29a   : > { %v9143_v37 = vadd.f32 %v8883_v8, %v4560_v31  ;;  %v4562_v34 = vpop.f32.mrb[94].mxu1  ;;  %v7600_v31 = vld [vmem:[%s9553_s1 + $0x808] ss:$48 sps:$4 sm:$0xff]  }
 0x29b   : > { %v9149_v17 = vadd.f32 %v8885_v15, %v4562_v34  ;;  %v4564_v52 = vpop.f32.mrb[95].mxu1 }
 0x29c   : > { %v9152_v55 = vadd.f32 %v8887_v19, %v4564_v52  ;;  %v7601_v19 = vld [vmem:[%s9553_s1 + $0x86c] ss:$48 sps:$4 sm:$0xff]  }
 0x29e   : > { %4950 = vmatmul.mubr.bf16.gmra.mrb[144].mxu0 %v7597_v21 }
 0x29f   : > { %6220 = vmatprep.mubr.msk.bf16.mxu0 %vm3332_vm0, %v7598_v25 }
 0x2a0   : > { %v4568_v41 = vpop.f32.mrb[96].mxu1 }
 0x2a1   : > { %v9156_v26 = vadd.f32 %v8902_v47, %v4568_v41  ;;  %v4570_v8 = vpop.f32.mrb[97].mxu1 }
 0x2a2   : > { %v9162_v49 = vadd.f32 %v8904_v6, %v4570_v8  ;;  %v4572_v15 = vpop.f32.mrb[98].mxu1 }
 0x2a3   : > { %v9168_v63 = vadd.f32 %v8906_v11, %v4572_v15  ;;  %v4574_v22 = vpop.f32.mrb[99].mxu1 }
 0x2a4   : > { %v9171_v47 = vadd.f32 %v8908_v23, %v4574_v22 }
 0x2a6   : > { %4960 = vmatmul.mubr.bf16.gmra.mrb[148].mxu0 %v7600_v31 }
 0x2a7   : > { %6221 = vmatprep.mubr.msk.bf16.mxu0 %vm3332_vm0, %v7601_v19 }
 0x2a8   : > { %v4578_v16 = vpop.f32.mrb[100].mxu1 }
 0x2a9   : > { %v9175_v44 = vadd.f32 %v8923_v46, %v4578_v16  ;;  %v4580_v6 = vpop.f32.mrb[101].mxu1 }
 0x2aa   : > { %v9181_v21 = vadd.f32 %v8925_v60, %v4580_v6  ;;  %v4582_v11 = vpop.f32.mrb[102].mxu1 }
 0x2ab   : > { %v9184_v34 = vadd.f32 %v8927_v10, %v4582_v11  ;;  %v4584_v23 = vpop.f32.mrb[103].mxu1 }
 0x2ac   : > { %v9187_v25 = vadd.f32 %v8929_v43, %v4584_v23 }
 0x2ae   : > { %4970 = vmatmul.mubr.bf16.gmra.mrb[152].mxu0 %v7603_v33 }
 0x2b0   : > { %v4588_v52 = vpop.f32.mrb[104].mxu1 }
 0x2b1   : > { %v9190_v46 = vadd.f32 %v8944_v42, %v4588_v52  ;;  %v4590_v41 = vpop.f32.mrb[105].mxu1 }
 0x2b2   : > { %v9193_v8 = vadd.f32 %v8946_v59, %v4590_v41  ;;  %v4592_v31 = vpop.f32.mrb[106].mxu1 }
 0x2b3   : > { %v9196_v60 = vadd.f32 %v8948_v53, %v4592_v31  ;;  %v4594_v15 = vpop.f32.mrb[107].mxu1 }
 0x2b4   : > { %v9199_v10 = vadd.f32 %v8950_v36, %v4594_v15 }
 0x2b8   : > { %v4598_v19 = vpop.f32.mrb[108].mxu1 }
 0x2b9   : > { %v9202_v43 = vadd.f32 %v8962_v35, %v4598_v19  ;;  %v4600_v22 = vpop.f32.mrb[109].mxu1 }
 0x2ba   : > { %v9205_v42 = vadd.f32 %v8964_v14, %v4600_v22  ;;  %v4602_v16 = vpop.f32.mrb[110].mxu1  ;;  %v6287_v22 = vadd.f32 %v8691_v61, %v8757_v28 }
 0x2bb   : > { %v9208_v59 = vadd.f32 %v8966_v13, %v4602_v16  ;;  %v4604_v6 = vpop.f32.mrb[111].mxu1 }
 0x2bc   : > { %v9211_v53 = vadd.f32 %v8968_v45, %v4604_v6 }
 0x2c0   : > { %v4608_v33 = vpop.f32.mrb[112].mxu1 }
 0x2c1   : > { %v9214_v36 = vadd.f32 %v8977_v2, %v4608_v33  ;;  %v4610_v11 = vpop.f32.mrb[113].mxu1 }
 0x2c2   : > { %v9217_v35 = vadd.f32 %v8979_v5, %v4610_v11  ;;  %v4612_v23 = vpop.f32.mrb[114].mxu1 }
 0x2c3   : > { %v9220_v14 = vadd.f32 %v8981_v54, %v4612_v23  ;;  %v4614_v52 = vpop.f32.mrb[115].mxu1 }
 0x2c4   : > { %v9223_v13 = vadd.f32 %v8983_v40, %v4614_v52  ;;  %v6285_v40 = vadd.f32 %v8685_v58, %v8757_v28 }
 0x2c8   : > { %v4618_v41 = vpop.f32.mrb[116].mxu1 }
 0x2c9   : > { %v9226_v45 = vadd.f32 %v8992_v18, %v4618_v41  ;;  %v4620_v31 = vpop.f32.mrb[117].mxu1 }
 0x2ca   : > { %v9229_v2 = vadd.f32 %v8994_v57, %v4620_v31  ;;  %v4622_v15 = vpop.f32.mrb[118].mxu1  ;;  %v6289_v57 = vadd.f32 %v8699_v0, %v8781_v38 }
 0x2cb   : > { %v9232_v5 = vadd.f32 %v8996_v62, %v4622_v15  ;;  %v4624_v19 = vpop.f32.mrb[119].mxu1 }
 0x2cc   : > { %v9235_v54 = vadd.f32 %v8998_v51, %v4624_v19  ;;  %v6291_v51 = vadd.f32 %v8707_v3, %v8781_v38  ;;  %v6293_v38 = vadd.f32 %v8712_v7, %v8761_v30 }
 0x2d0   : > { %v4628_v18 = vpop.f32.mrb[120].mxu1 }
 0x2d1   : > { %v4751_v16 = vpop.f32.mrb[0].mxu0  ;;  %v9244_v6 = vadd.f32 %v9007_v4, %v4628_v18  ;;  %v4630_v33 = vpop.f32.mrb[121].mxu1 }
 0x2d2   : > { %v6286_v62 = vadd.f32 %v6285_v40, %v4751_v16  ;;  %v4753_v11 = vpop.f32.mrb[1].mxu0  ;;  %v9249_v23 = vadd.f32 %v9009_v1, %v4630_v33  ;;  %v4632_v52 = vpop.f32.mrb[122].mxu1  ;;  %v9630_v33 = vld [vmem:[#allocation2_spill] sm:$0xff] }
 0x2d3   : > { %v6288_v58 = vadd.f32 %v6287_v22, %v4753_v11  ;;  %v4755_v61 = vpop.f32.mrb[2].mxu0  ;;  %v9252_v28 = vadd.f32 %v9011_v56, %v4632_v52  ;;  %v4634_v0 = vpop.f32.mrb[123].mxu1  ;;  %v6295_v22 = vadd.f32 %v8715_v9, %v8761_v30  ;;  %v9631_v11 = vld [vmem:[#allocation34_spill] sm:$0xff]  ;;  %v9633_v9 = vld [vmem:[#allocation35_spill] sm:$0xff] }
 0x2d4   : > { %v6290_v41 = vadd.f32 %v6289_v57, %v4755_v61  ;;  %v4757_v31 = vpop.f32.mrb[3].mxu0  ;;  %v9255_v4 = vadd.f32 %v9013_v27, %v4634_v0  ;;  %v4980_v19 = vmax.f32 %v6286_v62, 0.0  ;;  %v7606_v27 = vld [vmem:[%s9555_s3 + $0x4] ss:$12 sps:$4 sm:$0xff]   ;;  %v6297_v62 = vadd.f32 %v9630_v33, %v8784_v39  ;;  %v9632_v61 = vld [vmem:[#allocation3_spill] sm:$0xff] }
 0x2d5   : > { %v6292_v15 = vadd.f32 %v6291_v51, %v4757_v31  ;;  %v4981_v18 = vmax.f32 %v6288_v58, 0.0  ;;  %5355 = vmatprep.mubr.bf16.mxu1 %v7606_v27  ;;  %v9641_v27 = vld [vmem:[#allocation5_spill] sm:$0xff] }
 0x2d6   : > { %v4982_v40 = vmax.f32 %v6290_v41, 0.0  ;;  %v6299_v41 = vadd.f32 %v9632_v61, %v8784_v39 }
 0x2d7   : > { %v4983_v3 = vmax.f32 %v6292_v15, 0.0 }
 0x2d8   : > { %v5072_v1 = vpack.c.bf16 %v4982_v40, %v4980_v19  ;;  %v4638_v16 = vpop.f32.mrb[124].mxu1  ;;  %v9635_v19 = vld [vmem:[#allocation36_spill] sm:$0xff] }
 0x2d9   : > { %v5073_v56 = vpack.c.bf16 %v4983_v3, %v4981_v18  ;;  %v4761_v57 = vpop.f32.mrb[4].mxu0  ;;  %v9267_v51 = vadd.f32 %v9631_v11, %v4638_v16  ;;  %v4640_v52 = vpop.f32.mrb[125].mxu1 }
 0x2da   : > { %v6294_v58 = vadd.f32 %v6293_v38, %v4761_v57  ;;  %v4763_v7 = vpop.f32.mrb[5].mxu0  ;;  %v9272_v30 = vadd.f32 %v9633_v9, %v4640_v52  ;;  %v4642_v31 = vpop.f32.mrb[126].mxu1  ;;  %v9637_v38 = vld [vmem:[#allocation37_spill] sm:$0xff] }
 0x2db   : > { %v6296_v0 = vadd.f32 %v6295_v22, %v4763_v7  ;;  %v4765_v15 = vpop.f32.mrb[6].mxu0  ;;  %5323 = vmatprep.subr.bf16.mxu1 %v5073_v56  ;;  %v9275_v40 = vadd.f32 %v9635_v19, %v4642_v31  ;;  %v4644_v3 = vpop.f32.mrb[127].mxu1  ;;  %v9639_v22 = vld [vmem:[#allocation14_spill] sm:$0xff]  ;;  %v9640_v7 = vld [vmem:[#allocation4_spill] sm:$0xff] }
 0x2dc   : > { %9634 = vst [vmem:[#allocation2_spill] sm:$0xff] %v9272_v30  ;;  %v6298_v18 = vadd.f32 %v6297_v62, %v4765_v15  ;;  %v4767_v16 = vpop.f32.mrb[7].mxu0  ;;  %5324 = vmatpush1.bf16.msra.mxu1 %v5072_v1  ;;  %v9278_v57 = vadd.f32 %v9637_v38, %v4644_v3  ;;  %v4984_v39 = vmax.f32 %v6294_v58, 0.0  ;;  %v6301_v9 = vadd.f32 %v9640_v7, %v9639_v22  ;;  %v9643_v1 = vld [vmem:[#allocation6_spill] sm:$0xff] }
 0x2dd   : > { %9636 = vst [vmem:[#allocation34_spill] sm:$0xff] %v9275_v40  ;;  %v6300_v33 = vadd.f32 %v6299_v41, %v4767_v16  ;;  %v4985_v52 = vmax.f32 %v6296_v0, 0.0  ;;  %v6303_v31 = vadd.f32 %v9641_v27, %v9639_v22  ;;  %v9642_v40 = vld [vmem:[#allocation16_spill] sm:$0xff]  ;;  %v9644_v3 = vld [vmem:[#allocation38_spill] sm:$0xff] }
 0x2de   : > { %9638 = vst [vmem:[#allocation3_spill] sm:$0xff] %v9278_v57  ;;  %v4986_v11 = vmax.f32 %v6298_v18, 0.0  ;;  %v6305_v30 = vadd.f32 %v9643_v1, %v9642_v40  ;;  %v9646_v18 = vld [vmem:[#allocation7_spill] sm:$0xff] }
 0x2df   : > { %v4987_v61 = vmax.f32 %v6300_v33, 0.0  ;;  %v6307_v16 = vadd.f32 %v9646_v18, %v9642_v40  ;;  %v9647_v33 = vld [vmem:[#allocation39_spill] sm:$0xff] }
 0x2e0   : > { %v5074_v56 = vpack.c.bf16 %v4986_v11, %v4984_v39  ;;  %v4648_v62 = vpop.f32.mrb[128].mxu1 }
 0x2e1   : > { %v5075_v19 = vpack.c.bf16 %v4987_v61, %v4985_v52  ;;  %v4771_v15 = vpop.f32.mrb[8].mxu0  ;;  %v9287_v38 = vadd.f32 %v9644_v3, %v4648_v62  ;;  %v4650_v41 = vpop.f32.mrb[129].mxu1  ;;  %v9649_v61 = vld [vmem:[#allocation40_spill] sm:$0xff] }
 0x2e2   : > { %v6302_v58 = vadd.f32 %v6301_v9, %v4771_v15  ;;  %v4773_v0 = vpop.f32.mrb[9].mxu0  ;;  %v9292_v39 = vadd.f32 %v9647_v33, %v4650_v41  ;;  %v4652_v22 = vpop.f32.mrb[130].mxu1  ;;  %v9651_v9 = vld [vmem:[#allocation41_spill] sm:$0xff]  ;;  %v9653_v33 = vld [vmem:[#allocation18_spill] sm:$0xff] }
 0x2e3   : > { %9645 = vst [vmem:[#allocation35_spill] sm:$0xff] %v9287_v38  ;;  %v6304_v11 = vadd.f32 %v6303_v31, %v4773_v0  ;;  %v4775_v52 = vpop.f32.mrb[10].mxu0  ;;  %5325 = vmatprep.subr.bf16.mxu1 %v5075_v19  ;;  %v9295_v7 = vadd.f32 %v9649_v61, %v4652_v22  ;;  %v4654_v1 = vpop.f32.mrb[131].mxu1  ;;  %v9654_v31 = vld [vmem:[#allocation8_spill] sm:$0xff]  ;;  %v9655_v19 = vld [vmem:[#allocation9_spill] sm:$0xff] }
 0x2e4   : > { %9648 = vst [vmem:[#allocation36_spill] sm:$0xff] %v9292_v39  ;;  %v6306_v27 = vadd.f32 %v6305_v30, %v4775_v52  ;;  %v4777_v62 = vpop.f32.mrb[11].mxu0  ;;  %5326 = vmatpush1.bf16.msra.mxu1 %v5074_v56  ;;  %v9298_v15 = vadd.f32 %v9651_v9, %v4654_v1  ;;  %v4988_v38 = vmax.f32 %v6302_v58, 0.0  ;;  %v6309_v0 = vadd.f32 %v9654_v31, %v9653_v33  ;;  %v9657_v56 = vld [vmem:[#allocation10_spill] sm:$0xff] }
 0x2e5   : > { %9650 = vst [vmem:[#allocation37_spill] sm:$0xff] %v9295_v7  ;;  %v6308_v3 = vadd.f32 %v6307_v16, %v4777_v62  ;;  %v4989_v18 = vmax.f32 %v6304_v11, 0.0  ;;  %v6311_v22 = vadd.f32 %v9655_v19, %v9653_v33  ;;  %v9656_v7 = vld [vmem:[#allocation19_spill] sm:$0xff]  ;;  %v9658_v1 = vld [vmem:[#allocation42_spill] sm:$0xff] }
 0x2e6   : > { %9652 = vst [vmem:[#allocation14_spill] sm:$0xff] %v9298_v15  ;;  %v4990_v40 = vmax.f32 %v6306_v27, 0.0  ;;  %v6313_v57 = vadd.f32 %v9657_v56, %v9656_v7  ;;  %v9660_v27 = vld [vmem:[#allocation11_spill] sm:$0xff] }
 0x2e7   : > { %v4991_v41 = vmax.f32 %v6308_v3, 0.0  ;;  %v6315_v62 = vadd.f32 %v9660_v27, %v9656_v7  ;;  %v9661_v3 = vld [vmem:[#allocation43_spill] sm:$0xff] }
 0x2e8   : > { %v5076_v39 = vpack.c.bf16 %v4990_v40, %v4988_v38  ;;  %v4658_v30 = vpop.f32.mrb[132].mxu1 }
 0x2e9   : > { %v5077_v61 = vpack.c.bf16 %v4991_v41, %v4989_v18  ;;  %v4781_v52 = vpop.f32.mrb[12].mxu0  ;;  %v9307_v9 = vadd.f32 %v9658_v1, %v4658_v30  ;;  %v4660_v16 = vpop.f32.mrb[133].mxu1  ;;  %v9663_v41 = vld [vmem:[#allocation44_spill] sm:$0xff] }
 0x2ea   : > { %v6310_v58 = vadd.f32 %v6309_v0, %v4781_v52  ;;  %v4783_v11 = vpop.f32.mrb[13].mxu0  ;;  %v9312_v38 = vadd.f32 %v9661_v3, %v4660_v16  ;;  %v4662_v33 = vpop.f32.mrb[134].mxu1  ;;  %v9665_v0 = vld [vmem:[#allocation45_spill] sm:$0xff]  ;;  %v9667_v3 = vld [vmem:[#allocation22_spill] sm:$0xff] }
 0x2eb   : > { %9659 = vst [vmem:[#allocation4_spill] sm:$0xff] %v9307_v9  ;;  %v6312_v40 = vadd.f32 %v6311_v22, %v4783_v11  ;;  %v4785_v18 = vpop.f32.mrb[14].mxu0  ;;  %5327 = vmatprep.subr.bf16.mxu1 %v5077_v61  ;;  %v9315_v31 = vadd.f32 %v9663_v41, %v4662_v33  ;;  %v4664_v56 = vpop.f32.mrb[135].mxu1  ;;  %v9668_v22 = vld [vmem:[#allocation12_spill] sm:$0xff]  ;;  %v9669_v61 = vld [vmem:[#allocation13_spill] sm:$0xff] }
 0x2ec   : > { %9662 = vst [vmem:[#allocation5_spill] sm:$0xff] %v9312_v38  ;;  %v6314_v19 = vadd.f32 %v6313_v57, %v4785_v18  ;;  %v4787_v30 = vpop.f32.mrb[15].mxu0  ;;  %5328 = vmatpush1.bf16.msra.mxu1 %v5076_v39  ;;  %v9318_v52 = vadd.f32 %v9665_v0, %v4664_v56  ;;  %v4992_v9 = vmax.f32 %v6310_v58, 0.0  ;;  %v6317_v11 = vadd.f32 %v9668_v22, %v9667_v3  ;;  %v9671_v39 = vld [vmem:[#allocation15_spill] sm:$0xff]  ;;  %v9672_v56 = vld [vmem:[#allocation46_spill] sm:$0xff] }
 0x2ed   : > { %9664 = vst [vmem:[#allocation16_spill] sm:$0xff] %v9315_v31  ;;  %v6316_v1 = vadd.f32 %v6315_v62, %v4787_v30  ;;  %v4993_v27 = vmax.f32 %v6312_v40, 0.0  ;;  %v6319_v33 = vadd.f32 %v9669_v61, %v9667_v3  ;;  %v9670_v31 = vld [vmem:[#allocation24_spill] sm:$0xff] }
 0x2ee   : > { %9666 = vst [vmem:[#allocation6_spill] sm:$0xff] %v9318_v52  ;;  %v4994_v7 = vmax.f32 %v6314_v19, 0.0  ;;  %v6321_v15 = vadd.f32 %v9671_v39, %v9670_v31  ;;  %v9674_v19 = vld [vmem:[#allocation17_spill] sm:$0xff] }
 0x2ef   : > { %v4995_v16 = vmax.f32 %v6316_v1, 0.0  ;;  %v6323_v30 = vadd.f32 %v9674_v19, %v9670_v31  ;;  %v9675_v1 = vld [vmem:[#allocation47_spill] sm:$0xff] }
 0x2f0   : > { %v5078_v38 = vpack.c.bf16 %v4994_v7, %v4992_v9  ;;  %v4668_v57 = vpop.f32.mrb[136].mxu1 }
 0x2f1   : > { %v5079_v41 = vpack.c.bf16 %v4995_v16, %v4993_v27  ;;  %v4791_v18 = vpop.f32.mrb[16].mxu0  ;;  %v9327_v0 = vadd.f32 %v9672_v56, %v4668_v57  ;;  %v4670_v62 = vpop.f32.mrb[137].mxu1  ;;  %v9677_v16 = vld [vmem:[#allocation48_spill] sm:$0xff] }
 0x2f2   : > { %v6318_v58 = vadd.f32 %v6317_v11, %v4791_v18  ;;  %v4793_v40 = vpop.f32.mrb[17].mxu0  ;;  %v9332_v9 = vadd.f32 %v9675_v1, %v4670_v62  ;;  %v4672_v3 = vpop.f32.mrb[138].mxu1  ;;  %v9679_v11 = vld [vmem:[#allocation49_spill] sm:$0xff]  ;;  %v9681_v1 = vld [vmem:[#allocation26_spill] sm:$0xff] }
 0x2f3   : > { %9673 = vst [vmem:[#allocation38_spill] sm:$0xff] %v9327_v0  ;;  %v6320_v7 = vadd.f32 %v6319_v33, %v4793_v40  ;;  %v4795_v27 = vpop.f32.mrb[18].mxu0  ;;  %5329 = vmatprep.subr.bf16.mxu1 %v5079_v41  ;;  %v9335_v22 = vadd.f32 %v9677_v16, %v4672_v3  ;;  %v4674_v39 = vpop.f32.mrb[139].mxu1  ;;  %v9682_v33 = vld [vmem:[#allocation20_spill] sm:$0xff]  ;;  %v9683_v41 = vld [vmem:[#allocation21_spill] sm:$0xff] }
 0x2f4   : > { %9676 = vst [vmem:[#allocation7_spill] sm:$0xff] %v9332_v9  ;;  %v6322_v61 = vadd.f32 %v6321_v15, %v4795_v27  ;;  %v4797_v57 = vpop.f32.mrb[19].mxu0  ;;  %5330 = vmatpush1.bf16.msra.mxu1 %v5078_v38  ;;  %v9338_v18 = vadd.f32 %v9679_v11, %v4674_v39  ;;  %v4996_v0 = vmax.f32 %v6318_v58, 0.0  ;;  %v6325_v40 = vadd.f32 %v9682_v33, %v9681_v1  ;;  %v9685_v38 = vld [vmem:[#allocation23_spill] sm:$0xff]  ;;  %v9686_v39 = vld [vmem:[#allocation50_spill] sm:$0xff] }
 0x2f5   : > { %9678 = vst [vmem:[#allocation39_spill] sm:$0xff] %v9335_v22  ;;  %v6324_v56 = vadd.f32 %v6323_v30, %v4797_v57  ;;  %v4997_v19 = vmax.f32 %v6320_v7, 0.0  ;;  %v6327_v3 = vadd.f32 %v9683_v41, %v9681_v1  ;;  %v9684_v22 = vld [vmem:[#allocation27_spill] sm:$0xff] }
 0x2f6   : > { %9680 = vst [vmem:[#allocation40_spill] sm:$0xff] %v9338_v18  ;;  %v4998_v31 = vmax.f32 %v6322_v61, 0.0  ;;  %v6329_v52 = vadd.f32 %v9685_v38, %v9684_v22  ;;  %v9688_v61 = vld [vmem:[#allocation25_spill] sm:$0xff] }
 0x2f7   : > { %v4999_v62 = vmax.f32 %v6324_v56, 0.0  ;;  %v6331_v57 = vadd.f32 %v9688_v61, %v9684_v22  ;;  %v9689_v56 = vld [vmem:[#allocation51_spill] sm:$0xff] }
 0x2f8   : > { %v5080_v9 = vpack.c.bf16 %v4998_v31, %v4996_v0  ;;  %v4678_v15 = vpop.f32.mrb[140].mxu1 }
 0x2f9   : > { %v5081_v16 = vpack.c.bf16 %v4999_v62, %v4997_v19  ;;  %v4801_v27 = vpop.f32.mrb[20].mxu0  ;;  %v9347_v11 = vadd.f32 %v9686_v39, %v4678_v15  ;;  %v4680_v30 = vpop.f32.mrb[141].mxu1  ;;  %v9691_v62 = vld [vmem:[#allocation52_spill] sm:$0xff] }
 0x2fa   : > { %v6326_v58 = vadd.f32 %v6325_v40, %v4801_v27  ;;  %v4803_v7 = vpop.f32.mrb[21].mxu0  ;;  %v9352_v0 = vadd.f32 %v9689_v56, %v4680_v30  ;;  %v4682_v1 = vpop.f32.mrb[142].mxu1  ;;  %v9693_v40 = vld [vmem:[#allocation53_spill] sm:$0xff]  ;;  %v9694_v56 = vld [vmem:[#allocation30_spill] sm:$0xff] }
 0x2fb   : > { %9687 = vst [vmem:[#allocation41_spill] sm:$0xff] %v9347_v11  ;;  %v6328_v31 = vadd.f32 %v6327_v3, %v4803_v7  ;;  %v4805_v19 = vpop.f32.mrb[22].mxu0  ;;  %5331 = vmatprep.subr.bf16.mxu1 %v5081_v16  ;;  %v9355_v33 = vadd.f32 %v9691_v62, %v4682_v1  ;;  %v4684_v38 = vpop.f32.mrb[143].mxu1  ;;  %v9695_v3 = vld [vmem:[#allocation28_spill] sm:$0xff]  ;;  %v9696_v16 = vld [vmem:[#allocation29_spill] sm:$0xff] }
 0x2fc   : > { %9690 = vst [vmem:[#allocation18_spill] sm:$0xff] %v9352_v0  ;;  %v6330_v41 = vadd.f32 %v6329_v52, %v4805_v19  ;;  %v4807_v15 = vpop.f32.mrb[23].mxu0  ;;  %5332 = vmatpush1.bf16.msra.mxu1 %v5080_v9  ;;  %v9358_v27 = vadd.f32 %v9693_v40, %v4684_v38  ;;  %v5000_v11 = vmax.f32 %v6326_v58, 0.0  ;;  %v6333_v7 = vadd.f32 %v9695_v3, %v9694_v56  ;;  %v9698_v9 = vld [vmem:[#allocation31_spill] sm:$0xff]  ;;  %v9699_v38 = vld [vmem:[#allocation54_spill] sm:$0xff] }
 0x2fd   : > { %9692 = vst [vmem:[#allocation8_spill] sm:$0xff] %v9355_v33  ;;  %v6332_v39 = vadd.f32 %v6331_v57, %v4807_v15  ;;  %v5001_v61 = vmax.f32 %v6328_v31, 0.0  ;;  %v6335_v1 = vadd.f32 %v9696_v16, %v9694_v56  ;;  %v9697_v33 = vld [vmem:[#allocation32_spill] sm:$0xff] }
 0x2fe   : > { %v5002_v22 = vmax.f32 %v6330_v41, 0.0  ;;  %v6337_v18 = vadd.f32 %v9698_v9, %v9697_v33  ;;  %v9701_v41 = vld [vmem:[#allocation33_spill] sm:$0xff] }
 0x2ff   : > { %v5003_v30 = vmax.f32 %v6332_v39, 0.0  ;;  %v6339_v15 = vadd.f32 %v9701_v41, %v9697_v33  ;;  %v9702_v39 = vld [vmem:[#allocation55_spill] sm:$0xff] }
 0x300   : > { %v5082_v0 = vpack.c.bf16 %v5002_v22, %v5000_v11  ;;  %v4688_v52 = vpop.f32.mrb[144].mxu1 }
 0x301   : > { %v5083_v62 = vpack.c.bf16 %v5003_v30, %v5001_v61  ;;  %v4811_v19 = vpop.f32.mrb[24].mxu0  ;;  %v9367_v40 = vadd.f32 %v9699_v38, %v4688_v52  ;;  %v4690_v57 = vpop.f32.mrb[145].mxu1  ;;  %v9704_v30 = vld [vmem:[#allocation56_spill] sm:$0xff] }
 0x302   : > { %v6334_v58 = vadd.f32 %v6333_v7, %v4811_v19  ;;  %v4813_v31 = vpop.f32.mrb[25].mxu0  ;;  %v9372_v11 = vadd.f32 %v9702_v39, %v4690_v57  ;;  %v4692_v56 = vpop.f32.mrb[146].mxu1  ;;  %v9705_v7 = vld [vmem:[#allocation57_spill] sm:$0xff] }
 0x303   : > { %9700 = vst [vmem:[#allocation9_spill] sm:$0xff] %v9367_v40  ;;  %v6336_v22 = vadd.f32 %v6335_v1, %v4813_v31  ;;  %v4815_v61 = vpop.f32.mrb[26].mxu0  ;;  %5333 = vmatprep.subr.bf16.mxu1 %v5083_v62  ;;  %v9375_v3 = vadd.f32 %v9704_v30, %v4692_v56  ;;  %v4694_v9 = vpop.f32.mrb[147].mxu1 }
 0x304   : > { %9703 = vst [vmem:[#allocation19_spill] sm:$0xff] %v9372_v11  ;;  %v6338_v16 = vadd.f32 %v6337_v18, %v4815_v61  ;;  %v4817_v52 = vpop.f32.mrb[27].mxu0  ;;  %5334 = vmatpush1.bf16.msra.mxu1 %v5082_v0  ;;  %v9378_v19 = vadd.f32 %v9705_v7, %v4694_v9  ;;  %v5004_v40 = vmax.f32 %v6334_v58, 0.0 }
 0x305   : > { %v6340_v38 = vadd.f32 %v6339_v15, %v4817_v52  ;;  %v5005_v41 = vmax.f32 %v6336_v22, 0.0  ;;  %v9706_v22 = vld [vmem:[#allocation58_spill] sm:$0xff]  ;;  %v9707_v52 = vld [vmem:[#allocation59_spill] sm:$0xff] }
 0x306   : > { %v5006_v33 = vmax.f32 %v6338_v16, 0.0 }
 0x307   : > { %v5007_v57 = vmax.f32 %v6340_v38, 0.0 }
 0x308   : > { %v5084_v39 = vpack.c.bf16 %v5006_v33, %v5004_v40  ;;  %v4698_v31 = vpop.f32.mrb[148].mxu1 }
 0x309   : > { %v5085_v1 = vpack.c.bf16 %v5007_v57, %v5005_v41  ;;  %v4821_v11 = vpop.f32.mrb[92].mxu0  ;;  %v9381_v62 = vadd.f32 %v9112_v12, %v4698_v31  ;;  %v4700_v56 = vpop.f32.mrb[149].mxu1 }
 0x30a   : > { %v6344_v18 = vadd.f32 %v9137_v29, %v4821_v11  ;;  %v4823_v61 = vpop.f32.mrb[93].mxu0  ;;  %v9385_v0 = vadd.f32 %v9114_v50, %v4700_v56  ;;  %v4702_v58 = vpop.f32.mrb[150].mxu1 }
 0x30b   : > { %v6348_v15 = vadd.f32 %v9143_v37, %v4823_v61  ;;  %v4825_v30 = vpop.f32.mrb[94].mxu0  ;;  %5335 = vmatprep.subr.bf16.mxu1 %v5085_v1  ;;  %v9389_v40 = vadd.f32 %v9706_v22, %v4702_v58  ;;  %v4704_v9 = vpop.f32.mrb[151].mxu1 }
 0x30c   : > { %v6352_v16 = vadd.f32 %v9149_v17, %v4825_v30  ;;  %v4827_v12 = vpop.f32.mrb[95].mxu0  ;;  %5336 = vmatpush1.bf16.msra.mxu1 %v5084_v39  ;;  %v9393_v29 = vadd.f32 %v9707_v52, %v4704_v9  ;;  %v5008_v50 = vmax.f32 %v6344_v18, 0.0 }
 0x30d   : > { %v6356_v11 = vadd.f32 %v9152_v55, %v4827_v12  ;;  %v5009_v38 = vmax.f32 %v6348_v15, 0.0 }
 0x30e   : > { %v5010_v7 = vmax.f32 %v6352_v16, 0.0 }
 0x30f   : > { %v5011_v37 = vmax.f32 %v6356_v11, 0.0 }
 0x310   : > { %v5086_v33 = vpack.c.bf16 %v5010_v7, %v5008_v50  ;;  %v4708_v57 = vpop.f32.mrb[152].mxu1 }
 0x311   : > { %v5087_v41 = vpack.c.bf16 %v5011_v37, %v5009_v38  ;;  %v4831_v1 = vpop.f32.mrb[96].mxu0  ;;  %v9397_v31 = vadd.f32 %v9127_v32, %v4708_v57  ;;  %v4710_v56 = vpop.f32.mrb[153].mxu1 }
 0x312   : > { %v6360_v17 = vadd.f32 %v9156_v26, %v4831_v1  ;;  %v4833_v39 = vpop.f32.mrb[97].mxu0  ;;  %v9401_v61 = vadd.f32 %v9129_v48, %v4710_v56  ;;  %v4712_v18 = vpop.f32.mrb[154].mxu1 }
 0x313   : > { %v6364_v55 = vadd.f32 %v9162_v49, %v4833_v39  ;;  %v4835_v58 = vpop.f32.mrb[98].mxu0  ;;  %5337 = vmatprep.subr.bf16.mxu1 %v5087_v41  ;;  %v9405_v15 = vadd.f32 %v9131_v24, %v4712_v18  ;;  %v4714_v22 = vpop.f32.mrb[155].mxu1 }
 0x314   : > { %v6368_v30 = vadd.f32 %v9168_v63, %v4835_v58  ;;  %v4837_v32 = vpop.f32.mrb[99].mxu0  ;;  %5338 = vmatpush1.bf16.msra.mxu1 %v5086_v33  ;;  %v9409_v26 = vadd.f32 %v9133_v20, %v4714_v22  ;;  %v5012_v48 = vmax.f32 %v6360_v17, 0.0 }
 0x315   : > { %v6372_v16 = vadd.f32 %v9171_v47, %v4837_v32  ;;  %v5013_v12 = vmax.f32 %v6364_v55, 0.0 }
 0x316   : > { %v5014_v9 = vmax.f32 %v6368_v30, 0.0 }
 0x317   : > { %v5015_v49 = vmax.f32 %v6372_v16, 0.0 }
 0x318   : > { %v5088_v52 = vpack.c.bf16 %v5014_v9, %v5012_v48 }
 0x319   : > { %v5089_v11 = vpack.c.bf16 %v5015_v49, %v5013_v12  ;;  %v4841_v50 = vpop.f32.mrb[100].mxu0 }
 0x31a   : > { %v6376_v24 = vadd.f32 %v9175_v44, %v4841_v50  ;;  %v4843_v7 = vpop.f32.mrb[101].mxu0 }
 0x31b   : > { %v6380_v63 = vadd.f32 %v9181_v21, %v4843_v7  ;;  %v4845_v38 = vpop.f32.mrb[102].mxu0  ;;  %5339 = vmatprep.subr.bf16.mxu1 %v5089_v11 }
 0x31c   : > { %v6384_v37 = vadd.f32 %v9184_v34, %v4845_v38  ;;  %v4847_v20 = vpop.f32.mrb[103].mxu0  ;;  %5340 = vmatpush1.bf16.msra.mxu1 %v5088_v52  ;;  %v5016_v33 = vmax.f32 %v6376_v24, 0.0 }
 0x31d   : > { %v6388_v47 = vadd.f32 %v9187_v25, %v4847_v20  ;;  %v5017_v57 = vmax.f32 %v6380_v63, 0.0 }
 0x31e   : > { %v5018_v41 = vmax.f32 %v6384_v37, 0.0 }
 0x31f   : > { %v5019_v1 = vmax.f32 %v6388_v47, 0.0 }
 0x320   : > { %v5090_v17 = vpack.c.bf16 %v5018_v41, %v5016_v33 }
 0x321   : > { %v5091_v56 = vpack.c.bf16 %v5019_v1, %v5017_v57  ;;  %v4851_v39 = vpop.f32.mrb[104].mxu0 }
 0x322   : > { %v6392_v44 = vadd.f32 %v9190_v46, %v4851_v39  ;;  %v4853_v55 = vpop.f32.mrb[105].mxu0 }
 0x323   : > { %v6396_v21 = vadd.f32 %v9193_v8, %v4853_v55  ;;  %v4855_v18 = vpop.f32.mrb[106].mxu0  ;;  %5341 = vmatprep.subr.bf16.mxu1 %v5091_v56 }
 0x324   : > { %v6400_v34 = vadd.f32 %v9196_v60, %v4855_v18  ;;  %v4857_v58 = vpop.f32.mrb[107].mxu0  ;;  %5342 = vmatpush1.bf16.msra.mxu1 %v5090_v17  ;;  %v5020_v30 = vmax.f32 %v6392_v44, 0.0 }
 0x325   : > { %v6404_v25 = vadd.f32 %v9199_v10, %v4857_v58  ;;  %v5021_v32 = vmax.f32 %v6396_v21, 0.0 }
 0x326   : > { %v5022_v22 = vmax.f32 %v6400_v34, 0.0 }
 0x327   : > { %v5023_v16 = vmax.f32 %v6404_v25, 0.0 }
 0x328   : > { %v5092_v48 = vpack.c.bf16 %v5022_v22, %v5020_v30 }
 0x329   : > { %v5093_v9 = vpack.c.bf16 %v5023_v16, %v5021_v32  ;;  %v4861_v12 = vpop.f32.mrb[108].mxu0 }
 0x32a   : > { %v6408_v46 = vadd.f32 %v9202_v43, %v4861_v12  ;;  %v4863_v49 = vpop.f32.mrb[109].mxu0 }
 0x32b   : > { %v6412_v8 = vadd.f32 %v9205_v42, %v4863_v49  ;;  %v4865_v52 = vpop.f32.mrb[110].mxu0  ;;  %5343 = vmatprep.subr.bf16.mxu1 %v5093_v9 }
 0x32c   : > { %v6416_v60 = vadd.f32 %v9208_v59, %v4865_v52  ;;  %v4867_v11 = vpop.f32.mrb[111].mxu0  ;;  %5344 = vmatpush1.bf16.msra.mxu1 %v5092_v48  ;;  %v5024_v50 = vmax.f32 %v6408_v46, 0.0 }
 0x32d   : > { %v6420_v10 = vadd.f32 %v9211_v53, %v4867_v11  ;;  %v5025_v7 = vmax.f32 %v6412_v8, 0.0 }
 0x32e   : > { %v5026_v24 = vmax.f32 %v6416_v60, 0.0 }
 0x32f   : > { %v5027_v63 = vmax.f32 %v6420_v10, 0.0 }
 0x330   : > { %v5094_v38 = vpack.c.bf16 %v5026_v24, %v5024_v50 }
 0x331   : > { %v5095_v37 = vpack.c.bf16 %v5027_v63, %v5025_v7  ;;  %v4871_v20 = vpop.f32.mrb[112].mxu0  ;;  %v9708_v7 = vld [vmem:[#allocation2_spill] sm:$0xff] }
 0x332   : > { %v6424_v43 = vadd.f32 %v9214_v36, %v4871_v20  ;;  %v4873_v47 = vpop.f32.mrb[113].mxu0  ;;  %v9710_v20 = vld [vmem:[#allocation3_spill] sm:$0xff] }
 0x333   : > { %v6428_v42 = vadd.f32 %v9217_v35, %v4873_v47  ;;  %v4875_v33 = vpop.f32.mrb[114].mxu0  ;;  %5345 = vmatprep.subr.bf16.mxu1 %v5095_v37 }
 0x334   : > { %v6432_v59 = vadd.f32 %v9220_v14, %v4875_v33  ;;  %v4877_v41 = vpop.f32.mrb[115].mxu0  ;;  %5346 = vmatpush1.bf16.msra.mxu1 %v5094_v38  ;;  %v5028_v57 = vmax.f32 %v6424_v43, 0.0  ;;  %v9709_v38 = vld [vmem:[#allocation34_spill] sm:$0xff] }
 0x335   : > { %v6436_v53 = vadd.f32 %v9223_v13, %v4877_v41  ;;  %v5029_v17 = vmax.f32 %v6428_v42, 0.0 }
 0x336   : > { %v5030_v1 = vmax.f32 %v6432_v59, 0.0 }
 0x337   : > { %v5031_v56 = vmax.f32 %v6436_v53, 0.0 }
 0x338   : > { %v5096_v39 = vpack.c.bf16 %v5030_v1, %v5028_v57  ;;  %v9711_v57 = vld [vmem:[#allocation35_spill] sm:$0xff] }
 0x339   : > { %v5097_v44 = vpack.c.bf16 %v5031_v56, %v5029_v17  ;;  %v4881_v55 = vpop.f32.mrb[116].mxu0  ;;  %v9712_v17 = vld [vmem:[#allocation36_spill] sm:$0xff] }
 0x33a   : > { %v6440_v36 = vadd.f32 %v9226_v45, %v4881_v55  ;;  %v4883_v21 = vpop.f32.mrb[117].mxu0  ;;  %v9713_v55 = vld [vmem:[#allocation37_spill] sm:$0xff] }
 0x33b   : > { %v6444_v35 = vadd.f32 %v9229_v2, %v4883_v21  ;;  %v4885_v18 = vpop.f32.mrb[118].mxu0  ;;  %5347 = vmatprep.subr.bf16.mxu1 %v5097_v44  ;;  %v7604_v44 = vld [vmem:[%s9555_s3] ss:$12 sps:$4 sm:$0xff]  }
 0x33c   : > { %v6448_v14 = vadd.f32 %v9232_v5, %v4885_v18  ;;  %v4887_v34 = vpop.f32.mrb[119].mxu0  ;;  %5348 = vmatpush1.bf16.msra.mxu1 %v5096_v39  ;;  %v5032_v58 = vmax.f32 %v6440_v36, 0.0  ;;  %v9714_v18 = vld [vmem:[#allocation14_spill] sm:$0xff] }
 0x33d   : > { %v6452_v13 = vadd.f32 %v9235_v54, %v4887_v34  ;;  %v5033_v30 = vmax.f32 %v6444_v35, 0.0  ;;  %v7607_v35 = vld [vmem:[%s9555_s3 + $0x1c] ss:$12 sps:$4 sm:$0xff]  }
 0x33e   : > { %v5034_v25 = vmax.f32 %v6448_v14, 0.0 }
 0x33f   : > { %v5035_v22 = vmax.f32 %v6452_v13, 0.0 }
 0x340   : > { %v5098_v32 = vpack.c.bf16 %v5034_v25, %v5032_v58 }
 0x341   : > { %v5099_v16 = vpack.c.bf16 %v5035_v22, %v5033_v30  ;;  %v4891_v48 = vpop.f32.mrb[120].mxu0 }
 0x342   : > { %v6456_v45 = vadd.f32 %v9244_v6, %v4891_v48  ;;  %v4893_v9 = vpop.f32.mrb[121].mxu0 }
 0x343   : > { %v6460_v2 = vadd.f32 %v9249_v23, %v4893_v9  ;;  %v4895_v12 = vpop.f32.mrb[122].mxu0  ;;  %5349 = vmatprep.subr.bf16.mxu1 %v5099_v16  ;;  %v9715_v16 = vld [vmem:[#allocation4_spill] sm:$0xff]  ;;  %v9716_v9 = vld [vmem:[#allocation5_spill] sm:$0xff] }
 0x344   : > { %v6464_v5 = vadd.f32 %v9252_v28, %v4895_v12  ;;  %v4897_v46 = vpop.f32.mrb[123].mxu0  ;;  %5350 = vmatpush1.bf16.msra.mxu1 %v5098_v32  ;;  %v5036_v49 = vmax.f32 %v6456_v45, 0.0 }
 0x345   : > { %v6468_v54 = vadd.f32 %v9255_v4, %v4897_v46  ;;  %v5037_v52 = vmax.f32 %v6460_v2, 0.0  ;;  %v9717_v46 = vld [vmem:[#allocation16_spill] sm:$0xff] }
 0x346   : > { %v5038_v8 = vmax.f32 %v6464_v5, 0.0  ;;  %v7609_v5 = vld [vmem:[%s9555_s3 + $0x18] ss:$12 sps:$4 sm:$0xff]  }
 0x347   : > { %v5039_v60 = vmax.f32 %v6468_v54, 0.0 }
 0x348   : > { %v5100_v11 = vpack.c.bf16 %v5038_v8, %v5036_v49  ;;  %v7610_v8 = vld [vmem:[%s9555_s3 + $0x34] ss:$12 sps:$4 sm:$0xff]  }
 0x349   : > { %v5101_v10 = vpack.c.bf16 %v5039_v60, %v5037_v52  ;;  %v4901_v50 = vpop.f32.mrb[124].mxu0  ;;  %v9718_v52 = vld [vmem:[#allocation6_spill] sm:$0xff] }
 0x34a   : > { %v6472_v6 = vadd.f32 %v9267_v51, %v4901_v50  ;;  %v4903_v24 = vpop.f32.mrb[125].mxu0 }
 0x34b   : > { %v6476_v23 = vadd.f32 %v9708_v7, %v4903_v24  ;;  %v4905_v63 = vpop.f32.mrb[126].mxu0  ;;  %5351 = vmatprep.subr.bf16.mxu1 %v5101_v10 }
 0x34c   : > { %v6480_v28 = vadd.f32 %v9709_v38, %v4905_v63  ;;  %v4907_v37 = vpop.f32.mrb[127].mxu0  ;;  %5352 = vmatpush1.bf16.msra.mxu1 %v5100_v11  ;;  %v5040_v43 = vmax.f32 %v6472_v6, 0.0  ;;  %v9719_v63 = vld [vmem:[#allocation38_spill] sm:$0xff] }
 0x34d   : > { %v6484_v4 = vadd.f32 %v9710_v20, %v4907_v37  ;;  %v5041_v42 = vmax.f32 %v6476_v23, 0.0  ;;  %v9720_v37 = vld [vmem:[#allocation7_spill] sm:$0xff] }
 0x34e   : > { %v5042_v47 = vmax.f32 %v6480_v28, 0.0 }
 0x34f   : > { %v5043_v33 = vmax.f32 %v6484_v4, 0.0 }
 0x350   : > { %v5102_v59 = vpack.c.bf16 %v5042_v47, %v5040_v43  ;;  %v7612_v43 = vld [vmem:[%s9555_s3 + $0x30] ss:$12 sps:$4 sm:$0xff]   ;;  %v9721_v47 = vld [vmem:[#allocation39_spill] sm:$0xff] }
 0x351   : > { %v5103_v41 = vpack.c.bf16 %v5043_v33, %v5041_v42  ;;  %v4911_v53 = vpop.f32.mrb[128].mxu0 }
 0x352   : > { %v6488_v51 = vadd.f32 %v9711_v57, %v4911_v53  ;;  %v4913_v1 = vpop.f32.mrb[129].mxu0 }
 0x353   : > { %v6492_v56 = vadd.f32 %v9712_v17, %v4913_v1  ;;  %v4915_v39 = vpop.f32.mrb[130].mxu0  ;;  %5353 = vmatprep.subr.bf16.mxu1 %v5103_v41  ;;  %v9722_v41 = vld [vmem:[#allocation40_spill] sm:$0xff] }
 0x354   : > { %v6496_v36 = vadd.f32 %v9713_v55, %v4915_v39  ;;  %v4917_v21 = vpop.f32.mrb[131].mxu0  ;;  %5354 = vmatpush1.bf16.msra.mxu1 %v5102_v59  ;;  %v5044_v34 = vmax.f32 %v6488_v51, 0.0  ;;  %v7613_v59 = vld [vmem:[%s9555_s3 + $0x4c] ss:$12 sps:$4 sm:$0xff]  }
 0x355   : > { %v6500_v14 = vadd.f32 %v9714_v18, %v4917_v21  ;;  %v5045_v58 = vmax.f32 %v6492_v56, 0.0  ;;  %v9723_v55 = vld [vmem:[#allocation41_spill] sm:$0xff] }
 0x356   : > { %v5046_v13 = vmax.f32 %v6496_v36, 0.0 }
 0x357   : > { %v5047_v25 = vmax.f32 %v6500_v14, 0.0  ;;  %5356 = vmatmul.mubr.bf16.vlgmr.msra.gmra.mrb[156].mxu1 %v7604_v44 }
 0x358   : > { %v5104_v30 = vpack.c.bf16 %v5046_v13, %v5044_v34  ;;  %5365 = vmatprep.mubr.bf16.mxu1 %v7607_v35  ;;  %v9724_v35 = vld [vmem:[#allocation18_spill] sm:$0xff]  ;;  %v7615_v34 = vld [vmem:[%s9555_s3 + $0x48] ss:$12 sps:$4 sm:$0xff]  }
 0x359   : > { %v5105_v22 = vpack.c.bf16 %v5047_v25, %v5045_v58  ;;  %v4921_v32 = vpop.f32.mrb[132].mxu0  ;;  %v9725_v13 = vld [vmem:[#allocation8_spill] sm:$0xff] }
 0x35a   : > { %v6504_v48 = vadd.f32 %v9715_v16, %v4921_v32  ;;  %v4923_v45 = vpop.f32.mrb[133].mxu0 }
 0x35b   : > { %v6508_v2 = vadd.f32 %v9716_v9, %v4923_v45  ;;  %v4925_v12 = vpop.f32.mrb[134].mxu0  ;;  %5416 = vmatprep.subr.bf16.mxu1 %v5105_v22 }
 0x35c   : > { %v6512_v54 = vadd.f32 %v9717_v46, %v4925_v12  ;;  %v4927_v49 = vpop.f32.mrb[135].mxu0  ;;  %5417 = vmatpush1.bf16.msra.mxu1 %v5104_v30  ;;  %v5048_v11 = vmax.f32 %v6504_v48, 0.0  ;;  %v7616_v30 = vld [vmem:[%s9555_s3 + $0x64] ss:$12 sps:$4 sm:$0xff]  }
 0x35d   : > { %v6516_v60 = vadd.f32 %v9718_v52, %v4927_v49  ;;  %v5049_v50 = vmax.f32 %v6508_v2, 0.0  ;;  %v9727_v49 = vld [vmem:[#allocation19_spill] sm:$0xff] }
 0x35e   : > { %v5050_v10 = vmax.f32 %v6512_v54, 0.0 }
 0x35f   : > { %v5051_v6 = vmax.f32 %v6516_v60, 0.0  ;;  %5366 = vmatmul.mubr.bf16.gmra.mrb[160].mxu1 %v7609_v5  ;;  %v9726_v5 = vld [vmem:[#allocation9_spill] sm:$0xff] }
 0x360   : > { %v5106_v24 = vpack.c.bf16 %v5050_v10, %v5048_v11  ;;  %5375 = vmatprep.mubr.bf16.mxu1 %v7610_v8  ;;  %v7619_v10 = vld [vmem:[%s9555_s3 + $0x7c] ss:$12 sps:$4 sm:$0x3f]  }
 0x361   : > { %v5107_v7 = vpack.c.bf16 %v5051_v6, %v5049_v50  ;;  %v4931_v23 = vpop.f32.mrb[136].mxu0 }
 0x362   : > { %v6520_v38 = vadd.f32 %v9719_v63, %v4931_v23  ;;  %v4933_v28 = vpop.f32.mrb[137].mxu0 }
 0x363   : > { %v6524_v20 = vadd.f32 %v9720_v37, %v4933_v28  ;;  %v4935_v4 = vpop.f32.mrb[138].mxu0  ;;  %5418 = vmatprep.subr.bf16.mxu1 %v5107_v7 }
 0x364   : > { %v6528_v42 = vadd.f32 %v9721_v47, %v4935_v4  ;;  %v4937_v33 = vpop.f32.mrb[139].mxu0  ;;  %5419 = vmatpush1.bf16.msra.mxu1 %v5106_v24  ;;  %v5052_v57 = vmax.f32 %v6520_v38, 0.0 }
 0x365   : > { %v6532_v53 = vadd.f32 %v9722_v41, %v4937_v33  ;;  %v5053_v1 = vmax.f32 %v6524_v20, 0.0 }
 0x366   : > { %v5054_v51 = vmax.f32 %v6528_v42, 0.0 }
 0x367   : > { %v5055_v17 = vmax.f32 %v6532_v53, 0.0  ;;  %5376 = vmatmul.mubr.bf16.gmra.mrb[164].mxu1 %v7612_v43 }
 0x368   : > { %v5108_v56 = vpack.c.bf16 %v5054_v51, %v5052_v57  ;;  %5385 = vmatprep.mubr.bf16.mxu1 %v7613_v59  ;;  %v9728_v57 = vmov 0  }
 0x369   : > { %v5109_v39 = vpack.c.bf16 %v5055_v17, %v5053_v1  ;;  %v4941_v44 = vpop.f32.mrb[140].mxu0 }
 0x36a   : > { %v6536_v36 = vadd.f32 %v9723_v55, %v4941_v44  ;;  %v4943_v21 = vpop.f32.mrb[141].mxu0 }
 0x36b   : > { %v6540_v18 = vadd.f32 %v9724_v35, %v4943_v21  ;;  %v4945_v14 = vpop.f32.mrb[142].mxu0  ;;  %5420 = vmatprep.subr.bf16.mxu1 %v5109_v39 }
 0x36c   : > { %v6544_v58 = vadd.f32 %v9725_v13, %v4945_v14  ;;  %v4947_v25 = vpop.f32.mrb[143].mxu0  ;;  %5421 = vmatpush1.bf16.msra.mxu1 %v5108_v56  ;;  %v5056_v32 = vmax.f32 %v6536_v36, 0.0  ;;  %v7627_v13 = vld [vmem:[%s9555_s3 + $0x80] ss:$12 sps:$4 sm:$0x3f]  }
 0x36d   : > { %v6548_v22 = vadd.f32 %v9358_v27, %v4947_v25  ;;  %v5057_v48 = vmax.f32 %v6540_v18, 0.0  ;;  %v7618_v27 = vld [vmem:[%s9555_s3 + $0x60] ss:$12 sps:$4 sm:$0xff]  }
 0x36e   : > { %v5058_v16 = vmax.f32 %v6544_v58, 0.0  ;;  %v5157_v58 = vpop.permute.xlu0 %5156 }
 0x36f   : > { %v5059_v45 = vmax.f32 %v6548_v22, 0.0  ;;  %5386 = vmatmul.mubr.bf16.gmra.mrb[168].mxu1 %v7615_v34  ;;  %v7626_v34 = vld [vmem:[%s9555_s3 + $0x68] ss:$12 sps:$4 sm:$0xff]  }
 0x370   : > { %v5110_v9 = vpack.c.bf16 %v5058_v16, %v5056_v32  ;;  %5395 = vmatprep.mubr.bf16.mxu1 %v7616_v30  ;;  %v5162_v32 = vpop.permute.xlu1 %5161 }
 0x371   : > { %v5111_v2 = vpack.c.bf16 %v5059_v45, %v5057_v48  ;;  %v4951_v12 = vpop.f32.mrb[144].mxu0 }
 0x372   : > { %v6552_v46 = vadd.f32 %v9726_v5, %v4951_v12  ;;  %v4953_v54 = vpop.f32.mrb[145].mxu0 }
 0x373   : > { %v6556_v8 = vadd.f32 %v9727_v49, %v4953_v54  ;;  %v4955_v52 = vpop.f32.mrb[146].mxu0  ;;  %5422 = vmatprep.subr.bf16.mxu1 %v5111_v2 }
 0x374   : > { %v6560_v60 = vadd.f32 %v9375_v3, %v4955_v52  ;;  %v4957_v11 = vpop.f32.mrb[147].mxu0  ;;  %5423 = vmatpush1.bf16.msra.mxu1 %v5110_v9  ;;  %v5060_v6 = vmax.f32 %v6552_v46, 0.0 }
 0x375   : > { %v6564_v50 = vadd.f32 %v9378_v19, %v4957_v11  ;;  %v5061_v7 = vmax.f32 %v6556_v8, 0.0  ;;  %v7621_v19 = vld [vmem:[%s9555_s3 + $0x78] ss:$12 sps:$4 sm:$0x3f]   ;;  %v5167_v8 = vpop.permute.xlu0 %5166 }
 0x376   : > { %v5062_v24 = vmax.f32 %v6560_v60, 0.0 }
 0x377   : > { %v5063_v23 = vmax.f32 %v6564_v50, 0.0  ;;  %5396 = vmatmul.mubr.bf16.gmra.mrb[172].mxu1 %v7618_v27 }
 0x378   : > { %v5112_v63 = vpack.c.bf16 %v5062_v24, %v5060_v6  ;;  %5405 = vmatprep.mubr.bf16.mxu1 %v7619_v10  ;;  %v5172_v10 = vpop.permute.xlu1 %5171 }
 0x379   : > { %v5113_v38 = vpack.c.bf16 %v5063_v23, %v5061_v7  ;;  %v4961_v28 = vpop.f32.mrb[148].mxu0 }
 0x37a   : > { %v6568_v37 = vadd.f32 %v9381_v62, %v4961_v28  ;;  %v4963_v3 = vpop.f32.mrb[149].mxu0 }
 0x37b   : > { %v6572_v20 = vadd.f32 %v9385_v0, %v4963_v3  ;;  %v4965_v4 = vpop.f32.mrb[150].mxu0  ;;  %5424 = vmatprep.subr.bf16.mxu1 %v5113_v38 }
 0x37c   : > { %v6576_v43 = vadd.f32 %v9389_v40, %v4965_v4  ;;  %v4967_v47 = vpop.f32.mrb[151].mxu0  ;;  %5425 = vmatpush1.bf16.msra.mxu1 %v5112_v63  ;;  %v5064_v33 = vmax.f32 %v6568_v37, 0.0 }
 0x37d   : > { %v6580_v42 = vadd.f32 %v9393_v29, %v4967_v47  ;;  %v5065_v41 = vmax.f32 %v6572_v20, 0.0  ;;  %v5177_v20 = vpop.permute.xlu0 %5176 }
 0x37e   : > { %v5066_v59 = vmax.f32 %v6576_v43, 0.0 }
 0x37f   : > { %v5067_v53 = vmax.f32 %v6580_v42, 0.0  ;;  %5406 = vmatmul.mubr.bf16.gmra.mrb[176].mxu1 %v7621_v19  ;;  %v5182_v42 = vpop.permute.xlu1 %5181 }
 0x380   : > { %v5114_v62 = vpack.c.bf16 %v5066_v59, %v5064_v33  ;;  %5448 = vmatprep.mubr.bf16.mxu1 %v9728_v57 }
 0x381   : > { %v5115_v0 = vpack.c.bf16 %v5067_v53, %v5065_v41  ;;  %v4971_v51 = vpop.f32.mrb[152].mxu0 }
 0x382   : > { %v6584_v1 = vadd.f32 %v9397_v31, %v4971_v51  ;;  %v4973_v17 = vpop.f32.mrb[153].mxu0  ;;  %v7622_v31 = vld [vmem:[%s9555_s3 + $0x8] ss:$12 sps:$4 sm:$0xff]  }
 0x383   : > { %v6588_v56 = vadd.f32 %v9401_v61, %v4973_v17  ;;  %v4975_v40 = vpop.f32.mrb[154].mxu0  ;;  %5426 = vmatprep.subr.bf16.mxu1 %v5115_v0  ;;  %v7623_v61 = vld [vmem:[%s9555_s3 + $0x20] ss:$12 sps:$4 sm:$0xff]  }
 0x384   : > { %v6592_v39 = vadd.f32 %v9405_v15, %v4975_v40  ;;  %v4977_v29 = vpop.f32.mrb[155].mxu0  ;;  %5427 = vmatpush1.bf16.msra.mxu1 %v5114_v62  ;;  %v5068_v55 = vmax.f32 %v6584_v1, 0.0  ;;  %v7624_v15 = vld [vmem:[%s9555_s3 + $0x38] ss:$12 sps:$4 sm:$0xff]   ;;  %v5187_v40 = vpop.permute.xlu0 %5186 }
 0x385   : > { %v6596_v44 = vadd.f32 %v9409_v26, %v4977_v29  ;;  %v5069_v21 = vmax.f32 %v6588_v56, 0.0  ;;  %v7625_v26 = vld [vmem:[%s9555_s3 + $0x50] ss:$12 sps:$4 sm:$0xff]  }
 0x386   : > { %v5070_v36 = vmax.f32 %v6592_v39, 0.0 }
 0x387   : > { %v5071_v35 = vmax.f32 %v6596_v44, 0.0 }
 0x388   : > { %v5116_v18 = vpack.c.bf16 %v5070_v36, %v5068_v55  ;;  %v5192_v36 = vpop.permute.xlu1 %5191 }
 0x389   : > { %v5117_v14 = vpack.c.bf16 %v5071_v35, %v5069_v21 }
 0x38b   : > { %5428 = vmatprep.subr.bf16.mxu1 %v5117_v14 }
 0x38c   : > { %5429 = vmatpush1.bf16.msra.mxu1 %v5116_v18 }
 0x38f   : > { %6240 = vmatmul.mubr.msk.bf16.vlgmr.msra.gmra.mrb[156].mxu1 %vm5304_vm1, %v7622_v31 }
 0x390   : > { %5458 = vmatprep.mubr.bf16.mxu1 %v9728_v57 }
 0x397   : > { %6241 = vmatmul.mubr.msk.bf16.gmra.mrb[160].mxu1 %vm5304_vm1, %v7623_v61 }
 0x398   : > { %5468 = vmatprep.mubr.bf16.mxu1 %v9728_v57 }
 0x39f   : > { %6242 = vmatmul.mubr.msk.bf16.gmra.mrb[164].mxu1 %vm5304_vm1, %v7624_v15 }
 0x3a0   : > { %5478 = vmatprep.mubr.bf16.mxu1 %v9728_v57 }
 0x3a7   : > { %6243 = vmatmul.mubr.msk.bf16.gmra.mrb[168].mxu1 %vm5304_vm1, %v7625_v26 }
 0x3a8   : > { %5488 = vmatprep.mubr.bf16.mxu1 %v9728_v57 }
 0x3af   : > { %6244 = vmatmul.mubr.msk.bf16.gmra.mrb[172].mxu1 %vm5304_vm1, %v7626_v34 }
 0x3b0   : > { %5498 = vmatprep.mubr.bf16.mxu1 %v9728_v57 }
 0x3b7   : > { %6245 = vmatmul.mubr.msk.bf16.gmra.mrb[176].mxu1 %vm5304_vm1, %v7627_v13 }
 0x3b8   : > { %5620 = vmatprep.mubr.bf16.mxu1 %v9728_v57 }
 0x462   : > { %v5450_v25 = vpop.f32.mrb[156].mxu1 }
 0x463   : > { %v6597_v30 = vadd.f32 %v5450_v25, %v5157_v58  ;;  %v5452_v22 = vpop.f32.mrb[157].mxu1 }
 0x464   : > { %v6598_v16 = vadd.f32 %v5452_v22, %v5157_v58  ;;  %v5454_v48 = vpop.f32.mrb[158].mxu1  ;;  %v5197_v58 = vpop.permute.xlu0 %5196 }
 0x465   : > { %v6599_v45 = vadd.f32 %v5454_v48, %v5162_v32  ;;  %v5456_v9 = vpop.f32.mrb[159].mxu1  ;;  %v5509_v12 = vmax.f32 %v6597_v30, 0.0 }
 0x466   : > { %v6600_v2 = vadd.f32 %v5456_v9, %v5162_v32  ;;  %v5510_v46 = vmax.f32 %v6598_v16, 0.0  ;;  %v5202_v16 = vpop.permute.xlu1 %5201 }
 0x467   : > { %v5511_v5 = vmax.f32 %v6599_v45, 0.0 }
 0x468   : > { %v5512_v54 = vmax.f32 %v6600_v2, 0.0 }
 0x469   : > { %v5533_v49 = vpack.c.bf16 %v5511_v5, %v5509_v12 }
 0x46a   : > { %v5534_v52 = vpack.c.bf16 %v5512_v54, %v5510_v46  ;;  %v5460_v27 = vpop.f32.mrb[160].mxu1 }
 0x46b   : > { %v6601_v60 = vadd.f32 %v5460_v27, %v5167_v8  ;;  %v5462_v11 = vpop.f32.mrb[161].mxu1 }
 0x46c   : > { %v6602_v50 = vadd.f32 %v5462_v11, %v5167_v8  ;;  %v5464_v6 = vpop.f32.mrb[162].mxu1  ;;  %5588 = vmatprep.subr.bf16.mxu1 %v5534_v52  ;;  %v5207_v52 = vpop.permute.xlu0 %5206 }
 0x46d   : > { %v6603_v24 = vadd.f32 %v5464_v6, %v5172_v10  ;;  %v5466_v7 = vpop.f32.mrb[163].mxu1  ;;  %5589 = vmatpush1.bf16.msra.mxu1 %v5533_v49  ;;  %v5513_v63 = vmax.f32 %v6601_v60, 0.0 }
 0x46e   : > { %v6604_v23 = vadd.f32 %v5466_v7, %v5172_v10  ;;  %v5514_v28 = vmax.f32 %v6602_v50, 0.0  ;;  %v5212_v50 = vpop.permute.xlu1 %5211 }
 0x46f   : > { %v5515_v38 = vmax.f32 %v6603_v24, 0.0 }
 0x470   : > { %v5516_v37 = vmax.f32 %v6604_v23, 0.0 }
 0x471   : > { %v5535_v3 = vpack.c.bf16 %v5515_v38, %v5513_v63 }
 0x472   : > { %v5536_v4 = vpack.c.bf16 %v5516_v37, %v5514_v28  ;;  %v5470_v19 = vpop.f32.mrb[164].mxu1 }
 0x473   : > { %v6605_v43 = vadd.f32 %v5470_v19, %v5177_v20  ;;  %v5472_v47 = vpop.f32.mrb[165].mxu1 }
 0x474   : > { %v6606_v33 = vadd.f32 %v5472_v47, %v5177_v20  ;;  %v5474_v59 = vpop.f32.mrb[166].mxu1  ;;  %5590 = vmatprep.subr.bf16.mxu1 %v5536_v4  ;;  %v7629_v47 = vld [vmem:[%s9557_s5 + $0x8] ss:$0 sps:$4 sm:$0x77]  }
 0x475   : > { %v6607_v41 = vadd.f32 %v5474_v59, %v5182_v42  ;;  %v5476_v53 = vpop.f32.mrb[167].mxu1  ;;  %5591 = vmatpush1.bf16.msra.mxu1 %v5535_v3  ;;  %v5517_v0 = vmax.f32 %v6605_v43, 0.0  ;;  %v7628_v43 = vld [vmem:[%s9557_s5] sm:$0xff]  }
 0x476   : > { %v6608_v62 = vadd.f32 %v5476_v53, %v5182_v42  ;;  %v5518_v1 = vmax.f32 %v6606_v33, 0.0  ;;  %v5554_v42 = vpop.permute.xlu0 %5553  ;;  %v5559_v53 = vpop.permute.xlu1 %5558 }
 0x477   : > { %v5519_v51 = vmax.f32 %v6607_v41, 0.0 }
 0x478   : > { %v5520_v17 = vmax.f32 %v6608_v62, 0.0 }
 0x479   : > { %v5537_v56 = vpack.c.bf16 %v5519_v51, %v5517_v0 }
 0x47a   : > { %v5538_v39 = vpack.c.bf16 %v5520_v17, %v5518_v1  ;;  %v5480_v29 = vpop.f32.mrb[168].mxu1  ;;  %v5564_v17 = vpop.permute.xlu0 %5563 }
 0x47b   : > { %v6609_v44 = vadd.f32 %v5480_v29, %v5187_v40  ;;  %v5482_v55 = vpop.f32.mrb[169].mxu1 }
 0x47c   : > { %v6610_v21 = vadd.f32 %v5482_v55, %v5187_v40  ;;  %v5484_v35 = vpop.f32.mrb[170].mxu1  ;;  %5592 = vmatprep.subr.bf16.mxu1 %v5538_v39 }
 0x47d   : > { %v6611_v18 = vadd.f32 %v5484_v35, %v5192_v36  ;;  %v5486_v14 = vpop.f32.mrb[171].mxu1  ;;  %5593 = vmatpush1.bf16.msra.mxu1 %v5537_v56  ;;  %v5521_v61 = vmax.f32 %v6609_v44, 0.0 }
 0x47e   : > { %v6612_v31 = vadd.f32 %v5486_v14, %v5192_v36  ;;  %v5522_v26 = vmax.f32 %v6610_v21, 0.0 }
 0x47f   : > { %v5523_v15 = vmax.f32 %v6611_v18, 0.0 }
 0x480   : > { %v5524_v34 = vmax.f32 %v6612_v31, 0.0 }
 0x481   : > { %v5539_v13 = vpack.c.bf16 %v5523_v15, %v5521_v61 }
 0x482   : > { %v5540_v25 = vpack.c.bf16 %v5524_v34, %v5522_v26  ;;  %v5490_v30 = vpop.f32.mrb[172].mxu1 }
 0x483   : > { %v6613_v22 = vadd.f32 %v5490_v30, %v5197_v58  ;;  %v5492_v32 = vpop.f32.mrb[173].mxu1 }
 0x484   : > { %v6614_v48 = vadd.f32 %v5492_v32, %v5197_v58  ;;  %v5494_v45 = vpop.f32.mrb[174].mxu1  ;;  %5594 = vmatprep.subr.bf16.mxu1 %v5540_v25 }
 0x485   : > { %v6615_v9 = vadd.f32 %v5494_v45, %v5202_v16  ;;  %v5496_v2 = vpop.f32.mrb[175].mxu1  ;;  %5595 = vmatpush1.bf16.msra.mxu1 %v5539_v13  ;;  %v5525_v5 = vmax.f32 %v6613_v22, 0.0 }
 0x486   : > { %v6616_v12 = vadd.f32 %v5496_v2, %v5202_v16  ;;  %v5526_v54 = vmax.f32 %v6614_v48, 0.0 }
 0x487   : > { %v5527_v46 = vmax.f32 %v6615_v9, 0.0 }
 0x488   : > { %v5528_v49 = vmax.f32 %v6616_v12, 0.0 }
 0x489   : > { %v5541_v8 = vpack.c.bf16 %v5527_v46, %v5525_v5 }
 0x48a   : > { %v5542_v27 = vpack.c.bf16 %v5528_v49, %v5526_v54  ;;  %v5500_v60 = vpop.f32.mrb[176].mxu1 }
 0x48b   : > { %v6617_v11 = vadd.f32 %v5500_v60, %v5207_v52  ;;  %v5502_v10 = vpop.f32.mrb[177].mxu1 }
 0x48c   : > { %v6618_v6 = vadd.f32 %v5502_v10, %v5207_v52  ;;  %v5504_v24 = vpop.f32.mrb[178].mxu1  ;;  %5596 = vmatprep.subr.bf16.mxu1 %v5542_v27 }
 0x48d   : > { %v6619_v7 = vadd.f32 %v5504_v24, %v5212_v50  ;;  %v5506_v23 = vpop.f32.mrb[179].mxu1  ;;  %5597 = vmatpush1.bf16.msra.mxu1 %v5541_v8  ;;  %v5529_v38 = vmax.f32 %v6617_v11, 0.0 }
 0x48e   : > { %v6620_v63 = vadd.f32 %v5506_v23, %v5212_v50  ;;  %v5530_v37 = vmax.f32 %v6618_v6, 0.0 }
 0x48f   : > { %v5531_v28 = vmax.f32 %v6619_v7, 0.0 }
 0x490   : > { %v5532_v3 = vmax.f32 %v6620_v63, 0.0 }
 0x491   : > { %v5543_v20 = vpack.c.bf16 %v5531_v28, %v5529_v38 }
 0x492   : > { %v5544_v4 = vpack.c.bf16 %v5532_v3, %v5530_v37 }
 0x493   : > { %v5583_v19 = vsel %vm5581_vm2, %v5543_v20, 0 }
 0x494   : > { %6248 = vmatprep.subr.msk.bf16.mxu1 %vm5581_vm2, %v5544_v4 }
 0x495   : > { %5599 = vmatpush1.bf16.msra.mxu1 %v5583_v19 }
 0x498   : > { %6249 = vmatmul.mubr.msk.bf16.vlgmr.msra.gmra.mrb[180].mxu1 %vm5574_vm3, %v7628_v43 }
 0x499   : > { %5630 = vmatprep.mubr.bf16.mxu1 %v9728_v57 }
 0x4a0   : > { %6250 = vmatmul.mubr.msk.bf16.gmra.mrb[184].mxu1 %vm5574_vm3, %v7629_v47 }
 0x56b   : > { %v5622_v33 = vpop.f32.mrb[180].mxu1 }
 0x56c   : > { %v5623_v59 = vadd.f32 %v5622_v33, %v5554_v42  ;;  %v5624_v41 = vpop.f32.mrb[181].mxu1 }
 0x56d   : > { %v5625_v62 = vadd.f32 %v5624_v41, %v5554_v42  ;;  %v5626_v0 = vpop.f32.mrb[182].mxu1 }
 0x56e   : > { %5639 = vst [vmem:[%s316_s15] sm:$0xff] %v5623_v59  ;;  %v5627_v51 = vadd.f32 %v5626_v0, %v5559_v53  ;;  %v5628_v57 = vpop.f32.mrb[183].mxu1 }
 0x56f   : > { %5640 = vst [vmem:[%s316_s15 + $0x8] sm:$0xff] %v5625_v62  ;;  %v5629_v1 = vadd.f32 %v5628_v57, %v5559_v53 }
 0x570   : > { %5641 = vst [vmem:[%s316_s15 + $0x10] sm:$0xff] %v5627_v51 }
 0x571   : > { %5642 = vst [vmem:[%s316_s15 + $0x18] sm:$0xff] %v5629_v1 }
 0x573   : > { %v5632_v56 = vpop.f32.mrb[184].mxu1 }
 0x574   : > { %v5633_v40 = vadd.f32 %v5632_v56, %v5564_v17  ;;  %v5634_v39 = vpop.f32.mrb[185].mxu1 }
 0x575   : > { %v5635_v29 = vadd.f32 %v5634_v39, %v5564_v17  ;;  %v5636_v44 = vpop.f32.mrb[186].mxu1 }
 0x576   : > { %5643 = vst [vmem:[%s316_s15 + $0x20] sm:$0x1f] %v5633_v40  ;;  %v5637_v55 = vpop.f32.mrb[187].mxu1 }
 0x577   : > { %5644 = vst [vmem:[%s316_s15 + $0x28] sm:$0x1f] %v5635_v29 }
 0x578 PF: > { %s17_s26 = sadd.s32 1, %s7652_s26   ;;  %s9729_s24 = smov %s7648_s25 }
 0x579   : > { %p14_p5 = scmp.ge.s32.totalorder %s17_s26, 4   ;;  %s9730_s25 = smov %s9732_s27 }
 0x57b   :  { %16 = sbr.rel (!%p14_p5) target bundleno = 2 (0x2), region = 78 }

</bundles_post_ra>
